<compile_context>
chip_gen: v5e
topology: v5e:2x2
jax: 0.10.0
libtpu: 0.0.40
codegen_flags: <defaults>
</compile_context>

<pallas_src>
import math

import numpy as np
import jax
import jax.numpy as jnp
from jax.experimental import pallas as pl
from jax.experimental.pallas import tpu as pltpu

# ----------------------------- configuration -------------------------------
SEQ_LEN = 16       # configs.seq_len
ENC_IN = 4         # configs.enc_in (number of variables)
D_MODEL = 32       # configs.d_model
N_HEADS = 4        # configs.n_heads
D_FF = 64          # configs.d_ff
E_LAYERS = 2       # configs.e_layers
NUM_CLASS = 3      # configs.num_class
PATCH_LEN = 8
STRIDE = 8
PADDING = STRIDE   # padding = stride in Model.__init__
LN_EPS = 1e-5
NEG_INF = -1e30

assert STRIDE == PATCH_LEN  # non-overlapping patches -> static slices, no gather

N_PATCHES = (SEQ_LEN + PADDING - PATCH_LEN) // STRIDE + 1    # 3
TOK_PER_VAR = N_PATCHES + 1                                  # patches + global

# Row layout of the packed parameter-vector slab (every row is D_MODEL wide).
ROW_PRO_B = 0
ROW_BEH_B = 1
ROW_PATCH_B = 2
ROW_POS = 3                                  # N_PATCHES rows of positional emb
ROW_LN0 = ROW_POS + N_PATCHES                # per layer: ln1_g, ln1_b, ln2_g, ln2_b, ln3_g, ln3_b
ROW_NORM = ROW_LN0 + 6 * E_LAYERS            # encoder-final norm gamma, beta
ROW_PROJ_B = ROW_NORM + 2                    # projection bias (first NUM_CLASS lanes)
N_VEC_ROWS = ROW_PROJ_B + 1

VMEM_SPEC = pl.BlockSpec(memory_space=pltpu.MemorySpace.VMEM)


# ------------------------------ fused kernel --------------------------------
def _lbtt_forward_kernel(xt_ref, emb_ref, vec_ref, const_ref, attn_ref,
                         ffn1_ref, ffn2_ref, whead_ref, out_ref, x_sc):
    f32 = jnp.float32
    BN, L = xt_ref.shape              # B*enc_in, seq_len
    T, D = x_sc.shape                 # total tokens (= S*BN), d_model
    B, C = out_ref.shape              # batch, num_class
    H = N_HEADS
    dh = D // H
    n_layers = ffn1_ref.shape[0]
    S = T // BN
    P = S - 1
    G = P * BN                        # first row of the per-variable global tokens
    scale = 1.0 / math.sqrt(dh)

    V = vec_ref[...]                  # (N_VEC_ROWS, D) packed parameter vectors
    CONST = const_ref[...]            # (T+BN+B, T) packed masks / selectors
    self_bias = CONST[:T, :]                     # (T, T)   same-(batch,var) mask
    cross_bias = CONST[T:T + BN, :BN]            # (BN, BN) same-batch mask
    sel = CONST[T + BN:T + BN + B, :]            # (B, T)   batch row selector

    def vrow(i):
        return V[i:i + 1, :]

    def layer_norm(x, g, b):
        mu = jnp.mean(x, axis=-1, keepdims=True)
        xc = x - mu
        var = jnp.mean(xc * xc, axis=-1, keepdims=True)
        return xc * jax.lax.rsqrt(var + LN_EPS) * g + b

    # Per-head lane masks built in-kernel (head h owns lanes [h*dh, (h+1)*dh)).
    lane = jax.lax.broadcasted_iota(jnp.int32, (1, D), 1)
    head_mask = [((lane >= h * dh) & (lane < (h + 1) * dh)).astype(f32)
                 for h in range(H)]

    def mha(q_in, kv_in, A, bias, fused_qkv):
        # A: (D+1, 4D) = [Wq|Wk|Wv|Wo ; bq|bk|bv|bo]
        Tk = kv_in.shape[0]
        W = A[:D, :]
        brow = A[D:D + 1, :]
        if fused_qkv:                 # q_in is kv_in -> single QKV matmul
            qkv = (jnp.dot(q_in, W[:, :3 * D], preferred_element_type=f32)
                   + brow[:, :3 * D])
            q, k, v = qkv[:, :D], qkv[:, D:2 * D], qkv[:, 2 * D:3 * D]
        else:
            q = jnp.dot(q_in, W[:, :D], preferred_element_type=f32) + brow[:, :D]
            kv = (jnp.dot(kv_in, W[:, D:3 * D], preferred_element_type=f32)
                  + brow[:, D:3 * D])
            k, v = kv[:, :D], kv[:, D:]
        # Head-stacked K/V: row h*Tk + t carries only head h's lanes, so one
        # lane-dense score matmul replaces the per-head loop.
        k_cat = jnp.concatenate([k * head_mask[h] for h in range(H)], axis=0)  # (H*Tk, D)
        v_cat = jnp.concatenate([v * head_mask[h] for h in range(H)], axis=0)  # (H*Tk, D)
        s = jax.lax.dot_general(q, k_cat, (((1,), (1,)), ((), ())),
                                preferred_element_type=f32) * scale            # (Tq, H*Tk)
        # Per-head softmax over contiguous Tk-lane blocks (cheap VPU/EUP work).
        probs = []
        for h in range(H):
            sh = s[:, h * Tk:(h + 1) * Tk] + bias
            m = jnp.max(sh, axis=-1, keepdims=True)
            p = jnp.exp(sh - m)
            denom = jnp.sum(p, axis=-1, keepdims=True)
            probs.append(p * pl.reciprocal(denom, approx=True))                # EUP
        p_all = jnp.concatenate(probs, axis=1)                                 # (Tq, H*Tk)
        acc = jnp.dot(p_all, v_cat, preferred_element_type=f32)                # (Tq, D)
        return jnp.dot(acc, W[:, 3 * D:], preferred_element_type=f32) + brow[:, 3 * D:]

    # ---- embeddings ---------------------------------------------------------
    xt = xt_ref[...].astype(f32)                                               # (BN, L)
    EW = emb_ref[...]                                                          # (L, 3D)
    pro_beh = jnp.dot(xt, EW[:, :2 * D], preferred_element_type=f32)           # fused pro+beh
    enc_pro = pro_beh[:, :D] + vrow(ROW_PRO_B)                                 # (BN, D)
    cross = pro_beh[:, D:] + vrow(ROW_BEH_B)                                   # (BN, D)

    # Patch extraction: ReplicationPad1d((0, padding)) + non-overlapping slices.
    xp = jnp.concatenate(
        [xt, jnp.broadcast_to(xt[:, L - 1:L], (BN, PADDING))], axis=1)         # (BN, L+pad)
    patches = jnp.concatenate(
        [xp[:, p * PATCH_LEN:(p + 1) * PATCH_LEN] for p in range(P)], axis=0)  # (P*BN, PL)
    pos_big = jnp.concatenate(
        [jnp.broadcast_to(vrow(ROW_POS + p), (BN, D)) for p in range(P)], axis=0)
    patch_tok = (jnp.dot(patches, EW[:PATCH_LEN, 2 * D:], preferred_element_type=f32)
                 + vrow(ROW_PATCH_B) + pos_big)                                # (P*BN, D)

    # Token slab (VMEM scratch): row t = s*BN + (b*N + n); global token last.
    x_sc[...] = jnp.concatenate([patch_tok, enc_pro], axis=0)

    # ---- encoder layers -----------------------------------------------------
    # TODO(synk): reconstructed LBTTEncoderLayer (see module docstring).
    for l in range(n_layers):
        base = ROW_LN0 + 6 * l

        # self attention over each variable's S tokens (block-diagonal mask)
        x = x_sc[...]
        a = mha(x, x, attn_ref[2 * l + 0], self_bias, fused_qkv=True)
        x = layer_norm(x + a, vrow(base + 0), vrow(base + 1))
        x_sc[...] = x

        # cross attention: each variable's global token attends over the
        # behaviour tokens of its own batch sample; only rows G: are updated.
        x_glb = x[G:, :]                                                       # (BN, D)
        ga = mha(x_glb, cross, attn_ref[2 * l + 1], cross_bias, fused_qkv=False)
        x_sc[pl.ds(G, BN), :] = layer_norm(x_glb + ga, vrow(base + 2), vrow(base + 3))

        # pointwise FFN (Conv1d k=1 == Linear over D), ReLU activation
        x = x_sc[...]
        F1 = ffn1_ref[l]                                                       # (D+1, D_FF)
        F2 = ffn2_ref[l]                                                       # (D_FF+1, D)
        dff = F1.shape[1]
        y = jnp.maximum(
            jnp.dot(x, F1[:D, :], preferred_element_type=f32) + F1[D:D + 1, :], 0.0)
        y = jnp.dot(y, F2[:dff, :], preferred_element_type=f32) + F2[dff:dff + 1, :]
        x_sc[...] = layer_norm(x + y, vrow(base + 4), vrow(base + 5))

    # ---- encoder final norm + classification head ---------------------------
    xf = layer_norm(x_sc[...], vrow(ROW_NORM), vrow(ROW_NORM + 1))
    # logits[b, c] = sum_t sel[b, t] * <xf[t, :], whead[c, t, :]> + proj_b[c]
    cols = [jnp.sum(xf * whead_ref[c], axis=-1, keepdims=True) for c in range(C)]
    R = jnp.concatenate(cols, axis=1)                                          # (T, C)
    logits = jnp.dot(sel, R, preferred_element_type=f32) + vrow(ROW_PROJ_B)[:, :C]
    out_ref[...] = logits.astype(out_ref.dtype)


# ------------------------------ wrapper --------------------------------------
def positional_embedding(num_pos, d):
    pos = jnp.arange(num_pos, dtype=jnp.float32)[:, None]
    div = jnp.exp(jnp.arange(0, d, 2, dtype=jnp.float32) * (-math.log(10000.0) / d))
    pe = jnp.zeros((num_pos, d), jnp.float32)
    pe = pe.at[:, 0::2].set(jnp.sin(pos * div))
    pe = pe.at[:, 1::2].set(jnp.cos(pos * div))
    return pe


@jax.jit
def forward(packed, x_enc, x_mark_enc=None):
    """Model.forward -> classification logits.  x_enc: (B, seq_len, enc_in)."""
    del x_mark_enc  # unused by the classification path
    B, L, N = x_enc.shape
    assert L == SEQ_LEN and N == ENC_IN
    BN = B * N
    T = TOK_PER_VAR * BN
    xt = jnp.transpose(x_enc, (0, 2, 1)).reshape(BN, L).astype(jnp.float32)
    return pl.pallas_call(
        _lbtt_forward_kernel,
        out_shape=jax.ShapeDtypeStruct((B, NUM_CLASS), jnp.float32),
        in_specs=[VMEM_SPEC] * 8,
        out_specs=VMEM_SPEC,
        scratch_shapes=[pltpu.VMEM((T, D_MODEL), jnp.float32)],
    )(xt, packed["emb_w"], packed["vecs"], packed["consts"],
      packed["attn"], packed["ffn1"], packed["ffn2"], packed["whead"])


# --------------------------- parameter packing -------------------------------
def pack_params(params, batch_size):
    """One-time (outside jit) packing of logical params into 7 kernel operands."""
    B, N, D, C = batch_size, ENC_IN, D_MODEL, NUM_CLASS
    P, S = N_PATCHES, TOK_PER_VAR
    BN = B * N
    T = S * BN

    # embedding weights: [pro_w | beh_w | patch_w(zero-padded rows)]  -> (L, 3D)
    emb_w = jnp.zeros((SEQ_LEN, 3 * D), jnp.float32)
    emb_w = emb_w.at[:, :D].set(params["pro_w"])
    emb_w = emb_w.at[:, D:2 * D].set(params["beh_w"])
    emb_w = emb_w.at[:PATCH_LEN, 2 * D:].set(params["patch_w"])

    # all D-wide parameter vectors in one slab
    rows = [params["pro_b"], params["beh_b"], params["patch_b"], params["pos_pe"]]
    for layer in params["layers"]:
        rows += [layer["ln1_g"], layer["ln1_b"], layer["ln2_g"], layer["ln2_b"],
                 layer["ln3_g"], layer["ln3_b"]]
    rows += [params["norm_g"], params["norm_b"],
             jnp.zeros((1, D), jnp.float32).at[:, :C].set(params["proj_b"])]
    vecs = jnp.concatenate(rows, axis=0)
    assert vecs.shape == (N_VEC_ROWS, D)

    # attention weights+biases: (2*E_LAYERS, D+1, 4D), order [self, cross] per layer
    def pack_attn(layer, pre):
        w = jnp.concatenate([layer[pre + "_q_w"], layer[pre + "_k_w"],
                             layer[pre + "_v_w"], layer[pre + "_o_w"]], axis=1)
        b = jnp.concatenate([layer[pre + "_q_b"], layer[pre + "_k_b"],
                             layer[pre + "_v_b"], layer[pre + "_o_b"]], axis=1)
        return jnp.concatenate([w, b], axis=0)

    attn = jnp.stack([pack_attn(layer, pre)
                      for layer in params["layers"] for pre in ("sa", "ca")], axis=0)
    ffn1 = jnp.stack([jnp.concatenate([l["w1"], l["b1"]], axis=0)
                      for l in params["layers"]], axis=0)
    ffn2 = jnp.stack([jnp.concatenate([l["w2"], l["b2"]], axis=0)
                      for l in params["layers"]], axis=0)

    # compile-time masks / selectors (numpy) packed into one slab
    r = np.arange(T)
    self_bias = np.where((r[:, None] % BN) == (r[None, :] % BN),
                         0.0, NEG_INF).astype(np.float32)           # same (batch, var)
    rb = np.arange(BN)
    cross_bias = np.where((rb[:, None] // N) == (rb[None, :] // N),
                          0.0, NEG_INF).astype(np.float32)          # same batch sample
    sel = ((r[None, :] % BN) // N == np.arange(B)[:, None]).astype(np.float32)
    consts = np.zeros((T + BN + B, T), np.float32)
    consts[:T, :] = self_bias
    consts[T:T + BN, :BN] = cross_bias
    consts[T + BN:, :] = sel

    # classification-head weight, rearranged & batch-expanded:
    # whead[c, s*BN + b*N + n, d] = proj_w[n*D*S + d*S + s, c]
    wr = params["proj_w"].reshape(N, D, S, C).transpose(3, 2, 0, 1)  # (C, S, N, D)
    whead = jnp.broadcast_to(wr[:, :, None, :, :], (C, S, B, N, D)).reshape(C, T, D)

    return {"emb_w": emb_w, "vecs": vecs, "consts": jnp.asarray(consts),
            "attn": attn, "ffn1": ffn1, "ffn2": ffn2, "whead": whead}


# --------------------------- deterministic init ------------------------------
def _linear_init(key, din, dout, bias=True):
    kw, kb = jax.random.split(key)
    bound = 1.0 / math.sqrt(din)
    w = jax.random.uniform(kw, (din, dout), jnp.float32, -bound, bound)
    b = (jax.random.uniform(kb, (1, dout), jnp.float32, -bound, bound)
         if bias else jnp.zeros((1, dout), jnp.float32))
    return w, b


def init_params(key):
    S = TOK_PER_VAR
    head_nf = D_MODEL * S   # = d_model * ((seq_len - patch_len)/stride + 2 + 1)
    keys = jax.random.split(key, 4 + E_LAYERS)

    params = {}
    params["pro_w"], params["pro_b"] = _linear_init(keys[0], SEQ_LEN, D_MODEL)
    params["beh_w"], params["beh_b"] = _linear_init(keys[1], SEQ_LEN, D_MODEL)
    params["patch_w"], _ = _linear_init(keys[2], PATCH_LEN, D_MODEL, bias=False)
    params["patch_b"] = jnp.zeros((1, D_MODEL), jnp.float32)  # patch Linear: no bias
    params["pos_pe"] = positional_embedding(N_PATCHES, D_MODEL)

    layers = []
    for l in range(E_LAYERS):
        lk = jax.random.split(keys[3 + l], 10)
        layer = {}
        names = ["sa_q", "sa_k", "sa_v", "sa_o", "ca_q", "ca_k", "ca_v", "ca_o"]
        for i, name in enumerate(names):
            w, b = _linear_init(lk[i], D_MODEL, D_MODEL)
            layer[name + "_w"], layer[name + "_b"] = w, b
        layer["w1"], layer["b1"] = _linear_init(lk[8], D_MODEL, D_FF)
        layer["w2"], layer["b2"] = _linear_init(lk[9], D_FF, D_MODEL)
        for i in (1, 2, 3):
            layer[f"ln{i}_g"] = jnp.ones((1, D_MODEL), jnp.float32)
            layer[f"ln{i}_b"] = jnp.zeros((1, D_MODEL), jnp.float32)
        layers.append(layer)
    params["layers"] = layers

    params["norm_g"] = jnp.ones((1, D_MODEL), jnp.float32)
    params["norm_b"] = jnp.zeros((1, D_MODEL), jnp.float32)
    params["proj_w"], params["proj_b"] = _linear_init(
        keys[3 + E_LAYERS], head_nf * ENC_IN, NUM_CLASS)
    return params


# ----------------------------------- main ------------------------------------
if __name__ == "__main__":
    key = jax.random.PRNGKey(0)
    pkey, xkey = jax.random.split(key)
    params = init_params(pkey)

    B = 2
    packed = pack_params(params, B)                      # one-time, outside jit
    x_enc = jax.random.normal(xkey, (B, SEQ_LEN, ENC_IN), jnp.float32)
    x_mark_enc = jnp.ones((B, SEQ_LEN, 1), jnp.float32)  # unused by classification

    logits = forward(packed, x_enc, x_mark_enc)
    jax.block_until_ready(logits)
    assert logits.shape == (B, NUM_CLASS), logits.shape
    assert bool(jnp.all(jnp.isfinite(logits)))
    print("KERNEL_OK")
</pallas_src>

<mosaic_0001>
module attributes {stable_mosaic.version = 11 : i64} {
  func.func @_lbtt_forward_kernel(%arg0: memref<8x16xf32, #tpu.memory_space<vmem>>, %arg1: memref<16x96xf32, #tpu.memory_space<vmem>>, %arg2: memref<21x32xf32, #tpu.memory_space<vmem>>, %arg3: memref<42x32xf32, #tpu.memory_space<vmem>>, %arg4: memref<4x33x128xf32, #tpu.memory_space<vmem>>, %arg5: memref<2x33x64xf32, #tpu.memory_space<vmem>>, %arg6: memref<2x65x32xf32, #tpu.memory_space<vmem>>, %arg7: memref<3x32x32xf32, #tpu.memory_space<vmem>>, %arg8: memref<2x3xf32, #tpu.memory_space<vmem>>, %arg9: memref<32x32xf32, #tpu.memory_space<vmem>>) attributes {dimension_semantics = [], scalar_prefetch = 0 : i64, scratch_operands = 1 : i64, tpu.core_type = #tpu.core_type<tc>} {
    %c0 = arith.constant 0 : index
    %c0_0 = arith.constant 0 : index
    %0 = vector.load %arg2[%c0, %c0_0] : memref<21x32xf32, #tpu.memory_space<vmem>>, vector<21x32xf32>
    %c0_1 = arith.constant 0 : index
    %c0_2 = arith.constant 0 : index
    %1 = vector.load %arg3[%c0_1, %c0_2] : memref<42x32xf32, #tpu.memory_space<vmem>>, vector<42x32xf32>
    %2 = vector.extract_strided_slice %1 {offsets = [0, 0], sizes = [32, 32], strides = [1, 1]} : vector<42x32xf32> to vector<32x32xf32>
    %3 = vector.extract_strided_slice %1 {offsets = [32, 0], sizes = [8, 8], strides = [1, 1]} : vector<42x32xf32> to vector<8x8xf32>
    %4 = vector.extract_strided_slice %1 {offsets = [40, 0], sizes = [2, 32], strides = [1, 1]} : vector<42x32xf32> to vector<2x32xf32>
    %5 = tpu.iota {dimensions = array<i32: 1>} : vector<1x32xi32>
    %c0_i32 = arith.constant 0 : i32
    %6 = vector.broadcast %c0_i32 : i32 to vector<1x32xi32>
    %7 = arith.cmpi sge, %5, %6 : vector<1x32xi32>
    %c8_i32 = arith.constant 8 : i32
    %8 = vector.broadcast %c8_i32 : i32 to vector<1x32xi32>
    %9 = arith.cmpi slt, %5, %8 : vector<1x32xi32>
    %10 = arith.andi %7, %9 : vector<1x32xi1>
    %11 = arith.extui %10 : vector<1x32xi1> to vector<1x32xi32>
    %12 = arith.sitofp %11 : vector<1x32xi32> to vector<1x32xf32>
    %c8_i32_3 = arith.constant 8 : i32
    %13 = vector.broadcast %c8_i32_3 : i32 to vector<1x32xi32>
    %14 = arith.cmpi sge, %5, %13 : vector<1x32xi32>
    %c16_i32 = arith.constant 16 : i32
    %15 = vector.broadcast %c16_i32 : i32 to vector<1x32xi32>
    %16 = arith.cmpi slt, %5, %15 : vector<1x32xi32>
    %17 = arith.andi %14, %16 : vector<1x32xi1>
    %18 = arith.extui %17 : vector<1x32xi1> to vector<1x32xi32>
    %19 = arith.sitofp %18 : vector<1x32xi32> to vector<1x32xf32>
    %c16_i32_4 = arith.constant 16 : i32
    %20 = vector.broadcast %c16_i32_4 : i32 to vector<1x32xi32>
    %21 = arith.cmpi sge, %5, %20 : vector<1x32xi32>
    %c24_i32 = arith.constant 24 : i32
    %22 = vector.broadcast %c24_i32 : i32 to vector<1x32xi32>
    %23 = arith.cmpi slt, %5, %22 : vector<1x32xi32>
    %24 = arith.andi %21, %23 : vector<1x32xi1>
    %25 = arith.extui %24 : vector<1x32xi1> to vector<1x32xi32>
    %26 = arith.sitofp %25 : vector<1x32xi32> to vector<1x32xf32>
    %c24_i32_5 = arith.constant 24 : i32
    %27 = vector.broadcast %c24_i32_5 : i32 to vector<1x32xi32>
    %28 = arith.cmpi sge, %5, %27 : vector<1x32xi32>
    %c32_i32 = arith.constant 32 : i32
    %29 = vector.broadcast %c32_i32 : i32 to vector<1x32xi32>
    %30 = arith.cmpi slt, %5, %29 : vector<1x32xi32>
    %31 = arith.andi %28, %30 : vector<1x32xi1>
    %32 = arith.extui %31 : vector<1x32xi1> to vector<1x32xi32>
    %33 = arith.sitofp %32 : vector<1x32xi32> to vector<1x32xf32>
    %c0_6 = arith.constant 0 : index
    %c0_7 = arith.constant 0 : index
    %34 = vector.load %arg0[%c0_6, %c0_7] : memref<8x16xf32, #tpu.memory_space<vmem>>, vector<8x16xf32>
    %c0_8 = arith.constant 0 : index
    %c0_9 = arith.constant 0 : index
    %35 = vector.load %arg1[%c0_8, %c0_9] : memref<16x96xf32, #tpu.memory_space<vmem>>, vector<16x96xf32>
    %36 = vector.extract_strided_slice %35 {offsets = [0, 0], sizes = [16, 64], strides = [1, 1]} : vector<16x96xf32> to vector<16x64xf32>
    %cst = arith.constant dense<0.000000e+00> : vector<8x64xf32>
    %37 = tpu.matmul %34, %36, %cst {dimension_numbers = #tpu.dot_dimension_numbers<[1], [0], [0], [1], [0, 0, 1, 1], [], []>} : vector<8x16xf32>, vector<16x64xf32>, vector<8x64xf32> -> vector<8x64xf32>
    %38 = vector.extract_strided_slice %37 {offsets = [0, 0], sizes = [8, 32], strides = [1, 1]} : vector<8x64xf32> to vector<8x32xf32>
    %39 = vector.extract_strided_slice %0 {offsets = [0, 0], sizes = [1, 32], strides = [1, 1]} : vector<21x32xf32> to vector<1x32xf32>
    %40 = vector.broadcast %39 : vector<1x32xf32> to vector<8x32xf32>
    %41 = arith.addf %38, %40 : vector<8x32xf32>
    %42 = vector.extract_strided_slice %37 {offsets = [0, 32], sizes = [8, 32], strides = [1, 1]} : vector<8x64xf32> to vector<8x32xf32>
    %43 = vector.extract_strided_slice %0 {offsets = [1, 0], sizes = [1, 32], strides = [1, 1]} : vector<21x32xf32> to vector<1x32xf32>
    %44 = vector.broadcast %43 : vector<1x32xf32> to vector<8x32xf32>
    %45 = arith.addf %42, %44 : vector<8x32xf32>
    %46 = vector.extract_strided_slice %34 {offsets = [0, 15], sizes = [8, 1], strides = [1, 1]} : vector<8x16xf32> to vector<8x1xf32>
    %47 = vector.shape_cast %46 : vector<8x1xf32> to vector<8x1xf32>
    %48 = vector.broadcast %47 : vector<8x1xf32> to vector<8x8xf32>
    %49 = tpu.concatenate %34, %48 in 1 : vector<8x16xf32>, vector<8x8xf32> -> vector<8x24xf32>
    %50 = vector.extract_strided_slice %49 {offsets = [0, 0], sizes = [8, 8], strides = [1, 1]} : vector<8x24xf32> to vector<8x8xf32>
    %51 = vector.extract_strided_slice %49 {offsets = [0, 8], sizes = [8, 8], strides = [1, 1]} : vector<8x24xf32> to vector<8x8xf32>
    %52 = vector.extract_strided_slice %49 {offsets = [0, 16], sizes = [8, 8], strides = [1, 1]} : vector<8x24xf32> to vector<8x8xf32>
    %53 = tpu.concatenate %50, %51, %52 in 0 : vector<8x8xf32>, vector<8x8xf32>, vector<8x8xf32> -> vector<24x8xf32>
    %54 = vector.extract_strided_slice %0 {offsets = [3, 0], sizes = [1, 32], strides = [1, 1]} : vector<21x32xf32> to vector<1x32xf32>
    %55 = vector.shape_cast %54 : vector<1x32xf32> to vector<1x32xf32>
    %56 = vector.broadcast %55 : vector<1x32xf32> to vector<8x32xf32>
    %57 = vector.extract_strided_slice %0 {offsets = [4, 0], sizes = [1, 32], strides = [1, 1]} : vector<21x32xf32> to vector<1x32xf32>
    %58 = vector.shape_cast %57 : vector<1x32xf32> to vector<1x32xf32>
    %59 = vector.broadcast %58 : vector<1x32xf32> to vector<8x32xf32>
    %60 = vector.extract_strided_slice %0 {offsets = [5, 0], sizes = [1, 32], strides = [1, 1]} : vector<21x32xf32> to vector<1x32xf32>
    %61 = vector.shape_cast %60 : vector<1x32xf32> to vector<1x32xf32>
    %62 = vector.broadcast %61 : vector<1x32xf32> to vector<8x32xf32>
    %63 = tpu.concatenate %56, %59, %62 in 0 : vector<8x32xf32>, vector<8x32xf32>, vector<8x32xf32> -> vector<24x32xf32>
    %64 = vector.extract_strided_slice %35 {offsets = [0, 64], sizes = [8, 32], strides = [1, 1]} : vector<16x96xf32> to vector<8x32xf32>
    %cst_10 = arith.constant dense<0.000000e+00> : vector<24x32xf32>
    %65 = tpu.matmul %53, %64, %cst_10 {dimension_numbers = #tpu.dot_dimension_numbers<[1], [0], [0], [1], [0, 0, 1, 1], [], []>} : vector<24x8xf32>, vector<8x32xf32>, vector<24x32xf32> -> vector<24x32xf32>
    %66 = vector.extract_strided_slice %0 {offsets = [2, 0], sizes = [1, 32], strides = [1, 1]} : vector<21x32xf32> to vector<1x32xf32>
    %67 = vector.broadcast %66 : vector<1x32xf32> to vector<24x32xf32>
    %68 = arith.addf %65, %67 : vector<24x32xf32>
    %69 = arith.addf %68, %63 : vector<24x32xf32>
    %70 = tpu.concatenate %69, %41 in 0 : vector<24x32xf32>, vector<8x32xf32> -> vector<32x32xf32>
    %c0_11 = arith.constant 0 : index
    %c0_12 = arith.constant 0 : index
    %71 = vector.load %arg9[%c0_11, %c0_12] : memref<32x32xf32, #tpu.memory_space<vmem>>, vector<32x32xf32>
    tpu.vector_store %arg9[%c0_11, %c0_12], %70 {strides = array<i32>} : memref<32x32xf32, #tpu.memory_space<vmem>>, vector<32x32xf32>,
    %c0_13 = arith.constant 0 : index
    %c0_14 = arith.constant 0 : index
    %72 = vector.load %arg9[%c0_13, %c0_14] : memref<32x32xf32, #tpu.memory_space<vmem>>, vector<32x32xf32>
    %c0_15 = arith.constant 0 : index
    %c0_16 = arith.constant 0 : index
    %c0_17 = arith.constant 0 : index
    %73 = vector.load %arg4[%c0_15, %c0_16, %c0_17] : memref<4x33x128xf32, #tpu.memory_space<vmem>>, vector<1x33x128xf32>
    %74 = vector.shape_cast %73 : vector<1x33x128xf32> to vector<33x128xf32>
    %75 = vector.extract_strided_slice %74 {offsets = [0, 0], sizes = [32, 128], strides = [1, 1]} : vector<33x128xf32> to vector<32x128xf32>
    %76 = vector.extract_strided_slice %74 {offsets = [32, 0], sizes = [1, 128], strides = [1, 1]} : vector<33x128xf32> to vector<1x128xf32>
    %77 = vector.extract_strided_slice %75 {offsets = [0, 0], sizes = [32, 96], strides = [1, 1]} : vector<32x128xf32> to vector<32x96xf32>
    %cst_18 = arith.constant dense<0.000000e+00> : vector<32x96xf32>
    %78 = tpu.matmul %72, %77, %cst_18 {dimension_numbers = #tpu.dot_dimension_numbers<[1], [0], [0], [1], [0, 0, 1, 1], [], []>} : vector<32x32xf32>, vector<32x96xf32>, vector<32x96xf32> -> vector<32x96xf32>
    %79 = vector.extract_strided_slice %76 {offsets = [0, 0], sizes = [1, 96], strides = [1, 1]} : vector<1x128xf32> to vector<1x96xf32>
    %80 = vector.broadcast %79 : vector<1x96xf32> to vector<32x96xf32>
    %81 = arith.addf %78, %80 : vector<32x96xf32>
    %82 = vector.extract_strided_slice %81 {offsets = [0, 0], sizes = [32, 32], strides = [1, 1]} : vector<32x96xf32> to vector<32x32xf32>
    %83 = vector.extract_strided_slice %81 {offsets = [0, 32], sizes = [32, 32], strides = [1, 1]} : vector<32x96xf32> to vector<32x32xf32>
    %84 = vector.extract_strided_slice %81 {offsets = [0, 64], sizes = [32, 32], strides = [1, 1]} : vector<32x96xf32> to vector<32x32xf32>
    %85 = vector.broadcast %12 : vector<1x32xf32> to vector<32x32xf32>
    %86 = arith.mulf %83, %85 : vector<32x32xf32>
    %87 = vector.broadcast %19 : vector<1x32xf32> to vector<32x32xf32>
    %88 = arith.mulf %83, %87 : vector<32x32xf32>
    %89 = vector.broadcast %26 : vector<1x32xf32> to vector<32x32xf32>
    %90 = arith.mulf %83, %89 : vector<32x32xf32>
    %91 = vector.broadcast %33 : vector<1x32xf32> to vector<32x32xf32>
    %92 = arith.mulf %83, %91 : vector<32x32xf32>
    %93 = tpu.concatenate %86, %88, %90, %92 in 0 : vector<32x32xf32>, vector<32x32xf32>, vector<32x32xf32>, vector<32x32xf32> -> vector<128x32xf32>
    %94 = vector.broadcast %12 : vector<1x32xf32> to vector<32x32xf32>
    %95 = arith.mulf %84, %94 : vector<32x32xf32>
    %96 = vector.broadcast %19 : vector<1x32xf32> to vector<32x32xf32>
    %97 = arith.mulf %84, %96 : vector<32x32xf32>
    %98 = vector.broadcast %26 : vector<1x32xf32> to vector<32x32xf32>
    %99 = arith.mulf %84, %98 : vector<32x32xf32>
    %100 = vector.broadcast %33 : vector<1x32xf32> to vector<32x32xf32>
    %101 = arith.mulf %84, %100 : vector<32x32xf32>
    %102 = tpu.concatenate %95, %97, %99, %101 in 0 : vector<32x32xf32>, vector<32x32xf32>, vector<32x32xf32>, vector<32x32xf32> -> vector<128x32xf32>
    %cst_19 = arith.constant dense<0.000000e+00> : vector<32x128xf32>
    %103 = tpu.matmul %82, %93, %cst_19 {dimension_numbers = #tpu.dot_dimension_numbers<[1], [1], [0], [0], [0, 0, 1, 0], [], []>} : vector<32x32xf32>, vector<128x32xf32>, vector<32x128xf32> -> vector<32x128xf32>
    %cst_20 = arith.constant 0.353553385 : f32
    %104 = vector.broadcast %cst_20 : f32 to vector<32x128xf32>
    %105 = arith.mulf %103, %104 : vector<32x128xf32>
    %106 = vector.extract_strided_slice %105 {offsets = [0, 0], sizes = [32, 32], strides = [1, 1]} : vector<32x128xf32> to vector<32x32xf32>
    %107 = arith.addf %106, %2 : vector<32x32xf32>
    %cst_21 = arith.constant dense<0xFF800000> : vector<32xf32>
    %108 = vector.multi_reduction <maximumf>, %107, %cst_21 [1] : vector<32x32xf32> to vector<32xf32>
    %109 = vector.shape_cast %108 : vector<32xf32> to vector<32x1xf32>
    %110 = vector.broadcast %109 : vector<32x1xf32> to vector<32x32xf32>
    %111 = arith.subf %107, %110 : vector<32x32xf32>
    %112 = math.exp %111 : vector<32x32xf32>
    %cst_22 = arith.constant dense<0.000000e+00> : vector<32xf32>
    %113 = vector.multi_reduction <add>, %112, %cst_22 [1] : vector<32x32xf32> to vector<32xf32>
    %114 = vector.shape_cast %113 : vector<32xf32> to vector<32x1xf32>
    %115 = tpu.reciprocal %114 {approx = true} : vector<32x1xf32> -> vector<32x1xf32>
    %116 = vector.broadcast %115 : vector<32x1xf32> to vector<32x32xf32>
    %117 = arith.mulf %112, %116 : vector<32x32xf32>
    %118 = vector.extract_strided_slice %105 {offsets = [0, 32], sizes = [32, 32], strides = [1, 1]} : vector<32x128xf32> to vector<32x32xf32>
    %119 = arith.addf %118, %2 : vector<32x32xf32>
    %cst_23 = arith.constant dense<0xFF800000> : vector<32xf32>
    %120 = vector.multi_reduction <maximumf>, %119, %cst_23 [1] : vector<32x32xf32> to vector<32xf32>
    %121 = vector.shape_cast %120 : vector<32xf32> to vector<32x1xf32>
    %122 = vector.broadcast %121 : vector<32x1xf32> to vector<32x32xf32>
    %123 = arith.subf %119, %122 : vector<32x32xf32>
    %124 = math.exp %123 : vector<32x32xf32>
    %cst_24 = arith.constant dense<0.000000e+00> : vector<32xf32>
    %125 = vector.multi_reduction <add>, %124, %cst_24 [1] : vector<32x32xf32> to vector<32xf32>
    %126 = vector.shape_cast %125 : vector<32xf32> to vector<32x1xf32>
    %127 = tpu.reciprocal %126 {approx = true} : vector<32x1xf32> -> vector<32x1xf32>
    %128 = vector.broadcast %127 : vector<32x1xf32> to vector<32x32xf32>
    %129 = arith.mulf %124, %128 : vector<32x32xf32>
    %130 = vector.extract_strided_slice %105 {offsets = [0, 64], sizes = [32, 32], strides = [1, 1]} : vector<32x128xf32> to vector<32x32xf32>
    %131 = arith.addf %130, %2 : vector<32x32xf32>
    %cst_25 = arith.constant dense<0xFF800000> : vector<32xf32>
    %132 = vector.multi_reduction <maximumf>, %131, %cst_25 [1] : vector<32x32xf32> to vector<32xf32>
    %133 = vector.shape_cast %132 : vector<32xf32> to vector<32x1xf32>
    %134 = vector.broadcast %133 : vector<32x1xf32> to vector<32x32xf32>
    %135 = arith.subf %131, %134 : vector<32x32xf32>
    %136 = math.exp %135 : vector<32x32xf32>
    %cst_26 = arith.constant dense<0.000000e+00> : vector<32xf32>
    %137 = vector.multi_reduction <add>, %136, %cst_26 [1] : vector<32x32xf32> to vector<32xf32>
    %138 = vector.shape_cast %137 : vector<32xf32> to vector<32x1xf32>
    %139 = tpu.reciprocal %138 {approx = true} : vector<32x1xf32> -> vector<32x1xf32>
    %140 = vector.broadcast %139 : vector<32x1xf32> to vector<32x32xf32>
    %141 = arith.mulf %136, %140 : vector<32x32xf32>
    %142 = vector.extract_strided_slice %105 {offsets = [0, 96], sizes = [32, 32], strides = [1, 1]} : vector<32x128xf32> to vector<32x32xf32>
    %143 = arith.addf %142, %2 : vector<32x32xf32>
    %cst_27 = arith.constant dense<0xFF800000> : vector<32xf32>
    %144 = vector.multi_reduction <maximumf>, %143, %cst_27 [1] : vector<32x32xf32> to vector<32xf32>
    %145 = vector.shape_cast %144 : vector<32xf32> to vector<32x1xf32>
    %146 = vector.broadcast %145 : vector<32x1xf32> to vector<32x32xf32>
    %147 = arith.subf %143, %146 : vector<32x32xf32>
    %148 = math.exp %147 : vector<32x32xf32>
    %cst_28 = arith.constant dense<0.000000e+00> : vector<32xf32>
    %149 = vector.multi_reduction <add>, %148, %cst_28 [1] : vector<32x32xf32> to vector<32xf32>
    %150 = vector.shape_cast %149 : vector<32xf32> to vector<32x1xf32>
    %151 = tpu.reciprocal %150 {approx = true} : vector<32x1xf32> -> vector<32x1xf32>
    %152 = vector.broadcast %151 : vector<32x1xf32> to vector<32x32xf32>
    %153 = arith.mulf %148, %152 : vector<32x32xf32>
    %154 = tpu.concatenate %117, %129, %141, %153 in 1 : vector<32x32xf32>, vector<32x32xf32>, vector<32x32xf32>, vector<32x32xf32> -> vector<32x128xf32>
    %cst_29 = arith.constant dense<0.000000e+00> : vector<32x32xf32>
    %155 = tpu.matmul %154, %102, %cst_29 {dimension_numbers = #tpu.dot_dimension_numbers<[1], [0], [0], [1], [0, 0, 1, 1], [], []>} : vector<32x128xf32>, vector<128x32xf32>, vector<32x32xf32> -> vector<32x32xf32>
    %156 = vector.extract_strided_slice %75 {offsets = [0, 96], sizes = [32, 32], strides = [1, 1]} : vector<32x128xf32> to vector<32x32xf32>
    %cst_30 = arith.constant dense<0.000000e+00> : vector<32x32xf32>
    %157 = tpu.matmul %155, %156, %cst_30 {dimension_numbers = #tpu.dot_dimension_numbers<[1], [0], [0], [1], [0, 0, 1, 1], [], []>} : vector<32x32xf32>, vector<32x32xf32>, vector<32x32xf32> -> vector<32x32xf32>
    %158 = vector.extract_strided_slice %76 {offsets = [0, 96], sizes = [1, 32], strides = [1, 1]} : vector<1x128xf32> to vector<1x32xf32>
    %159 = vector.broadcast %158 : vector<1x32xf32> to vector<32x32xf32>
    %160 = arith.addf %157, %159 : vector<32x32xf32>
    %161 = arith.addf %72, %160 : vector<32x32xf32>
    %162 = vector.extract_strided_slice %0 {offsets = [6, 0], sizes = [1, 32], strides = [1, 1]} : vector<21x32xf32> to vector<1x32xf32>
    %163 = vector.extract_strided_slice %0 {offsets = [7, 0], sizes = [1, 32], strides = [1, 1]} : vector<21x32xf32> to vector<1x32xf32>
    %cst_31 = arith.constant dense<0.000000e+00> : vector<32xf32>
    %164 = vector.multi_reduction <add>, %161, %cst_31 [1] : vector<32x32xf32> to vector<32xf32>
    %165 = vector.shape_cast %164 : vector<32xf32> to vector<32x1xf32>
    %cst_32 = arith.constant 3.200000e+01 : f32
    %166 = vector.broadcast %cst_32 : f32 to vector<32x1xf32>
    %167 = arith.divf %165, %166 : vector<32x1xf32>
    %168 = vector.broadcast %167 : vector<32x1xf32> to vector<32x32xf32>
    %169 = arith.subf %161, %168 : vector<32x32xf32>
    %170 = arith.mulf %169, %169 : vector<32x32xf32>
    %cst_33 = arith.constant dense<0.000000e+00> : vector<32xf32>
    %171 = vector.multi_reduction <add>, %170, %cst_33 [1] : vector<32x32xf32> to vector<32xf32>
    %172 = vector.shape_cast %171 : vector<32xf32> to vector<32x1xf32>
    %cst_34 = arith.constant 3.200000e+01 : f32
    %173 = vector.broadcast %cst_34 : f32 to vector<32x1xf32>
    %174 = arith.divf %172, %173 : vector<32x1xf32>
    %cst_35 = arith.constant 9.99999974E-6 : f32
    %175 = vector.broadcast %cst_35 : f32 to vector<32x1xf32>
    %176 = arith.addf %174, %175 : vector<32x1xf32>
    %177 = math.rsqrt %176 : vector<32x1xf32>
    %178 = vector.broadcast %177 : vector<32x1xf32> to vector<32x32xf32>
    %179 = arith.mulf %169, %178 : vector<32x32xf32>
    %180 = vector.broadcast %162 : vector<1x32xf32> to vector<32x32xf32>
    %181 = arith.mulf %179, %180 : vector<32x32xf32>
    %182 = vector.broadcast %163 : vector<1x32xf32> to vector<32x32xf32>
    %183 = arith.addf %181, %182 : vector<32x32xf32>
    %c0_36 = arith.constant 0 : index
    %c0_37 = arith.constant 0 : index
    %184 = vector.load %arg9[%c0_36, %c0_37] : memref<32x32xf32, #tpu.memory_space<vmem>>, vector<32x32xf32>
    tpu.vector_store %arg9[%c0_36, %c0_37], %183 {strides = array<i32>} : memref<32x32xf32, #tpu.memory_space<vmem>>, vector<32x32xf32>,
    %185 = vector.extract_strided_slice %183 {offsets = [24, 0], sizes = [8, 32], strides = [1, 1]} : vector<32x32xf32> to vector<8x32xf32>
    %c1 = arith.constant 1 : index
    %c0_38 = arith.constant 0 : index
    %c0_39 = arith.constant 0 : index
    %186 = vector.load %arg4[%c1, %c0_38, %c0_39] : memref<4x33x128xf32, #tpu.memory_space<vmem>>, vector<1x33x128xf32>
    %187 = vector.shape_cast %186 : vector<1x33x128xf32> to vector<33x128xf32>
    %188 = vector.extract_strided_slice %187 {offsets = [0, 0], sizes = [32, 128], strides = [1, 1]} : vector<33x128xf32> to vector<32x128xf32>
    %189 = vector.extract_strided_slice %187 {offsets = [32, 0], sizes = [1, 128], strides = [1, 1]} : vector<33x128xf32> to vector<1x128xf32>
    %190 = vector.extract_strided_slice %188 {offsets = [0, 0], sizes = [32, 32], strides = [1, 1]} : vector<32x128xf32> to vector<32x32xf32>
    %cst_40 = arith.constant dense<0.000000e+00> : vector<8x32xf32>
    %191 = tpu.matmul %185, %190, %cst_40 {dimension_numbers = #tpu.dot_dimension_numbers<[1], [0], [0], [1], [0, 0, 1, 1], [], []>} : vector<8x32xf32>, vector<32x32xf32>, vector<8x32xf32> -> vector<8x32xf32>
    %192 = vector.extract_strided_slice %189 {offsets = [0, 0], sizes = [1, 32], strides = [1, 1]} : vector<1x128xf32> to vector<1x32xf32>
    %193 = vector.broadcast %192 : vector<1x32xf32> to vector<8x32xf32>
    %194 = arith.addf %191, %193 : vector<8x32xf32>
    %195 = vector.extract_strided_slice %188 {offsets = [0, 32], sizes = [32, 64], strides = [1, 1]} : vector<32x128xf32> to vector<32x64xf32>
    %cst_41 = arith.constant dense<0.000000e+00> : vector<8x64xf32>
    %196 = tpu.matmul %45, %195, %cst_41 {dimension_numbers = #tpu.dot_dimension_numbers<[1], [0], [0], [1], [0, 0, 1, 1], [], []>} : vector<8x32xf32>, vector<32x64xf32>, vector<8x64xf32> -> vector<8x64xf32>
    %197 = vector.extract_strided_slice %189 {offsets = [0, 32], sizes = [1, 64], strides = [1, 1]} : vector<1x128xf32> to vector<1x64xf32>
    %198 = vector.broadcast %197 : vector<1x64xf32> to vector<8x64xf32>
    %199 = arith.addf %196, %198 : vector<8x64xf32>
    %200 = vector.extract_strided_slice %199 {offsets = [0, 0], sizes = [8, 32], strides = [1, 1]} : vector<8x64xf32> to vector<8x32xf32>
    %201 = vector.extract_strided_slice %199 {offsets = [0, 32], sizes = [8, 32], strides = [1, 1]} : vector<8x64xf32> to vector<8x32xf32>
    %202 = vector.broadcast %12 : vector<1x32xf32> to vector<8x32xf32>
    %203 = arith.mulf %200, %202 : vector<8x32xf32>
    %204 = vector.broadcast %19 : vector<1x32xf32> to vector<8x32xf32>
    %205 = arith.mulf %200, %204 : vector<8x32xf32>
    %206 = vector.broadcast %26 : vector<1x32xf32> to vector<8x32xf32>
    %207 = arith.mulf %200, %206 : vector<8x32xf32>
    %208 = vector.broadcast %33 : vector<1x32xf32> to vector<8x32xf32>
    %209 = arith.mulf %200, %208 : vector<8x32xf32>
    %210 = tpu.concatenate %203, %205, %207, %209 in 0 : vector<8x32xf32>, vector<8x32xf32>, vector<8x32xf32>, vector<8x32xf32> -> vector<32x32xf32>
    %211 = vector.broadcast %12 : vector<1x32xf32> to vector<8x32xf32>
    %212 = arith.mulf %201, %211 : vector<8x32xf32>
    %213 = vector.broadcast %19 : vector<1x32xf32> to vector<8x32xf32>
    %214 = arith.mulf %201, %213 : vector<8x32xf32>
    %215 = vector.broadcast %26 : vector<1x32xf32> to vector<8x32xf32>
    %216 = arith.mulf %201, %215 : vector<8x32xf32>
    %217 = vector.broadcast %33 : vector<1x32xf32> to vector<8x32xf32>
    %218 = arith.mulf %201, %217 : vector<8x32xf32>
    %219 = tpu.concatenate %212, %214, %216, %218 in 0 : vector<8x32xf32>, vector<8x32xf32>, vector<8x32xf32>, vector<8x32xf32> -> vector<32x32xf32>
    %cst_42 = arith.constant dense<0.000000e+00> : vector<8x32xf32>
    %220 = tpu.matmul %194, %210, %cst_42 {dimension_numbers = #tpu.dot_dimension_numbers<[1], [1], [0], [0], [0, 0, 1, 0], [], []>} : vector<8x32xf32>, vector<32x32xf32>, vector<8x32xf32> -> vector<8x32xf32>
    %cst_43 = arith.constant 0.353553385 : f32
    %221 = vector.broadcast %cst_43 : f32 to vector<8x32xf32>
    %222 = arith.mulf %220, %221 : vector<8x32xf32>
    %223 = vector.extract_strided_slice %222 {offsets = [0, 0], sizes = [8, 8], strides = [1, 1]} : vector<8x32xf32> to vector<8x8xf32>
    %224 = arith.addf %223, %3 : vector<8x8xf32>
    %cst_44 = arith.constant dense<0xFF800000> : vector<8xf32>
    %225 = vector.multi_reduction <maximumf>, %224, %cst_44 [1] : vector<8x8xf32> to vector<8xf32>
    %226 = vector.shape_cast %225 : vector<8xf32> to vector<8x1xf32>
    %227 = vector.broadcast %226 : vector<8x1xf32> to vector<8x8xf32>
    %228 = arith.subf %224, %227 : vector<8x8xf32>
    %229 = math.exp %228 : vector<8x8xf32>
    %cst_45 = arith.constant dense<0.000000e+00> : vector<8xf32>
    %230 = vector.multi_reduction <add>, %229, %cst_45 [1] : vector<8x8xf32> to vector<8xf32>
    %231 = vector.shape_cast %230 : vector<8xf32> to vector<8x1xf32>
    %232 = tpu.reciprocal %231 {approx = true} : vector<8x1xf32> -> vector<8x1xf32>
    %233 = vector.broadcast %232 : vector<8x1xf32> to vector<8x8xf32>
    %234 = arith.mulf %229, %233 : vector<8x8xf32>
    %235 = vector.extract_strided_slice %222 {offsets = [0, 8], sizes = [8, 8], strides = [1, 1]} : vector<8x32xf32> to vector<8x8xf32>
    %236 = arith.addf %235, %3 : vector<8x8xf32>
    %cst_46 = arith.constant dense<0xFF800000> : vector<8xf32>
    %237 = vector.multi_reduction <maximumf>, %236, %cst_46 [1] : vector<8x8xf32> to vector<8xf32>
    %238 = vector.shape_cast %237 : vector<8xf32> to vector<8x1xf32>
    %239 = vector.broadcast %238 : vector<8x1xf32> to vector<8x8xf32>
    %240 = arith.subf %236, %239 : vector<8x8xf32>
    %241 = math.exp %240 : vector<8x8xf32>
    %cst_47 = arith.constant dense<0.000000e+00> : vector<8xf32>
    %242 = vector.multi_reduction <add>, %241, %cst_47 [1] : vector<8x8xf32> to vector<8xf32>
    %243 = vector.shape_cast %242 : vector<8xf32> to vector<8x1xf32>
    %244 = tpu.reciprocal %243 {approx = true} : vector<8x1xf32> -> vector<8x1xf32>
    %245 = vector.broadcast %244 : vector<8x1xf32> to vector<8x8xf32>
    %246 = arith.mulf %241, %245 : vector<8x8xf32>
    %247 = vector.extract_strided_slice %222 {offsets = [0, 16], sizes = [8, 8], strides = [1, 1]} : vector<8x32xf32> to vector<8x8xf32>
    %248 = arith.addf %247, %3 : vector<8x8xf32>
    %cst_48 = arith.constant dense<0xFF800000> : vector<8xf32>
    %249 = vector.multi_reduction <maximumf>, %248, %cst_48 [1] : vector<8x8xf32> to vector<8xf32>
    %250 = vector.shape_cast %249 : vector<8xf32> to vector<8x1xf32>
    %251 = vector.broadcast %250 : vector<8x1xf32> to vector<8x8xf32>
    %252 = arith.subf %248, %251 : vector<8x8xf32>
    %253 = math.exp %252 : vector<8x8xf32>
    %cst_49 = arith.constant dense<0.000000e+00> : vector<8xf32>
    %254 = vector.multi_reduction <add>, %253, %cst_49 [1] : vector<8x8xf32> to vector<8xf32>
    %255 = vector.shape_cast %254 : vector<8xf32> to vector<8x1xf32>
    %256 = tpu.reciprocal %255 {approx = true} : vector<8x1xf32> -> vector<8x1xf32>
    %257 = vector.broadcast %256 : vector<8x1xf32> to vector<8x8xf32>
    %258 = arith.mulf %253, %257 : vector<8x8xf32>
    %259 = vector.extract_strided_slice %222 {offsets = [0, 24], sizes = [8, 8], strides = [1, 1]} : vector<8x32xf32> to vector<8x8xf32>
    %260 = arith.addf %259, %3 : vector<8x8xf32>
    %cst_50 = arith.constant dense<0xFF800000> : vector<8xf32>
    %261 = vector.multi_reduction <maximumf>, %260, %cst_50 [1] : vector<8x8xf32> to vector<8xf32>
    %262 = vector.shape_cast %261 : vector<8xf32> to vector<8x1xf32>
    %263 = vector.broadcast %262 : vector<8x1xf32> to vector<8x8xf32>
    %264 = arith.subf %260, %263 : vector<8x8xf32>
    %265 = math.exp %264 : vector<8x8xf32>
    %cst_51 = arith.constant dense<0.000000e+00> : vector<8xf32>
    %266 = vector.multi_reduction <add>, %265, %cst_51 [1] : vector<8x8xf32> to vector<8xf32>
    %267 = vector.shape_cast %266 : vector<8xf32> to vector<8x1xf32>
    %268 = tpu.reciprocal %267 {approx = true} : vector<8x1xf32> -> vector<8x1xf32>
    %269 = vector.broadcast %268 : vector<8x1xf32> to vector<8x8xf32>
    %270 = arith.mulf %265, %269 : vector<8x8xf32>
    %271 = tpu.concatenate %234, %246, %258, %270 in 1 : vector<8x8xf32>, vector<8x8xf32>, vector<8x8xf32>, vector<8x8xf32> -> vector<8x32xf32>
    %cst_52 = arith.constant dense<0.000000e+00> : vector<8x32xf32>
    %272 = tpu.matmul %271, %219, %cst_52 {dimension_numbers = #tpu.dot_dimension_numbers<[1], [0], [0], [1], [0, 0, 1, 1], [], []>} : vector<8x32xf32>, vector<32x32xf32>, vector<8x32xf32> -> vector<8x32xf32>
    %273 = vector.extract_strided_slice %188 {offsets = [0, 96], sizes = [32, 32], strides = [1, 1]} : vector<32x128xf32> to vector<32x32xf32>
    %cst_53 = arith.constant dense<0.000000e+00> : vector<8x32xf32>
    %274 = tpu.matmul %272, %273, %cst_53 {dimension_numbers = #tpu.dot_dimension_numbers<[1], [0], [0], [1], [0, 0, 1, 1], [], []>} : vector<8x32xf32>, vector<32x32xf32>, vector<8x32xf32> -> vector<8x32xf32>
    %275 = vector.extract_strided_slice %189 {offsets = [0, 96], sizes = [1, 32], strides = [1, 1]} : vector<1x128xf32> to vector<1x32xf32>
    %276 = vector.broadcast %275 : vector<1x32xf32> to vector<8x32xf32>
    %277 = arith.addf %274, %276 : vector<8x32xf32>
    %278 = arith.addf %185, %277 : vector<8x32xf32>
    %279 = vector.extract_strided_slice %0 {offsets = [8, 0], sizes = [1, 32], strides = [1, 1]} : vector<21x32xf32> to vector<1x32xf32>
    %280 = vector.extract_strided_slice %0 {offsets = [9, 0], sizes = [1, 32], strides = [1, 1]} : vector<21x32xf32> to vector<1x32xf32>
    %cst_54 = arith.constant dense<0.000000e+00> : vector<8xf32>
    %281 = vector.multi_reduction <add>, %278, %cst_54 [1] : vector<8x32xf32> to vector<8xf32>
    %282 = vector.shape_cast %281 : vector<8xf32> to vector<8x1xf32>
    %cst_55 = arith.constant 3.200000e+01 : f32
    %283 = vector.broadcast %cst_55 : f32 to vector<8x1xf32>
    %284 = arith.divf %282, %283 : vector<8x1xf32>
    %285 = vector.broadcast %284 : vector<8x1xf32> to vector<8x32xf32>
    %286 = arith.subf %278, %285 : vector<8x32xf32>
    %287 = arith.mulf %286, %286 : vector<8x32xf32>
    %cst_56 = arith.constant dense<0.000000e+00> : vector<8xf32>
    %288 = vector.multi_reduction <add>, %287, %cst_56 [1] : vector<8x32xf32> to vector<8xf32>
    %289 = vector.shape_cast %288 : vector<8xf32> to vector<8x1xf32>
    %cst_57 = arith.constant 3.200000e+01 : f32
    %290 = vector.broadcast %cst_57 : f32 to vector<8x1xf32>
    %291 = arith.divf %289, %290 : vector<8x1xf32>
    %cst_58 = arith.constant 9.99999974E-6 : f32
    %292 = vector.broadcast %cst_58 : f32 to vector<8x1xf32>
    %293 = arith.addf %291, %292 : vector<8x1xf32>
    %294 = math.rsqrt %293 : vector<8x1xf32>
    %295 = vector.broadcast %294 : vector<8x1xf32> to vector<8x32xf32>
    %296 = arith.mulf %286, %295 : vector<8x32xf32>
    %297 = vector.broadcast %279 : vector<1x32xf32> to vector<8x32xf32>
    %298 = arith.mulf %296, %297 : vector<8x32xf32>
    %299 = vector.broadcast %280 : vector<1x32xf32> to vector<8x32xf32>
    %300 = arith.addf %298, %299 : vector<8x32xf32>
    %c24 = arith.constant 24 : index
    %c0_59 = arith.constant 0 : index
    %301 = vector.load %arg9[%c24, %c0_59] : memref<32x32xf32, #tpu.memory_space<vmem>>, vector<8x32xf32>
    tpu.vector_store %arg9[%c24, %c0_59], %300 {strides = array<i32>} : memref<32x32xf32, #tpu.memory_space<vmem>>, vector<8x32xf32>,
    %c0_60 = arith.constant 0 : index
    %c0_61 = arith.constant 0 : index
    %302 = vector.load %arg9[%c0_60, %c0_61] : memref<32x32xf32, #tpu.memory_space<vmem>>, vector<32x32xf32>
    %c0_62 = arith.constant 0 : index
    %c0_63 = arith.constant 0 : index
    %c0_64 = arith.constant 0 : index
    %303 = vector.load %arg5[%c0_62, %c0_63, %c0_64] : memref<2x33x64xf32, #tpu.memory_space<vmem>>, vector<1x33x64xf32>
    %304 = vector.shape_cast %303 : vector<1x33x64xf32> to vector<33x64xf32>
    %c0_65 = arith.constant 0 : index
    %c0_66 = arith.constant 0 : index
    %c0_67 = arith.constant 0 : index
    %305 = vector.load %arg6[%c0_65, %c0_66, %c0_67] : memref<2x65x32xf32, #tpu.memory_space<vmem>>, vector<1x65x32xf32>
    %306 = vector.shape_cast %305 : vector<1x65x32xf32> to vector<65x32xf32>
    %307 = vector.extract_strided_slice %304 {offsets = [0, 0], sizes = [32, 64], strides = [1, 1]} : vector<33x64xf32> to vector<32x64xf32>
    %cst_68 = arith.constant dense<0.000000e+00> : vector<32x64xf32>
    %308 = tpu.matmul %302, %307, %cst_68 {dimension_numbers = #tpu.dot_dimension_numbers<[1], [0], [0], [1], [0, 0, 1, 1], [], []>} : vector<32x32xf32>, vector<32x64xf32>, vector<32x64xf32> -> vector<32x64xf32>
    %309 = vector.extract_strided_slice %304 {offsets = [32, 0], sizes = [1, 64], strides = [1, 1]} : vector<33x64xf32> to vector<1x64xf32>
    %310 = vector.broadcast %309 : vector<1x64xf32> to vector<32x64xf32>
    %311 = arith.addf %308, %310 : vector<32x64xf32>
    %cst_69 = arith.constant 0.000000e+00 : f32
    %312 = vector.broadcast %cst_69 : f32 to vector<32x64xf32>
    %313 = arith.maximumf %311, %312 : vector<32x64xf32>
    %314 = vector.extract_strided_slice %306 {offsets = [0, 0], sizes = [64, 32], strides = [1, 1]} : vector<65x32xf32> to vector<64x32xf32>
    %cst_70 = arith.constant dense<0.000000e+00> : vector<32x32xf32>
    %315 = tpu.matmul %313, %314, %cst_70 {dimension_numbers = #tpu.dot_dimension_numbers<[1], [0], [0], [1], [0, 0, 1, 1], [], []>} : vector<32x64xf32>, vector<64x32xf32>, vector<32x32xf32> -> vector<32x32xf32>
    %316 = vector.extract_strided_slice %306 {offsets = [64, 0], sizes = [1, 32], strides = [1, 1]} : vector<65x32xf32> to vector<1x32xf32>
    %317 = vector.broadcast %316 : vector<1x32xf32> to vector<32x32xf32>
    %318 = arith.addf %315, %317 : vector<32x32xf32>
    %319 = arith.addf %302, %318 : vector<32x32xf32>
    %320 = vector.extract_strided_slice %0 {offsets = [10, 0], sizes = [1, 32], strides = [1, 1]} : vector<21x32xf32> to vector<1x32xf32>
    %321 = vector.extract_strided_slice %0 {offsets = [11, 0], sizes = [1, 32], strides = [1, 1]} : vector<21x32xf32> to vector<1x32xf32>
    %cst_71 = arith.constant dense<0.000000e+00> : vector<32xf32>
    %322 = vector.multi_reduction <add>, %319, %cst_71 [1] : vector<32x32xf32> to vector<32xf32>
    %323 = vector.shape_cast %322 : vector<32xf32> to vector<32x1xf32>
    %cst_72 = arith.constant 3.200000e+01 : f32
    %324 = vector.broadcast %cst_72 : f32 to vector<32x1xf32>
    %325 = arith.divf %323, %324 : vector<32x1xf32>
    %326 = vector.broadcast %325 : vector<32x1xf32> to vector<32x32xf32>
    %327 = arith.subf %319, %326 : vector<32x32xf32>
    %328 = arith.mulf %327, %327 : vector<32x32xf32>
    %cst_73 = arith.constant dense<0.000000e+00> : vector<32xf32>
    %329 = vector.multi_reduction <add>, %328, %cst_73 [1] : vector<32x32xf32> to vector<32xf32>
    %330 = vector.shape_cast %329 : vector<32xf32> to vector<32x1xf32>
    %cst_74 = arith.constant 3.200000e+01 : f32
    %331 = vector.broadcast %cst_74 : f32 to vector<32x1xf32>
    %332 = arith.divf %330, %331 : vector<32x1xf32>
    %cst_75 = arith.constant 9.99999974E-6 : f32
    %333 = vector.broadcast %cst_75 : f32 to vector<32x1xf32>
    %334 = arith.addf %332, %333 : vector<32x1xf32>
    %335 = math.rsqrt %334 : vector<32x1xf32>
    %336 = vector.broadcast %335 : vector<32x1xf32> to vector<32x32xf32>
    %337 = arith.mulf %327, %336 : vector<32x32xf32>
    %338 = vector.broadcast %320 : vector<1x32xf32> to vector<32x32xf32>
    %339 = arith.mulf %337, %338 : vector<32x32xf32>
    %340 = vector.broadcast %321 : vector<1x32xf32> to vector<32x32xf32>
    %341 = arith.addf %339, %340 : vector<32x32xf32>
    %c0_76 = arith.constant 0 : index
    %c0_77 = arith.constant 0 : index
    %342 = vector.load %arg9[%c0_76, %c0_77] : memref<32x32xf32, #tpu.memory_space<vmem>>, vector<32x32xf32>
    tpu.vector_store %arg9[%c0_76, %c0_77], %341 {strides = array<i32>} : memref<32x32xf32, #tpu.memory_space<vmem>>, vector<32x32xf32>,
    %c0_78 = arith.constant 0 : index
    %c0_79 = arith.constant 0 : index
    %343 = vector.load %arg9[%c0_78, %c0_79] : memref<32x32xf32, #tpu.memory_space<vmem>>, vector<32x32xf32>
    %c2 = arith.constant 2 : index
    %c0_80 = arith.constant 0 : index
    %c0_81 = arith.constant 0 : index
    %344 = vector.load %arg4[%c2, %c0_80, %c0_81] : memref<4x33x128xf32, #tpu.memory_space<vmem>>, vector<1x33x128xf32>
    %345 = vector.shape_cast %344 : vector<1x33x128xf32> to vector<33x128xf32>
    %346 = vector.extract_strided_slice %345 {offsets = [0, 0], sizes = [32, 128], strides = [1, 1]} : vector<33x128xf32> to vector<32x128xf32>
    %347 = vector.extract_strided_slice %345 {offsets = [32, 0], sizes = [1, 128], strides = [1, 1]} : vector<33x128xf32> to vector<1x128xf32>
    %348 = vector.extract_strided_slice %346 {offsets = [0, 0], sizes = [32, 96], strides = [1, 1]} : vector<32x128xf32> to vector<32x96xf32>
    %cst_82 = arith.constant dense<0.000000e+00> : vector<32x96xf32>
    %349 = tpu.matmul %343, %348, %cst_82 {dimension_numbers = #tpu.dot_dimension_numbers<[1], [0], [0], [1], [0, 0, 1, 1], [], []>} : vector<32x32xf32>, vector<32x96xf32>, vector<32x96xf32> -> vector<32x96xf32>
    %350 = vector.extract_strided_slice %347 {offsets = [0, 0], sizes = [1, 96], strides = [1, 1]} : vector<1x128xf32> to vector<1x96xf32>
    %351 = vector.broadcast %350 : vector<1x96xf32> to vector<32x96xf32>
    %352 = arith.addf %349, %351 : vector<32x96xf32>
    %353 = vector.extract_strided_slice %352 {offsets = [0, 0], sizes = [32, 32], strides = [1, 1]} : vector<32x96xf32> to vector<32x32xf32>
    %354 = vector.extract_strided_slice %352 {offsets = [0, 32], sizes = [32, 32], strides = [1, 1]} : vector<32x96xf32> to vector<32x32xf32>
    %355 = vector.extract_strided_slice %352 {offsets = [0, 64], sizes = [32, 32], strides = [1, 1]} : vector<32x96xf32> to vector<32x32xf32>
    %356 = vector.broadcast %12 : vector<1x32xf32> to vector<32x32xf32>
    %357 = arith.mulf %354, %356 : vector<32x32xf32>
    %358 = vector.broadcast %19 : vector<1x32xf32> to vector<32x32xf32>
    %359 = arith.mulf %354, %358 : vector<32x32xf32>
    %360 = vector.broadcast %26 : vector<1x32xf32> to vector<32x32xf32>
    %361 = arith.mulf %354, %360 : vector<32x32xf32>
    %362 = vector.broadcast %33 : vector<1x32xf32> to vector<32x32xf32>
    %363 = arith.mulf %354, %362 : vector<32x32xf32>
    %364 = tpu.concatenate %357, %359, %361, %363 in 0 : vector<32x32xf32>, vector<32x32xf32>, vector<32x32xf32>, vector<32x32xf32> -> vector<128x32xf32>
    %365 = vector.broadcast %12 : vector<1x32xf32> to vector<32x32xf32>
    %366 = arith.mulf %355, %365 : vector<32x32xf32>
    %367 = vector.broadcast %19 : vector<1x32xf32> to vector<32x32xf32>
    %368 = arith.mulf %355, %367 : vector<32x32xf32>
    %369 = vector.broadcast %26 : vector<1x32xf32> to vector<32x32xf32>
    %370 = arith.mulf %355, %369 : vector<32x32xf32>
    %371 = vector.broadcast %33 : vector<1x32xf32> to vector<32x32xf32>
    %372 = arith.mulf %355, %371 : vector<32x32xf32>
    %373 = tpu.concatenate %366, %368, %370, %372 in 0 : vector<32x32xf32>, vector<32x32xf32>, vector<32x32xf32>, vector<32x32xf32> -> vector<128x32xf32>
    %cst_83 = arith.constant dense<0.000000e+00> : vector<32x128xf32>
    %374 = tpu.matmul %353, %364, %cst_83 {dimension_numbers = #tpu.dot_dimension_numbers<[1], [1], [0], [0], [0, 0, 1, 0], [], []>} : vector<32x32xf32>, vector<128x32xf32>, vector<32x128xf32> -> vector<32x128xf32>
    %cst_84 = arith.constant 0.353553385 : f32
    %375 = vector.broadcast %cst_84 : f32 to vector<32x128xf32>
    %376 = arith.mulf %374, %375 : vector<32x128xf32>
    %377 = vector.extract_strided_slice %376 {offsets = [0, 0], sizes = [32, 32], strides = [1, 1]} : vector<32x128xf32> to vector<32x32xf32>
    %378 = arith.addf %377, %2 : vector<32x32xf32>
    %cst_85 = arith.constant dense<0xFF800000> : vector<32xf32>
    %379 = vector.multi_reduction <maximumf>, %378, %cst_85 [1] : vector<32x32xf32> to vector<32xf32>
    %380 = vector.shape_cast %379 : vector<32xf32> to vector<32x1xf32>
    %381 = vector.broadcast %380 : vector<32x1xf32> to vector<32x32xf32>
    %382 = arith.subf %378, %381 : vector<32x32xf32>
    %383 = math.exp %382 : vector<32x32xf32>
    %cst_86 = arith.constant dense<0.000000e+00> : vector<32xf32>
    %384 = vector.multi_reduction <add>, %383, %cst_86 [1] : vector<32x32xf32> to vector<32xf32>
    %385 = vector.shape_cast %384 : vector<32xf32> to vector<32x1xf32>
    %386 = tpu.reciprocal %385 {approx = true} : vector<32x1xf32> -> vector<32x1xf32>
    %387 = vector.broadcast %386 : vector<32x1xf32> to vector<32x32xf32>
    %388 = arith.mulf %383, %387 : vector<32x32xf32>
    %389 = vector.extract_strided_slice %376 {offsets = [0, 32], sizes = [32, 32], strides = [1, 1]} : vector<32x128xf32> to vector<32x32xf32>
    %390 = arith.addf %389, %2 : vector<32x32xf32>
    %cst_87 = arith.constant dense<0xFF800000> : vector<32xf32>
    %391 = vector.multi_reduction <maximumf>, %390, %cst_87 [1] : vector<32x32xf32> to vector<32xf32>
    %392 = vector.shape_cast %391 : vector<32xf32> to vector<32x1xf32>
    %393 = vector.broadcast %392 : vector<32x1xf32> to vector<32x32xf32>
    %394 = arith.subf %390, %393 : vector<32x32xf32>
    %395 = math.exp %394 : vector<32x32xf32>
    %cst_88 = arith.constant dense<0.000000e+00> : vector<32xf32>
    %396 = vector.multi_reduction <add>, %395, %cst_88 [1] : vector<32x32xf32> to vector<32xf32>
    %397 = vector.shape_cast %396 : vector<32xf32> to vector<32x1xf32>
    %398 = tpu.reciprocal %397 {approx = true} : vector<32x1xf32> -> vector<32x1xf32>
    %399 = vector.broadcast %398 : vector<32x1xf32> to vector<32x32xf32>
    %400 = arith.mulf %395, %399 : vector<32x32xf32>
    %401 = vector.extract_strided_slice %376 {offsets = [0, 64], sizes = [32, 32], strides = [1, 1]} : vector<32x128xf32> to vector<32x32xf32>
    %402 = arith.addf %401, %2 : vector<32x32xf32>
    %cst_89 = arith.constant dense<0xFF800000> : vector<32xf32>
    %403 = vector.multi_reduction <maximumf>, %402, %cst_89 [1] : vector<32x32xf32> to vector<32xf32>
    %404 = vector.shape_cast %403 : vector<32xf32> to vector<32x1xf32>
    %405 = vector.broadcast %404 : vector<32x1xf32> to vector<32x32xf32>
    %406 = arith.subf %402, %405 : vector<32x32xf32>
    %407 = math.exp %406 : vector<32x32xf32>
    %cst_90 = arith.constant dense<0.000000e+00> : vector<32xf32>
    %408 = vector.multi_reduction <add>, %407, %cst_90 [1] : vector<32x32xf32> to vector<32xf32>
    %409 = vector.shape_cast %408 : vector<32xf32> to vector<32x1xf32>
    %410 = tpu.reciprocal %409 {approx = true} : vector<32x1xf32> -> vector<32x1xf32>
    %411 = vector.broadcast %410 : vector<32x1xf32> to vector<32x32xf32>
    %412 = arith.mulf %407, %411 : vector<32x32xf32>
    %413 = vector.extract_strided_slice %376 {offsets = [0, 96], sizes = [32, 32], strides = [1, 1]} : vector<32x128xf32> to vector<32x32xf32>
    %414 = arith.addf %413, %2 : vector<32x32xf32>
    %cst_91 = arith.constant dense<0xFF800000> : vector<32xf32>
    %415 = vector.multi_reduction <maximumf>, %414, %cst_91 [1] : vector<32x32xf32> to vector<32xf32>
    %416 = vector.shape_cast %415 : vector<32xf32> to vector<32x1xf32>
    %417 = vector.broadcast %416 : vector<32x1xf32> to vector<32x32xf32>
    %418 = arith.subf %414, %417 : vector<32x32xf32>
    %419 = math.exp %418 : vector<32x32xf32>
    %cst_92 = arith.constant dense<0.000000e+00> : vector<32xf32>
    %420 = vector.multi_reduction <add>, %419, %cst_92 [1] : vector<32x32xf32> to vector<32xf32>
    %421 = vector.shape_cast %420 : vector<32xf32> to vector<32x1xf32>
    %422 = tpu.reciprocal %421 {approx = true} : vector<32x1xf32> -> vector<32x1xf32>
    %423 = vector.broadcast %422 : vector<32x1xf32> to vector<32x32xf32>
    %424 = arith.mulf %419, %423 : vector<32x32xf32>
    %425 = tpu.concatenate %388, %400, %412, %424 in 1 : vector<32x32xf32>, vector<32x32xf32>, vector<32x32xf32>, vector<32x32xf32> -> vector<32x128xf32>
    %cst_93 = arith.constant dense<0.000000e+00> : vector<32x32xf32>
    %426 = tpu.matmul %425, %373, %cst_93 {dimension_numbers = #tpu.dot_dimension_numbers<[1], [0], [0], [1], [0, 0, 1, 1], [], []>} : vector<32x128xf32>, vector<128x32xf32>, vector<32x32xf32> -> vector<32x32xf32>
    %427 = vector.extract_strided_slice %346 {offsets = [0, 96], sizes = [32, 32], strides = [1, 1]} : vector<32x128xf32> to vector<32x32xf32>
    %cst_94 = arith.constant dense<0.000000e+00> : vector<32x32xf32>
    %428 = tpu.matmul %426, %427, %cst_94 {dimension_numbers = #tpu.dot_dimension_numbers<[1], [0], [0], [1], [0, 0, 1, 1], [], []>} : vector<32x32xf32>, vector<32x32xf32>, vector<32x32xf32> -> vector<32x32xf32>
    %429 = vector.extract_strided_slice %347 {offsets = [0, 96], sizes = [1, 32], strides = [1, 1]} : vector<1x128xf32> to vector<1x32xf32>
    %430 = vector.broadcast %429 : vector<1x32xf32> to vector<32x32xf32>
    %431 = arith.addf %428, %430 : vector<32x32xf32>
    %432 = arith.addf %343, %431 : vector<32x32xf32>
    %433 = vector.extract_strided_slice %0 {offsets = [12, 0], sizes = [1, 32], strides = [1, 1]} : vector<21x32xf32> to vector<1x32xf32>
    %434 = vector.extract_strided_slice %0 {offsets = [13, 0], sizes = [1, 32], strides = [1, 1]} : vector<21x32xf32> to vector<1x32xf32>
    %cst_95 = arith.constant dense<0.000000e+00> : vector<32xf32>
    %435 = vector.multi_reduction <add>, %432, %cst_95 [1] : vector<32x32xf32> to vector<32xf32>
    %436 = vector.shape_cast %435 : vector<32xf32> to vector<32x1xf32>
    %cst_96 = arith.constant 3.200000e+01 : f32
    %437 = vector.broadcast %cst_96 : f32 to vector<32x1xf32>
    %438 = arith.divf %436, %437 : vector<32x1xf32>
    %439 = vector.broadcast %438 : vector<32x1xf32> to vector<32x32xf32>
    %440 = arith.subf %432, %439 : vector<32x32xf32>
    %441 = arith.mulf %440, %440 : vector<32x32xf32>
    %cst_97 = arith.constant dense<0.000000e+00> : vector<32xf32>
    %442 = vector.multi_reduction <add>, %441, %cst_97 [1] : vector<32x32xf32> to vector<32xf32>
    %443 = vector.shape_cast %442 : vector<32xf32> to vector<32x1xf32>
    %cst_98 = arith.constant 3.200000e+01 : f32
    %444 = vector.broadcast %cst_98 : f32 to vector<32x1xf32>
    %445 = arith.divf %443, %444 : vector<32x1xf32>
    %cst_99 = arith.constant 9.99999974E-6 : f32
    %446 = vector.broadcast %cst_99 : f32 to vector<32x1xf32>
    %447 = arith.addf %445, %446 : vector<32x1xf32>
    %448 = math.rsqrt %447 : vector<32x1xf32>
    %449 = vector.broadcast %448 : vector<32x1xf32> to vector<32x32xf32>
    %450 = arith.mulf %440, %449 : vector<32x32xf32>
    %451 = vector.broadcast %433 : vector<1x32xf32> to vector<32x32xf32>
    %452 = arith.mulf %450, %451 : vector<32x32xf32>
    %453 = vector.broadcast %434 : vector<1x32xf32> to vector<32x32xf32>
    %454 = arith.addf %452, %453 : vector<32x32xf32>
    %c0_100 = arith.constant 0 : index
    %c0_101 = arith.constant 0 : index
    %455 = vector.load %arg9[%c0_100, %c0_101] : memref<32x32xf32, #tpu.memory_space<vmem>>, vector<32x32xf32>
    tpu.vector_store %arg9[%c0_100, %c0_101], %454 {strides = array<i32>} : memref<32x32xf32, #tpu.memory_space<vmem>>, vector<32x32xf32>,
    %456 = vector.extract_strided_slice %454 {offsets = [24, 0], sizes = [8, 32], strides = [1, 1]} : vector<32x32xf32> to vector<8x32xf32>
    %c3 = arith.constant 3 : index
    %c0_102 = arith.constant 0 : index
    %c0_103 = arith.constant 0 : index
    %457 = vector.load %arg4[%c3, %c0_102, %c0_103] : memref<4x33x128xf32, #tpu.memory_space<vmem>>, vector<1x33x128xf32>
    %458 = vector.shape_cast %457 : vector<1x33x128xf32> to vector<33x128xf32>
    %459 = vector.extract_strided_slice %458 {offsets = [0, 0], sizes = [32, 128], strides = [1, 1]} : vector<33x128xf32> to vector<32x128xf32>
    %460 = vector.extract_strided_slice %458 {offsets = [32, 0], sizes = [1, 128], strides = [1, 1]} : vector<33x128xf32> to vector<1x128xf32>
    %461 = vector.extract_strided_slice %459 {offsets = [0, 0], sizes = [32, 32], strides = [1, 1]} : vector<32x128xf32> to vector<32x32xf32>
    %cst_104 = arith.constant dense<0.000000e+00> : vector<8x32xf32>
    %462 = tpu.matmul %456, %461, %cst_104 {dimension_numbers = #tpu.dot_dimension_numbers<[1], [0], [0], [1], [0, 0, 1, 1], [], []>} : vector<8x32xf32>, vector<32x32xf32>, vector<8x32xf32> -> vector<8x32xf32>
    %463 = vector.extract_strided_slice %460 {offsets = [0, 0], sizes = [1, 32], strides = [1, 1]} : vector<1x128xf32> to vector<1x32xf32>
    %464 = vector.broadcast %463 : vector<1x32xf32> to vector<8x32xf32>
    %465 = arith.addf %462, %464 : vector<8x32xf32>
    %466 = vector.extract_strided_slice %459 {offsets = [0, 32], sizes = [32, 64], strides = [1, 1]} : vector<32x128xf32> to vector<32x64xf32>
    %cst_105 = arith.constant dense<0.000000e+00> : vector<8x64xf32>
    %467 = tpu.matmul %45, %466, %cst_105 {dimension_numbers = #tpu.dot_dimension_numbers<[1], [0], [0], [1], [0, 0, 1, 1], [], []>} : vector<8x32xf32>, vector<32x64xf32>, vector<8x64xf32> -> vector<8x64xf32>
    %468 = vector.extract_strided_slice %460 {offsets = [0, 32], sizes = [1, 64], strides = [1, 1]} : vector<1x128xf32> to vector<1x64xf32>
    %469 = vector.broadcast %468 : vector<1x64xf32> to vector<8x64xf32>
    %470 = arith.addf %467, %469 : vector<8x64xf32>
    %471 = vector.extract_strided_slice %470 {offsets = [0, 0], sizes = [8, 32], strides = [1, 1]} : vector<8x64xf32> to vector<8x32xf32>
    %472 = vector.extract_strided_slice %470 {offsets = [0, 32], sizes = [8, 32], strides = [1, 1]} : vector<8x64xf32> to vector<8x32xf32>
    %473 = vector.broadcast %12 : vector<1x32xf32> to vector<8x32xf32>
    %474 = arith.mulf %471, %473 : vector<8x32xf32>
    %475 = vector.broadcast %19 : vector<1x32xf32> to vector<8x32xf32>
    %476 = arith.mulf %471, %475 : vector<8x32xf32>
    %477 = vector.broadcast %26 : vector<1x32xf32> to vector<8x32xf32>
    %478 = arith.mulf %471, %477 : vector<8x32xf32>
    %479 = vector.broadcast %33 : vector<1x32xf32> to vector<8x32xf32>
    %480 = arith.mulf %471, %479 : vector<8x32xf32>
    %481 = tpu.concatenate %474, %476, %478, %480 in 0 : vector<8x32xf32>, vector<8x32xf32>, vector<8x32xf32>, vector<8x32xf32> -> vector<32x32xf32>
    %482 = vector.broadcast %12 : vector<1x32xf32> to vector<8x32xf32>
    %483 = arith.mulf %472, %482 : vector<8x32xf32>
    %484 = vector.broadcast %19 : vector<1x32xf32> to vector<8x32xf32>
    %485 = arith.mulf %472, %484 : vector<8x32xf32>
    %486 = vector.broadcast %26 : vector<1x32xf32> to vector<8x32xf32>
    %487 = arith.mulf %472, %486 : vector<8x32xf32>
    %488 = vector.broadcast %33 : vector<1x32xf32> to vector<8x32xf32>
    %489 = arith.mulf %472, %488 : vector<8x32xf32>
    %490 = tpu.concatenate %483, %485, %487, %489 in 0 : vector<8x32xf32>, vector<8x32xf32>, vector<8x32xf32>, vector<8x32xf32> -> vector<32x32xf32>
    %cst_106 = arith.constant dense<0.000000e+00> : vector<8x32xf32>
    %491 = tpu.matmul %465, %481, %cst_106 {dimension_numbers = #tpu.dot_dimension_numbers<[1], [1], [0], [0], [0, 0, 1, 0], [], []>} : vector<8x32xf32>, vector<32x32xf32>, vector<8x32xf32> -> vector<8x32xf32>
    %cst_107 = arith.constant 0.353553385 : f32
    %492 = vector.broadcast %cst_107 : f32 to vector<8x32xf32>
    %493 = arith.mulf %491, %492 : vector<8x32xf32>
    %494 = vector.extract_strided_slice %493 {offsets = [0, 0], sizes = [8, 8], strides = [1, 1]} : vector<8x32xf32> to vector<8x8xf32>
    %495 = arith.addf %494, %3 : vector<8x8xf32>
    %cst_108 = arith.constant dense<0xFF800000> : vector<8xf32>
    %496 = vector.multi_reduction <maximumf>, %495, %cst_108 [1] : vector<8x8xf32> to vector<8xf32>
    %497 = vector.shape_cast %496 : vector<8xf32> to vector<8x1xf32>
    %498 = vector.broadcast %497 : vector<8x1xf32> to vector<8x8xf32>
    %499 = arith.subf %495, %498 : vector<8x8xf32>
    %500 = math.exp %499 : vector<8x8xf32>
    %cst_109 = arith.constant dense<0.000000e+00> : vector<8xf32>
    %501 = vector.multi_reduction <add>, %500, %cst_109 [1] : vector<8x8xf32> to vector<8xf32>
    %502 = vector.shape_cast %501 : vector<8xf32> to vector<8x1xf32>
    %503 = tpu.reciprocal %502 {approx = true} : vector<8x1xf32> -> vector<8x1xf32>
    %504 = vector.broadcast %503 : vector<8x1xf32> to vector<8x8xf32>
    %505 = arith.mulf %500, %504 : vector<8x8xf32>
    %506 = vector.extract_strided_slice %493 {offsets = [0, 8], sizes = [8, 8], strides = [1, 1]} : vector<8x32xf32> to vector<8x8xf32>
    %507 = arith.addf %506, %3 : vector<8x8xf32>
    %cst_110 = arith.constant dense<0xFF800000> : vector<8xf32>
    %508 = vector.multi_reduction <maximumf>, %507, %cst_110 [1] : vector<8x8xf32> to vector<8xf32>
    %509 = vector.shape_cast %508 : vector<8xf32> to vector<8x1xf32>
    %510 = vector.broadcast %509 : vector<8x1xf32> to vector<8x8xf32>
    %511 = arith.subf %507, %510 : vector<8x8xf32>
    %512 = math.exp %511 : vector<8x8xf32>
    %cst_111 = arith.constant dense<0.000000e+00> : vector<8xf32>
    %513 = vector.multi_reduction <add>, %512, %cst_111 [1] : vector<8x8xf32> to vector<8xf32>
    %514 = vector.shape_cast %513 : vector<8xf32> to vector<8x1xf32>
    %515 = tpu.reciprocal %514 {approx = true} : vector<8x1xf32> -> vector<8x1xf32>
    %516 = vector.broadcast %515 : vector<8x1xf32> to vector<8x8xf32>
    %517 = arith.mulf %512, %516 : vector<8x8xf32>
    %518 = vector.extract_strided_slice %493 {offsets = [0, 16], sizes = [8, 8], strides = [1, 1]} : vector<8x32xf32> to vector<8x8xf32>
    %519 = arith.addf %518, %3 : vector<8x8xf32>
    %cst_112 = arith.constant dense<0xFF800000> : vector<8xf32>
    %520 = vector.multi_reduction <maximumf>, %519, %cst_112 [1] : vector<8x8xf32> to vector<8xf32>
    %521 = vector.shape_cast %520 : vector<8xf32> to vector<8x1xf32>
    %522 = vector.broadcast %521 : vector<8x1xf32> to vector<8x8xf32>
    %523 = arith.subf %519, %522 : vector<8x8xf32>
    %524 = math.exp %523 : vector<8x8xf32>
    %cst_113 = arith.constant dense<0.000000e+00> : vector<8xf32>
    %525 = vector.multi_reduction <add>, %524, %cst_113 [1] : vector<8x8xf32> to vector<8xf32>
    %526 = vector.shape_cast %525 : vector<8xf32> to vector<8x1xf32>
    %527 = tpu.reciprocal %526 {approx = true} : vector<8x1xf32> -> vector<8x1xf32>
    %528 = vector.broadcast %527 : vector<8x1xf32> to vector<8x8xf32>
    %529 = arith.mulf %524, %528 : vector<8x8xf32>
    %530 = vector.extract_strided_slice %493 {offsets = [0, 24], sizes = [8, 8], strides = [1, 1]} : vector<8x32xf32> to vector<8x8xf32>
    %531 = arith.addf %530, %3 : vector<8x8xf32>
    %cst_114 = arith.constant dense<0xFF800000> : vector<8xf32>
    %532 = vector.multi_reduction <maximumf>, %531, %cst_114 [1] : vector<8x8xf32> to vector<8xf32>
    %533 = vector.shape_cast %532 : vector<8xf32> to vector<8x1xf32>
    %534 = vector.broadcast %533 : vector<8x1xf32> to vector<8x8xf32>
    %535 = arith.subf %531, %534 : vector<8x8xf32>
    %536 = math.exp %535 : vector<8x8xf32>
    %cst_115 = arith.constant dense<0.000000e+00> : vector<8xf32>
    %537 = vector.multi_reduction <add>, %536, %cst_115 [1] : vector<8x8xf32> to vector<8xf32>
    %538 = vector.shape_cast %537 : vector<8xf32> to vector<8x1xf32>
    %539 = tpu.reciprocal %538 {approx = true} : vector<8x1xf32> -> vector<8x1xf32>
    %540 = vector.broadcast %539 : vector<8x1xf32> to vector<8x8xf32>
    %541 = arith.mulf %536, %540 : vector<8x8xf32>
    %542 = tpu.concatenate %505, %517, %529, %541 in 1 : vector<8x8xf32>, vector<8x8xf32>, vector<8x8xf32>, vector<8x8xf32> -> vector<8x32xf32>
    %cst_116 = arith.constant dense<0.000000e+00> : vector<8x32xf32>
    %543 = tpu.matmul %542, %490, %cst_116 {dimension_numbers = #tpu.dot_dimension_numbers<[1], [0], [0], [1], [0, 0, 1, 1], [], []>} : vector<8x32xf32>, vector<32x32xf32>, vector<8x32xf32> -> vector<8x32xf32>
    %544 = vector.extract_strided_slice %459 {offsets = [0, 96], sizes = [32, 32], strides = [1, 1]} : vector<32x128xf32> to vector<32x32xf32>
    %cst_117 = arith.constant dense<0.000000e+00> : vector<8x32xf32>
    %545 = tpu.matmul %543, %544, %cst_117 {dimension_numbers = #tpu.dot_dimension_numbers<[1], [0], [0], [1], [0, 0, 1, 1], [], []>} : vector<8x32xf32>, vector<32x32xf32>, vector<8x32xf32> -> vector<8x32xf32>
    %546 = vector.extract_strided_slice %460 {offsets = [0, 96], sizes = [1, 32], strides = [1, 1]} : vector<1x128xf32> to vector<1x32xf32>
    %547 = vector.broadcast %546 : vector<1x32xf32> to vector<8x32xf32>
    %548 = arith.addf %545, %547 : vector<8x32xf32>
    %549 = arith.addf %456, %548 : vector<8x32xf32>
    %550 = vector.extract_strided_slice %0 {offsets = [14, 0], sizes = [1, 32], strides = [1, 1]} : vector<21x32xf32> to vector<1x32xf32>
    %551 = vector.extract_strided_slice %0 {offsets = [15, 0], sizes = [1, 32], strides = [1, 1]} : vector<21x32xf32> to vector<1x32xf32>
    %cst_118 = arith.constant dense<0.000000e+00> : vector<8xf32>
    %552 = vector.multi_reduction <add>, %549, %cst_118 [1] : vector<8x32xf32> to vector<8xf32>
    %553 = vector.shape_cast %552 : vector<8xf32> to vector<8x1xf32>
    %cst_119 = arith.constant 3.200000e+01 : f32
    %554 = vector.broadcast %cst_119 : f32 to vector<8x1xf32>
    %555 = arith.divf %553, %554 : vector<8x1xf32>
    %556 = vector.broadcast %555 : vector<8x1xf32> to vector<8x32xf32>
    %557 = arith.subf %549, %556 : vector<8x32xf32>
    %558 = arith.mulf %557, %557 : vector<8x32xf32>
    %cst_120 = arith.constant dense<0.000000e+00> : vector<8xf32>
    %559 = vector.multi_reduction <add>, %558, %cst_120 [1] : vector<8x32xf32> to vector<8xf32>
    %560 = vector.shape_cast %559 : vector<8xf32> to vector<8x1xf32>
    %cst_121 = arith.constant 3.200000e+01 : f32
    %561 = vector.broadcast %cst_121 : f32 to vector<8x1xf32>
    %562 = arith.divf %560, %561 : vector<8x1xf32>
    %cst_122 = arith.constant 9.99999974E-6 : f32
    %563 = vector.broadcast %cst_122 : f32 to vector<8x1xf32>
    %564 = arith.addf %562, %563 : vector<8x1xf32>
    %565 = math.rsqrt %564 : vector<8x1xf32>
    %566 = vector.broadcast %565 : vector<8x1xf32> to vector<8x32xf32>
    %567 = arith.mulf %557, %566 : vector<8x32xf32>
    %568 = vector.broadcast %550 : vector<1x32xf32> to vector<8x32xf32>
    %569 = arith.mulf %567, %568 : vector<8x32xf32>
    %570 = vector.broadcast %551 : vector<1x32xf32> to vector<8x32xf32>
    %571 = arith.addf %569, %570 : vector<8x32xf32>
    %c24_123 = arith.constant 24 : index
    %c0_124 = arith.constant 0 : index
    %572 = vector.load %arg9[%c24_123, %c0_124] : memref<32x32xf32, #tpu.memory_space<vmem>>, vector<8x32xf32>
    tpu.vector_store %arg9[%c24_123, %c0_124], %571 {strides = array<i32>} : memref<32x32xf32, #tpu.memory_space<vmem>>, vector<8x32xf32>,
    %c0_125 = arith.constant 0 : index
    %c0_126 = arith.constant 0 : index
    %573 = vector.load %arg9[%c0_125, %c0_126] : memref<32x32xf32, #tpu.memory_space<vmem>>, vector<32x32xf32>
    %c1_127 = arith.constant 1 : index
    %c0_128 = arith.constant 0 : index
    %c0_129 = arith.constant 0 : index
    %574 = vector.load %arg5[%c1_127, %c0_128, %c0_129] : memref<2x33x64xf32, #tpu.memory_space<vmem>>, vector<1x33x64xf32>
    %575 = vector.shape_cast %574 : vector<1x33x64xf32> to vector<33x64xf32>
    %c1_130 = arith.constant 1 : index
    %c0_131 = arith.constant 0 : index
    %c0_132 = arith.constant 0 : index
    %576 = vector.load %arg6[%c1_130, %c0_131, %c0_132] : memref<2x65x32xf32, #tpu.memory_space<vmem>>, vector<1x65x32xf32>
    %577 = vector.shape_cast %576 : vector<1x65x32xf32> to vector<65x32xf32>
    %578 = vector.extract_strided_slice %575 {offsets = [0, 0], sizes = [32, 64], strides = [1, 1]} : vector<33x64xf32> to vector<32x64xf32>
    %cst_133 = arith.constant dense<0.000000e+00> : vector<32x64xf32>
    %579 = tpu.matmul %573, %578, %cst_133 {dimension_numbers = #tpu.dot_dimension_numbers<[1], [0], [0], [1], [0, 0, 1, 1], [], []>} : vector<32x32xf32>, vector<32x64xf32>, vector<32x64xf32> -> vector<32x64xf32>
    %580 = vector.extract_strided_slice %575 {offsets = [32, 0], sizes = [1, 64], strides = [1, 1]} : vector<33x64xf32> to vector<1x64xf32>
    %581 = vector.broadcast %580 : vector<1x64xf32> to vector<32x64xf32>
    %582 = arith.addf %579, %581 : vector<32x64xf32>
    %cst_134 = arith.constant 0.000000e+00 : f32
    %583 = vector.broadcast %cst_134 : f32 to vector<32x64xf32>
    %584 = arith.maximumf %582, %583 : vector<32x64xf32>
    %585 = vector.extract_strided_slice %577 {offsets = [0, 0], sizes = [64, 32], strides = [1, 1]} : vector<65x32xf32> to vector<64x32xf32>
    %cst_135 = arith.constant dense<0.000000e+00> : vector<32x32xf32>
    %586 = tpu.matmul %584, %585, %cst_135 {dimension_numbers = #tpu.dot_dimension_numbers<[1], [0], [0], [1], [0, 0, 1, 1], [], []>} : vector<32x64xf32>, vector<64x32xf32>, vector<32x32xf32> -> vector<32x32xf32>
    %587 = vector.extract_strided_slice %577 {offsets = [64, 0], sizes = [1, 32], strides = [1, 1]} : vector<65x32xf32> to vector<1x32xf32>
    %588 = vector.broadcast %587 : vector<1x32xf32> to vector<32x32xf32>
    %589 = arith.addf %586, %588 : vector<32x32xf32>
    %590 = arith.addf %573, %589 : vector<32x32xf32>
    %591 = vector.extract_strided_slice %0 {offsets = [16, 0], sizes = [1, 32], strides = [1, 1]} : vector<21x32xf32> to vector<1x32xf32>
    %592 = vector.extract_strided_slice %0 {offsets = [17, 0], sizes = [1, 32], strides = [1, 1]} : vector<21x32xf32> to vector<1x32xf32>
    %cst_136 = arith.constant dense<0.000000e+00> : vector<32xf32>
    %593 = vector.multi_reduction <add>, %590, %cst_136 [1] : vector<32x32xf32> to vector<32xf32>
    %594 = vector.shape_cast %593 : vector<32xf32> to vector<32x1xf32>
    %cst_137 = arith.constant 3.200000e+01 : f32
    %595 = vector.broadcast %cst_137 : f32 to vector<32x1xf32>
    %596 = arith.divf %594, %595 : vector<32x1xf32>
    %597 = vector.broadcast %596 : vector<32x1xf32> to vector<32x32xf32>
    %598 = arith.subf %590, %597 : vector<32x32xf32>
    %599 = arith.mulf %598, %598 : vector<32x32xf32>
    %cst_138 = arith.constant dense<0.000000e+00> : vector<32xf32>
    %600 = vector.multi_reduction <add>, %599, %cst_138 [1] : vector<32x32xf32> to vector<32xf32>
    %601 = vector.shape_cast %600 : vector<32xf32> to vector<32x1xf32>
    %cst_139 = arith.constant 3.200000e+01 : f32
    %602 = vector.broadcast %cst_139 : f32 to vector<32x1xf32>
    %603 = arith.divf %601, %602 : vector<32x1xf32>
    %cst_140 = arith.constant 9.99999974E-6 : f32
    %604 = vector.broadcast %cst_140 : f32 to vector<32x1xf32>
    %605 = arith.addf %603, %604 : vector<32x1xf32>
    %606 = math.rsqrt %605 : vector<32x1xf32>
    %607 = vector.broadcast %606 : vector<32x1xf32> to vector<32x32xf32>
    %608 = arith.mulf %598, %607 : vector<32x32xf32>
    %609 = vector.broadcast %591 : vector<1x32xf32> to vector<32x32xf32>
    %610 = arith.mulf %608, %609 : vector<32x32xf32>
    %611 = vector.broadcast %592 : vector<1x32xf32> to vector<32x32xf32>
    %612 = arith.addf %610, %611 : vector<32x32xf32>
    %c0_141 = arith.constant 0 : index
    %c0_142 = arith.constant 0 : index
    %613 = vector.load %arg9[%c0_141, %c0_142] : memref<32x32xf32, #tpu.memory_space<vmem>>, vector<32x32xf32>
    tpu.vector_store %arg9[%c0_141, %c0_142], %612 {strides = array<i32>} : memref<32x32xf32, #tpu.memory_space<vmem>>, vector<32x32xf32>,
    %c0_143 = arith.constant 0 : index
    %c0_144 = arith.constant 0 : index
    %614 = vector.load %arg9[%c0_143, %c0_144] : memref<32x32xf32, #tpu.memory_space<vmem>>, vector<32x32xf32>
    %615 = vector.extract_strided_slice %0 {offsets = [18, 0], sizes = [1, 32], strides = [1, 1]} : vector<21x32xf32> to vector<1x32xf32>
    %616 = vector.extract_strided_slice %0 {offsets = [19, 0], sizes = [1, 32], strides = [1, 1]} : vector<21x32xf32> to vector<1x32xf32>
    %cst_145 = arith.constant dense<0.000000e+00> : vector<32xf32>
    %617 = vector.multi_reduction <add>, %614, %cst_145 [1] : vector<32x32xf32> to vector<32xf32>
    %618 = vector.shape_cast %617 : vector<32xf32> to vector<32x1xf32>
    %cst_146 = arith.constant 3.200000e+01 : f32
    %619 = vector.broadcast %cst_146 : f32 to vector<32x1xf32>
    %620 = arith.divf %618, %619 : vector<32x1xf32>
    %621 = vector.broadcast %620 : vector<32x1xf32> to vector<32x32xf32>
    %622 = arith.subf %614, %621 : vector<32x32xf32>
    %623 = arith.mulf %622, %622 : vector<32x32xf32>
    %cst_147 = arith.constant dense<0.000000e+00> : vector<32xf32>
    %624 = vector.multi_reduction <add>, %623, %cst_147 [1] : vector<32x32xf32> to vector<32xf32>
    %625 = vector.shape_cast %624 : vector<32xf32> to vector<32x1xf32>
    %cst_148 = arith.constant 3.200000e+01 : f32
    %626 = vector.broadcast %cst_148 : f32 to vector<32x1xf32>
    %627 = arith.divf %625, %626 : vector<32x1xf32>
    %cst_149 = arith.constant 9.99999974E-6 : f32
    %628 = vector.broadcast %cst_149 : f32 to vector<32x1xf32>
    %629 = arith.addf %627, %628 : vector<32x1xf32>
    %630 = math.rsqrt %629 : vector<32x1xf32>
    %631 = vector.broadcast %630 : vector<32x1xf32> to vector<32x32xf32>
    %632 = arith.mulf %622, %631 : vector<32x32xf32>
    %633 = vector.broadcast %615 : vector<1x32xf32> to vector<32x32xf32>
    %634 = arith.mulf %632, %633 : vector<32x32xf32>
    %635 = vector.broadcast %616 : vector<1x32xf32> to vector<32x32xf32>
    %636 = arith.addf %634, %635 : vector<32x32xf32>
    %c0_150 = arith.constant 0 : index
    %c0_151 = arith.constant 0 : index
    %c0_152 = arith.constant 0 : index
    %637 = vector.load %arg7[%c0_150, %c0_151, %c0_152] : memref<3x32x32xf32, #tpu.memory_space<vmem>>, vector<1x32x32xf32>
    %638 = vector.shape_cast %637 : vector<1x32x32xf32> to vector<32x32xf32>
    %639 = arith.mulf %636, %638 : vector<32x32xf32>
    %cst_153 = arith.constant dense<0.000000e+00> : vector<32xf32>
    %640 = vector.multi_reduction <add>, %639, %cst_153 [1] : vector<32x32xf32> to vector<32xf32>
    %641 = vector.shape_cast %640 : vector<32xf32> to vector<32x1xf32>
    %c1_154 = arith.constant 1 : index
    %c0_155 = arith.constant 0 : index
    %c0_156 = arith.constant 0 : index
    %642 = vector.load %arg7[%c1_154, %c0_155, %c0_156] : memref<3x32x32xf32, #tpu.memory_space<vmem>>, vector<1x32x32xf32>
    %643 = vector.shape_cast %642 : vector<1x32x32xf32> to vector<32x32xf32>
    %644 = arith.mulf %636, %643 : vector<32x32xf32>
    %cst_157 = arith.constant dense<0.000000e+00> : vector<32xf32>
    %645 = vector.multi_reduction <add>, %644, %cst_157 [1] : vector<32x32xf32> to vector<32xf32>
    %646 = vector.shape_cast %645 : vector<32xf32> to vector<32x1xf32>
    %c2_158 = arith.constant 2 : index
    %c0_159 = arith.constant 0 : index
    %c0_160 = arith.constant 0 : index
    %647 = vector.load %arg7[%c2_158, %c0_159, %c0_160] : memref<3x32x32xf32, #tpu.memory_space<vmem>>, vector<1x32x32xf32>
    %648 = vector.shape_cast %647 : vector<1x32x32xf32> to vector<32x32xf32>
    %649 = arith.mulf %636, %648 : vector<32x32xf32>
    %cst_161 = arith.constant dense<0.000000e+00> : vector<32xf32>
    %650 = vector.multi_reduction <add>, %649, %cst_161 [1] : vector<32x32xf32> to vector<32xf32>
    %651 = vector.shape_cast %650 : vector<32xf32> to vector<32x1xf32>
    %652 = tpu.concatenate %641, %646, %651 in 1 : vector<32x1xf32>, vector<32x1xf32>, vector<32x1xf32> -> vector<32x3xf32>
    %cst_162 = arith.constant dense<0.000000e+00> : vector<2x3xf32>
    %653 = tpu.matmul %4, %652, %cst_162 {dimension_numbers = #tpu.dot_dimension_numbers<[1], [0], [0], [1], [0, 0, 1, 1], [], []>} : vector<2x32xf32>, vector<32x3xf32>, vector<2x3xf32> -> vector<2x3xf32>
    %654 = vector.extract_strided_slice %0 {offsets = [20, 0], sizes = [1, 32], strides = [1, 1]} : vector<21x32xf32> to vector<1x32xf32>
    %655 = vector.extract_strided_slice %654 {offsets = [0, 0], sizes = [1, 3], strides = [1, 1]} : vector<1x32xf32> to vector<1x3xf32>
    %656 = vector.broadcast %655 : vector<1x3xf32> to vector<2x3xf32>
    %657 = arith.addf %653, %656 : vector<2x3xf32>
    %c0_163 = arith.constant 0 : index
    %c0_164 = arith.constant 0 : index
    %658 = vector.load %arg8[%c0_163, %c0_164] : memref<2x3xf32, #tpu.memory_space<vmem>>, vector<2x3xf32>
    tpu.vector_store %arg8[%c0_163, %c0_164], %657 {strides = array<i32>} : memref<2x3xf32, #tpu.memory_space<vmem>>, vector<2x3xf32>,
    return
  }
}

</mosaic_0001>

<bundles_post_ra>
// kernel: forward.1
= control target key start
LH: loop header
LB: loop body
LE: loop exit
PB: predicated region body
PF: predicated region fallthrough
CT: control target
= control target key end

     0   :  { %v3485_v1 = vmov 15   ;;  %s5105_s0 = inlined_call_operand.vmem [shape: f32[8,16], index: 0, kind: input, shape index: {}]   ;;  %s5106_s1 = inlined_call_operand.vmem [shape: f32[16,96], index: 1, kind: input, shape index: {}]   ;;  %s5107_s2 = inlined_call_operand.vmem [shape: f32[21,32], index: 2, kind: input, shape index: {}]   ;;  %s5108_s3 = inlined_call_operand.vmem [shape: f32[42,32], index: 3, kind: input, shape index: {}]   ;;  %s5109_s4 = inlined_call_operand.vmem [shape: f32[4,33,128], index: 4, kind: input, shape index: {}]   ;;  %s5110_s5 = inlined_call_operand.vmem [shape: f32[2,33,64], index: 5, kind: input, shape index: {}]   ;;  %s5111_s6 = inlined_call_operand.vmem [shape: f32[2,65,32], index: 6, kind: input, shape index: {}]   ;;  %s5112_s7 = inlined_call_operand.vmem [shape: f32[3,32,32], index: 7, kind: input, shape index: {}]   ;;  %s5113_s8 = inlined_call_operand.hbm [shape: f32[2,3], index: 8, kind: output, shape index: {}]  }
   0x1   :  { %v61_v0 = vld [vmem:[%s5105_s0] sm:$0xff]  ;;  %3050 = vset.pattern.permute.xlu0 %v3485_v1 }
   0x2   :  { %97 = vperm.xlu0 %3050, %v61_v0  }
   0x3   :  { %13 = vsyncpa [#allocation4], 0  ;;  %v62_v2 = vld [vmem:[%s5106_s1] sm:$0xff]  ;;  %s3486_s9 = smov 64   ;;  %vm5117_vm0 = vcmask 130048   ;;  %s3487_s10 = smov 120   ;;  %v39_v14 = vlaneseq }
   0x4   :  { %vm114_vm1 = vcmask 64512   ;;  %s3488_s0 = smov 112   ;;  %v63_v6 = vld [vmem:[%s5106_s1 + $0x8] sm:$0xff]  ;;  %v3561_v7 = vld [vmem:[%s5109_s4 + $0x18] sm:$0xff]  ;;  %v3566_v8 = vld [vmem:[%s5109_s4 + $0x10] sm:$0xff]  ;;  %v3489_v16 = vmov 0.0  }
   0x5   :  { %82 = vmatpush.msra.mxu0 %v63_v6  ;;  %189 = vmatpush.msra.mxu2 %v3561_v7  ;;  %v3574_v10 = vld [vmem:[%s5109_s4 + $0x8] sm:$0xff]  ;;  %v3579_v11 = vld [vmem:[%s5109_s4] sm:$0xff]  ;;  %v40_v15 = vand.u32 127, %v39_v14  ;;  %s3490_s20 = smov 32   ;;  %vm150_vm12 = vcmask 261120   ;;  %s3491_s25 = smov 96  }
   0x6   :  { %v3605_v23 = vld [vmem:[%s5107_s2] sm:$0xff]  ;;  %vm536_vm13 = vcmask 785920   ;;  %vm459_vm14 = vcmask 523520   ;;  %vm613_vm15 = vcmask 1048320   ;;  %s3493_s29 = smov 8   ;;  %s3494_s30 = smov 24  }
   0x7   :  { %83 = vmatpush.msra.mxu0 %v62_v2  ;;  %190 = vmatpush.msra.mxu2 %v3566_v8  ;;  %vm51_vm2 = vcmp.ge.s32.totalorder %v40_v15, 16  ;;  %vm52_vm3 = vcmp.lt.s32.totalorder %v40_v15, 24  ;;  %vm56_vm4 = vcmp.ge.s32.totalorder %v40_v15, 24  ;;  %vm57_vm5 = vcmp.lt.s32.totalorder %v40_v15, 32  ;;  %v3632_v46 = vld [vmem:[%s5109_s4 + $0x20] ss:$0 sm:$0xff] }
   0x8   :  { %2905 = vmatmul.msk.f32.vlgmr.msra.gmra.mxu0 %vm5117_vm0, %v61_v0  ;;  %vm53_vm6 = vmand %vm51_vm2, %vm52_vm3  ;;  %vm46_vm7 = vcmp.ge.s32.totalorder %v40_v15, 8  ;;  %vm47_vm8 = vcmp.lt.s32.totalorder %v40_v15, 16  ;;  %vm42_vm10 = vcmp.lt.s32.totalorder %v40_v15, 8  ;;  %v109_v25 = vperm.slane %v3605_v23, 2  ;;  %s3495_s11 = smov 16   ;;  %s3496_s12 = smov 104  }
   0x9   :  { %191 = vmatpush.msra.mxu2 %v3574_v10  ;;  %v3587_v17 = vsel %vm53_vm6, 1.0, %v3489_v16  ;;  %vm58_vm9 = vmand %vm56_vm4, %vm57_vm5  ;;  %v3598_v21 = vsel %vm42_vm10, 1.0, %v3489_v16  ;;  %v106_v26 = vperm.slane %v3605_v23, 3  ;;  %v88_v32 = vperm.slane %v3605_v23, 0 }
   0xa   :  { %111 = vrot.lane.b32.xlu0 %v62_v2, %s3486_s9  ;;  %v3589_v18 = vsel %vm58_vm9, 1.0, %v3489_v16  ;;  %vm48_vm11 = vmand %vm46_vm7, %vm47_vm8  ;;  %v107_v34 = vperm.slane %v3605_v23, 4  ;;  %v108_v38 = vperm.slane %v3605_v23, 5  ;;  %vm678_vm2 = vcmask 523264  }
   0xb   :  { %192 = vmatpush.msra.mxu2 %v3579_v11  ;;  %v3593_v20 = vpack.i.bf16 %v3587_v17, %v3589_v18  ;;  %v3600_v22 = vsel %vm48_vm11, 1.0, %v3489_v16  ;;  %v3699_v16 = vld [vmem:[%s5108_s3] sm:$0xff]  ;;  %vm683_vm3 = vcmask 785408   ;;  %vm1111_vm8 = vcmask 195712  }
   0xc   :  { %v3609_v24 = vpack.i.bf16 %v3598_v21, %v3600_v22  ;;  %vm1131_vm9 = vcmask 261312   ;;  %vm1091_vm10 = vcmask 130112   ;;  %vm5116_vm11 = vcmask 195584  }
   0xd   :  { %3052 = vrot.lane.b32.xlu2 %v3593_v20, %s3490_s20 }
  0x15   :  { %3057 = vrot.lane.b32.xlu2 %v3609_v24, %s3490_s20 }
  0x67   :  { %v3053_v47 = vpop.permute.xlu2 %3052 }
  0x68   :  { %v3634_v49 = vunpack.i.l.bf16 %v3053_v47  ;;  %v3642_v53 = vunpack.i.h.bf16 %v3053_v47 }
  0x6f   :  { %v3058_v57 = vpop.permute.xlu2 %3057 }
  0x70   :  { %v3653_v59 = vunpack.i.l.bf16 %v3058_v57 }
  0x74   :  { %v98_v3 = vpop.permute.xlu0 %97 }
  0x75   :  { %v100_v4 = vsel %vm5117_vm0, %v61_v0, %v98_v3 }
  0x76   :  { %102 = vrot.lane.b32.xlu1 %v100_v4, %s3487_s10 }
  0x7c   :  { %v112_v5 = vpop.permute.xlu0 %111 }
  0x7d   :  { %136 = vmatpush.msra.mxu1 %v112_v5 }
  0x7e   :  { %104 = vrot.lane.b32.xlu1 %v100_v4, %s3488_s0  ;;  %2906 = vmatmul.msk.f32.vlgmr.msra.gmra.mxu1 %vm114_vm1, %v100_v4  ;;  %v3679_v4 = vunpack.i.h.bf16 %v3058_v57 }
  0x85   :  { %v3617_v31 = vpop.f32.mrf.mxu0 }
  0x86   :  { %v89_v33 = vadd.f32 %v88_v32, %v3617_v31 }
  0x88   :  { %154 = vst.msk [vmem:[#allocation2 + $0x18] sm:$0xff] %vm150_vm12, %v89_v33 }
  0x8f   :  { %v158_v44 = vld [vmem:[#allocation2 + $0x18] sm:$0xff] }
  0xe8   :  { %v103_v13 = vpop.permute.xlu1 %102 }
  0xe9   :  { %2907 = vmatmul.msk.f32.gmra.mxu1 %vm114_vm1, %v103_v13 }
  0xf0   :  { %v105_v19 = vpop.permute.xlu1 %104 }
  0xf1   :  { %2908 = vmatmul.msk.f32.gmra.mxu1 %vm114_vm1, %v105_v19 }
  0xfb   :  { %v138_v27 = vpop.f32.mrf.mxu1 }
  0xfc   :  { %v139_v28 = vadd.f32 %v138_v27, %v109_v25  ;;  %v3723_v27 = vld [vmem:[%s5108_s3 + $0x10] sm:$0xff] }
  0xfe   :  { %v147_v29 = vadd.f32 %v139_v28, %v106_v26  ;;  %v3734_v28 = vld [vmem:[%s5108_s3 + $0x18] sm:$0xff] }
 0x100   :  { %151 = vst.msk [vmem:[#allocation2] sm:$0xff] %vm150_vm12, %v147_v29 }
 0x107   :  { %v155_v30 = vld [vmem:[#allocation2] sm:$0xff] }
 0x108   :  { %2909 = vmatmul.msk.f32.vlgmr.msra.gmra.mxu2 %vm150_vm12, %v155_v30 }
 0x166   :  { %v141_v35 = vpop.f32.mrf.mxu1 }
 0x167   :  { %v142_v36 = vadd.f32 %v141_v35, %v109_v25 }
 0x169   :  { %v148_v37 = vadd.f32 %v142_v36, %v107_v34 }
 0x16b   :  { %152 = vst.msk [vmem:[#allocation2 + $0x8] sm:$0xff] %vm150_vm12, %v148_v37 }
 0x16e   :  { %v144_v39 = vpop.f32.mrf.mxu1 }
 0x16f   :  { %v145_v40 = vadd.f32 %v144_v39, %v109_v25  ;;  %v3711_v25 = vld [vmem:[%s5108_s3 + $0x8] sm:$0xff] }
 0x171   :  { %v149_v41 = vadd.f32 %v145_v40, %v108_v38 }
 0x172   :  { %v156_v42 = vld [vmem:[#allocation2 + $0x8] sm:$0xff] }
 0x173   :  { %153 = vst.msk [vmem:[#allocation2 + $0x10] sm:$0xff] %vm150_vm12, %v149_v41  ;;  %2910 = vmatmul.msk.f32.gmra.mxu2 %vm150_vm12, %v156_v42 }
 0x17a   :  { %v157_v43 = vld [vmem:[#allocation2 + $0x10] sm:$0xff] }
 0x17b   :  { %2911 = vmatmul.msk.f32.gmra.mxu2 %vm150_vm12, %v157_v43 }
 0x183   :  { %2912 = vmatmul.msk.f32.gmra.mxu2 %vm150_vm12, %v158_v44 }
 0x18b   :  { %v194_v45 = vpop.f32.mrf.mxu2 }
 0x18c   :  { %v3668_v0 = vadd.f32 %v3632_v46, %v194_v45 }
 0x18e   :  { %v234_v1 = vmul.f32 %v3634_v49, %v3668_v0  ;;  %v226_v2 = vmul.f32 %v3642_v53, %v3668_v0  ;;  %v218_v3 = vmul.f32 %v3653_v59, %v3668_v0  ;;  %v210_v26 = vmul.f32 %v3679_v4, %v3668_v0 }
 0x1f6   :  { %v197_v48 = vpop.f32.mrf.mxu2 }
 0x1f7   :  { %v3637_v50 = vadd.f32 %v3632_v46, %v197_v48 }
 0x1f9   :  { %v235_v51 = vmul.f32 %v3634_v49, %v3637_v50  ;;  %v227_v5 = vmul.f32 %v3642_v53, %v3637_v50  ;;  %v219_v6 = vmul.f32 %v3653_v59, %v3637_v50  ;;  %v211_v13 = vmul.f32 %v3679_v4, %v3637_v50 }
 0x1fb   :  { %308 = vrot.lane.b32.xlu2 %v235_v51, %s3491_s25 }
 0x1fe   :  { %v200_v52 = vpop.f32.mrf.mxu2 }
 0x1ff   :  { %v3645_v54 = vadd.f32 %v3632_v46, %v200_v52 }
 0x201   :  { %v236_v55 = vmul.f32 %v3634_v49, %v3645_v54  ;;  %v228_v56 = vmul.f32 %v3642_v53, %v3645_v54  ;;  %v220_v14 = vmul.f32 %v3653_v59, %v3645_v54  ;;  %v212_v15 = vmul.f32 %v3679_v4, %v3645_v54 }
 0x203   :  { %310 = vrot.lane.b32.xlu1 %v236_v55, %s3491_s25  ;;  %302 = vrot.lane.b32.xlu2 %v228_v56, %s3491_s25 }
 0x206   :  { %v203_v58 = vpop.f32.mrf.mxu2 }
 0x207   :  { %v3656_v60 = vadd.f32 %v3632_v46, %v203_v58 }
 0x209   :  { %v237_v61 = vmul.f32 %v3634_v49, %v3656_v60  ;;  %v229_v62 = vmul.f32 %v3642_v53, %v3656_v60  ;;  %v221_v63 = vmul.f32 %v3653_v59, %v3656_v60  ;;  %v213_v19 = vmul.f32 %v3679_v4, %v3656_v60 }
 0x20b   :  { %312 = vrot.lane.b32.xlu0 %v237_v61, %s3491_s25  ;;  %304 = vrot.lane.b32.xlu1 %v229_v62, %s3491_s25 }
 0x20c   :  { %296 = vrot.lane.b32.xlu2 %v221_v63, %s3491_s25 }
 0x213   :  { %306 = vrot.lane.b32.xlu0 %v234_v1, %s3491_s25  ;;  %298 = vrot.lane.b32.xlu1 %v226_v2, %s3491_s25 }
 0x214   :  { %290 = vrot.lane.b32.xlu2 %v218_v3, %s3491_s25 }
 0x21b   :  { %300 = vrot.lane.b32.xlu0 %v227_v5, %s3491_s25  ;;  %292 = vrot.lane.b32.xlu1 %v219_v6, %s3491_s25 }
 0x21c   :  { %284 = vrot.lane.b32.xlu2 %v211_v13, %s3491_s25 }
 0x223   :  { %294 = vrot.lane.b32.xlu0 %v220_v14, %s3491_s25  ;;  %286 = vrot.lane.b32.xlu1 %v212_v15, %s3491_s25 }
 0x224   :  { %520 = vrot.lane.b32.xlu2 %v3699_v16, %s3486_s9 }
 0x22b   :  { %443 = vrot.lane.b32.xlu1 %v3699_v16, %s3490_s20  ;;  %288 = vrot.lane.b32.xlu0 %v213_v19, %s3491_s25 }
 0x22c   :  { %522 = vrot.lane.b32.xlu2 %v3711_v25, %s3486_s9 }
 0x233   :  { %445 = vrot.lane.b32.xlu1 %v3711_v25, %s3490_s20  ;;  %282 = vrot.lane.b32.xlu0 %v210_v26, %s3491_s25 }
 0x234   :  { %524 = vrot.lane.b32.xlu2 %v3723_v27, %s3486_s9 }
 0x23b   :  { %447 = vrot.lane.b32.xlu1 %v3723_v27, %s3490_s20  ;;  %597 = vrot.lane.b32.xlu0 %v3699_v16, %s3491_s25 }
 0x23c   :  { %526 = vrot.lane.b32.xlu2 %v3734_v28, %s3486_s9 }
 0x243   :  { %449 = vrot.lane.b32.xlu1 %v3734_v28, %s3490_s20  ;;  %599 = vrot.lane.b32.xlu0 %v3711_v25, %s3491_s25 }
 0x24b   :  { %3067 = vrot.lane.b32.xlu1 %v3609_v24, %s3486_s9  ;;  %601 = vrot.lane.b32.xlu0 %v3723_v27, %s3491_s25 }
 0x253   :  { %603 = vrot.lane.b32.xlu0 %v3734_v28, %s3491_s25 }
 0x255   :  { %v309_v32 = vpop.permute.xlu2 %308 }
 0x25b   :  { %3062 = vrot.lane.b32.xlu0 %v3593_v20, %s3486_s9 }
 0x25d   :  { %v303_v35 = vpop.permute.xlu2 %302 }
 0x266   :  { %v297_v37 = vpop.permute.xlu2 %296 }
 0x26e   :  { %v291_v41 = vpop.permute.xlu2 %290 }
 0x275   :  { %v311_v30 = vpop.permute.xlu1 %310 }
 0x276   :  { %v285_v44 = vpop.permute.xlu2 %284 }
 0x27d   :  { %v313_v29 = vpop.permute.xlu0 %312  ;;  %v305_v24 = vpop.permute.xlu1 %304 }
 0x27e   :  { %2913 = vmatpush.xpose.msk.msra.mxu3 %vm150_vm12, %v313_v29  ;;  %v3811_v26 = vpop.permute.xlu2 %520 }
 0x282   :  { %2914 = vmatpush.xpose.msk.msra.mxu3 %vm150_vm12, %v311_v30 }
 0x285   :  { %v307_v33 = vpop.permute.xlu0 %306  ;;  %v299_v36 = vpop.permute.xlu1 %298 }
 0x286   :  { %2915 = vmatpush.xpose.msk.msra.mxu3 %vm150_vm12, %v309_v32 }
 0x28a   :  { %2916 = vmatpush.xpose.msk.msra.mxu3 %vm150_vm12, %v307_v33 }
 0x28d   :  { %v301_v34 = vpop.permute.xlu0 %300  ;;  %v293_v39 = vpop.permute.xlu1 %292 }
 0x28e   :  { %2917 = vmatpush.xpose.msk.msra.mxu3 %vm150_vm12, %v305_v24 }
 0x292   :  { %2918 = vmatpush.xpose.msk.msra.mxu3 %vm150_vm12, %v303_v35 }
 0x295   :  { %v295_v20 = vpop.permute.xlu0 %294  ;;  %v287_v43 = vpop.permute.xlu1 %286 }
 0x296   :  { %2919 = vmatpush.xpose.msk.msra.mxu3 %vm150_vm12, %v301_v34 }
 0x29a   :  { %2920 = vmatpush.xpose.msk.msra.mxu3 %vm150_vm12, %v299_v36 }
 0x29d   :  { %v289_v38 = vpop.permute.xlu0 %288  ;;  %v3801_v5 = vpop.permute.xlu1 %443 }
 0x29e   :  { %2921 = vmatpush.xpose.msk.msra.mxu3 %vm150_vm12, %v297_v37 }
 0x2a2   :  { %2922 = vmatpush.xpose.msk.msra.mxu3 %vm150_vm12, %v295_v20 }
 0x2a5   :  { %v283_v40 = vpop.permute.xlu0 %282  ;;  %v3803_v6 = vpop.permute.xlu1 %445 }
 0x2a6   :  { %2923 = vmatpush.xpose.msk.msra.mxu3 %vm150_vm12, %v293_v39 }
 0x2aa   :  { %2924 = vmatpush.xpose.msk.msra.mxu3 %vm150_vm12, %v291_v41 }
 0x2ad   :  { %v3762_v42 = vpop.permute.xlu0 %597  ;;  %v3805_v13 = vpop.permute.xlu1 %447 }
 0x2ae   :  { %2925 = vmatpush.xpose.msk.msra.mxu3 %vm150_vm12, %v289_v38 }
 0x2b2   :  { %2926 = vmatpush.xpose.msk.msra.mxu3 %vm150_vm12, %v287_v43 }
 0x2b5   :  { %v3766_v45 = vpop.permute.xlu0 %599  ;;  %v3807_v14 = vpop.permute.xlu1 %449 }
 0x2b6   :  { %2927 = vmatpush.xpose.msk.msra.mxu3 %vm150_vm12, %v285_v44  ;;  %5118 = vst [vmem:[#allocation6_spill] sm:$0xff] %v3807_v14 }
 0x2ba   :  { %2928 = vmatpush.xpose.msk.msra.mxu3 %vm150_vm12, %v283_v40 }
 0x2bd   :  { %2929 = vmatmul.msk.f32.vlgmr.msra.gmra.mxu3 %vm150_vm12, %v3668_v0  ;;  %v3772_v47 = vpop.permute.xlu0 %601  ;;  %v3809_v15 = vpop.permute.xlu1 %3067 }
 0x2c5   :  { %2930 = vmatmul.msk.f32.gmra.mxu3 %vm150_vm12, %v3637_v50  ;;  %v3776_v48 = vpop.permute.xlu0 %603 }
 0x2cd   :  { %2931 = vmatmul.msk.f32.gmra.mxu3 %vm150_vm12, %v3645_v54  ;;  %v3063_v51 = vpop.permute.xlu0 %3062 }
 0x2ce   :  { %v3780_v52 = vunpack.i.l.bf16 %v3063_v51  ;;  %v3790_v61 = vunpack.i.h.bf16 %v3063_v51  ;;  %v3834_v51 = vpop.permute.xlu2 %522 }
 0x2d0   :  { %v264_v55 = vmul.f32 %v3780_v52, %v3645_v54  ;;  %v265_v56 = vmul.f32 %v3780_v52, %v3656_v60  ;;  %v262_v57 = vmul.f32 %v3780_v52, %v3668_v0  ;;  %v263_v58 = vmul.f32 %v3780_v52, %v3637_v50 }
 0x2d1   :  { %v257_v1 = vmul.f32 %v3790_v61, %v3645_v54  ;;  %v258_v2 = vmul.f32 %v3790_v61, %v3656_v60 }
 0x2d2   :  { %v3076_v62 = vpack.i.bf16 %v264_v55, %v265_v56  ;;  %v3071_v63 = vpack.i.bf16 %v262_v57, %v263_v58 }
 0x2d3   :  { %v3081_v3 = vpack.i.bf16 %v257_v1, %v258_v2 }
 0x2d4   :  { %3077 = vrot.lane.b32.xlu1 %v3076_v62, %s3486_s9  ;;  %3072 = vrot.lane.b32.xlu0 %v3071_v63, %s3486_s9 }
 0x2d5   :  { %2932 = vmatmul.msk.f32.gmra.mxu3 %vm150_vm12, %v3656_v60 }
 0x2dc   :  { %3082 = vrot.lane.b32.xlu0 %v3081_v3, %s3486_s9 }
 0x340   :  { %v375_v19 = vpop.f32.mrf.mxu3 }
 0x341   :  { %v387_v29 = vmul.f32 0.35355338, %v375_v19 }
 0x343   :  { %v3814_v30 = vadd.f32 %v3811_v26, %v387_v29  ;;  %v3817_v32 = vadd.f32 %v3801_v5, %v387_v29  ;;  %v3820_v33 = vadd.f32 %v3762_v42, %v387_v29  ;;  %v3829_v41 = vadd.f32 %v387_v29, %v3699_v16 }
 0x345   :  { %v537_v24 = vsel %vm536_vm13, %v3814_v30, -inf  ;;  %v460_v34 = vsel %vm459_vm14, %v3817_v32, -inf  ;;  %v614_v35 = vsel %vm613_vm15, %v3820_v33, -inf  ;;  %v395_v56 = vsel %vm150_vm12, %v3829_v41, -inf }
 0x346   :  { %538 = vmax.xlane.f32.xlu2 %v537_v24  ;;  %461 = vmax.xlane.f32.xlu1 %v460_v34  ;;  %v3078_v20 = vpop.permute.xlu1 %3077  ;;  %v3073_v36 = vpop.permute.xlu0 %3072 }
 0x347   :  { %615 = vmax.xlane.f32.xlu0 %v614_v35  ;;  %v3079_v37 = vunpack.i.l.bf16 %v3078_v20  ;;  %v3080_v40 = vunpack.i.h.bf16 %v3078_v20  ;;  %v3074_v43 = vunpack.i.l.bf16 %v3073_v36  ;;  %v3075_v57 = vunpack.i.h.bf16 %v3073_v36  ;;  %v3855_v35 = vpop.permute.xlu2 %524 }
 0x348   :  { %v378_v38 = vpop.f32.mrf.mxu3 }
 0x349   :  { %v388_v39 = vmul.f32 0.35355338, %v378_v38  ;;  %752 = vmatpush.msrb.mxu1 %v3079_v37 }
 0x34b   :  { %753 = vmatpush.msrb.mxu1 %v3080_v40  ;;  %v3832_v44 = vadd.f32 %v3803_v6, %v388_v39  ;;  %v3841_v2 = vadd.f32 %v3766_v45, %v388_v39  ;;  %v3844_v3 = vadd.f32 %v3834_v51, %v388_v39  ;;  %v3858_v37 = vadd.f32 %v388_v39, %v3711_v25 }
 0x34d   :  { %754 = vmatpush.msrb.mxu1 %v3074_v43  ;;  %v463_v55 = vsel %vm459_vm14, %v3832_v44, -inf  ;;  %v617_v29 = vsel %vm613_vm15, %v3841_v2, -inf  ;;  %v540_v24 = vsel %vm536_vm13, %v3844_v3, -inf  ;;  %v398_v43 = vsel %vm150_vm12, %v3858_v37, -inf }
 0x34e   :  { %464 = vmax.xlane.f32.xlu2 %v463_v55  ;;  %396 = vmax.xlane.f32.xlu1 %v395_v56  ;;  %v3083_v58 = vpop.permute.xlu0 %3082 }
 0x34f   :  { %755 = vmatpush.msrb.mxu1 %v3075_v57  ;;  %v3084_v16 = vunpack.i.l.bf16 %v3083_v58  ;;  %v3085_v1 = vunpack.i.h.bf16 %v3083_v58 }
 0x350   :  { %v381_v62 = vpop.f32.mrf.mxu3 }
 0x351   :  { %v389_v63 = vmul.f32 0.35355338, %v381_v62  ;;  %756 = vmatpush.msrb.mxu1 %v3084_v16  ;;  %v3882_v16 = vpop.permute.xlu2 %526  ;;  %v3885_v62 = vunpack.i.l.bf16 %v3809_v15 }
 0x352   :  { %5119 = vst [vmem:[#allocation7_spill] sm:$0xff] %v3882_v16 }
 0x353   :  { %757 = vmatpush.msrb.mxu1 %v3085_v1  ;;  %v3847_v19 = vadd.f32 %v3805_v13, %v389_v63  ;;  %v3861_v38 = vadd.f32 %v3855_v35, %v389_v63  ;;  %v3873_v25 = vadd.f32 %v3772_v47, %v389_v63  ;;  %v3876_v39 = vadd.f32 %v389_v63, %v3723_v27 }
 0x355   :  { %v466_v34 = vsel %vm459_vm14, %v3847_v19, -inf  ;;  %v543_v55 = vsel %vm536_vm13, %v3861_v38, -inf  ;;  %v620_v57 = vsel %vm613_vm15, %v3873_v25, -inf  ;;  %v401_v58 = vsel %vm150_vm12, %v3876_v39, -inf }
 0x356   :  { %618 = vmax.xlane.f32.xlu2 %v617_v29  ;;  %541 = vmax.xlane.f32.xlu1 %v540_v24  ;;  %v250_v24 = vmul.f32 %v3885_v62, %v3645_v54 }
 0x357   :  { %467 = vmax.xlane.f32.xlu0 %v466_v34  ;;  %v251_v34 = vmul.f32 %v3885_v62, %v3656_v60 }
 0x358   :  { %v384_v20 = vpop.f32.mrf.mxu3 }
 0x359   :  { %v390_v36 = vmul.f32 0.35355338, %v384_v20  ;;  %v3091_v20 = vpack.i.bf16 %v250_v24, %v251_v34 }
 0x35b   :  { %v3864_v40 = vadd.f32 %v3807_v14, %v390_v36  ;;  %v3888_v1 = vadd.f32 %v3776_v48, %v390_v36  ;;  %v3891_v29 = vadd.f32 %v3882_v16, %v390_v36 }
 0x35d   :  { %v469_v56 = vsel %vm459_vm14, %v3864_v40, -inf  ;;  %v623_v27 = vsel %vm613_vm15, %v3888_v1, -inf  ;;  %v546_v63 = vsel %vm536_vm13, %v3891_v29, -inf }
 0x35e   :  { %399 = vmax.xlane.f32.xlu2 %v398_v43  ;;  %544 = vmax.xlane.f32.xlu1 %v543_v55  ;;  %v3902_v43 = vadd.f32 %v390_v36, %v3734_v28 }
 0x35f   :  { %470 = vmax.xlane.f32.xlu0 %v469_v56  ;;  %v255_v56 = vmul.f32 %v3790_v61, %v3668_v0 }
 0x360   :  { %v404_v55 = vsel %vm150_vm12, %v3902_v43, -inf }
 0x366   :  { %621 = vmax.xlane.f32.xlu2 %v620_v57  ;;  %402 = vmax.xlane.f32.xlu1 %v401_v58  ;;  %v256_v57 = vmul.f32 %v3790_v61, %v3637_v50 }
 0x368   :  { %v3086_v58 = vpack.i.bf16 %v255_v56, %v256_v57 }
 0x36e   :  { %624 = vmax.xlane.f32.xlu2 %v623_v27  ;;  %547 = vmax.xlane.f32.xlu1 %v546_v63 }
 0x373   :  { %3092 = vrot.lane.b32.xlu0 %v3091_v20, %s3486_s9 }
 0x376   :  { %405 = vmax.xlane.f32.xlu2 %v404_v55 }
 0x387   :  { %3087 = vrot.lane.b32.xlu1 %v3086_v58, %s3486_s9 }
 0x3b9   :  { %v539_v27 = vpop.xlane.xlu2 %538  ;;  %v462_v63 = vpop.xlane.xlu1 %461 }
 0x3ba   :  { %v549_v28 = vsub.f32 %v3814_v30, %v539_v27  ;;  %v472_v36 = vsub.f32 %v3817_v32, %v462_v63  ;;  %v616_v24 = vpop.xlane.xlu0 %615 }
 0x3bb   :  { %v626_v55 = vsub.f32 %v3820_v33, %v616_v24 }
 0x3bc   :  { %v553_v34 = vmul.f32 1.442695, %v549_v28  ;;  %v476_v20 = vmul.f32 1.442695, %v472_v36 }
 0x3bd   :  { %v630_v16 = vmul.f32 1.442695, %v626_v55 }
 0x3be   :  { %3239 = vpow2.f32 %v553_v34 }
 0x3bf   :  { %3241 = vpow2.f32 %v476_v20 }
 0x3c0   :  { %3243 = vpow2.f32 %v630_v16 }
 0x3c1   :  { %v465_v9 = vpop.xlane.xlu2 %464  ;;  %v397_v12 = vpop.xlane.xlu1 %396 }
 0x3c2   :  { %v407_v56 = vsub.f32 %v3829_v41, %v397_v12  ;;  %v473_v30 = vsub.f32 %v3832_v44, %v465_v9 }
 0x3c4   :  { %v3916_v57 = vpop.eup %3239  ;;  %v411_v58 = vmul.f32 1.442695, %v407_v56  ;;  %v478_v27 = vmul.f32 1.442695, %v473_v30 }
 0x3c5   :  { %v3918_v14 = vpop.eup %3241  ;;  %565 = vrot.lane.b32.xlu0 %v3916_v57, %s3486_s9 }
 0x3c6   :  { %488 = vrot.lane.b32.xlu2 %v3918_v14, %s3491_s25  ;;  %3245 = vpow2.f32 %v411_v58  ;;  %v3926_v41 = vpop.eup %3243 }
 0x3c7   :  { %3247 = vpow2.f32 %v478_v27 }
 0x3c9   :  { %v619_v32 = vpop.xlane.xlu2 %618  ;;  %v542_v33 = vpop.xlane.xlu1 %541 }
 0x3ca   :  { %v550_v12 = vsub.f32 %v3844_v3, %v542_v33  ;;  %v627_v36 = vsub.f32 %v3841_v2, %v619_v32  ;;  %v468_v24 = vpop.xlane.xlu0 %467 }
 0x3cb   :  { %v474_v2 = vsub.f32 %v3847_v19, %v468_v24 }
 0x3cc   :  { %v555_v63 = vmul.f32 1.442695, %v550_v12  ;;  %v3928_v28 = vpop.eup %3245  ;;  %v632_v44 = vmul.f32 1.442695, %v627_v36 }
 0x3cd   :  { %642 = vrot.lane.b32.xlu0 %v3926_v41, %s3490_s20  ;;  %v419_v9 = vsel %vm150_vm12, %v3928_v28, 0.0  ;;  %v3936_v34 = vpop.eup %3247  ;;  %v480_v58 = vmul.f32 1.442695, %v474_v2 }
 0x3ce   :  { %3249 = vpow2.f32 %v555_v63  ;;  %420 = vadd.xlane.f32.xlu1 %v419_v9 }
 0x3cf   :  { %3251 = vpow2.f32 %v632_v44 }
 0x3d1   :  { %v400_v16 = vpop.xlane.xlu2 %399  ;;  %v545_v30 = vpop.xlane.xlu1 %544 }
 0x3d2   :  { %v408_v3 = vsub.f32 %v3858_v37, %v400_v16  ;;  %v551_v33 = vsub.f32 %v3861_v38, %v545_v30  ;;  %v471_v24 = vpop.xlane.xlu0 %470 }
 0x3d4   :  { %v413_v20 = vmul.f32 1.442695, %v408_v3  ;;  %v3938_v55 = vpop.eup %3249  ;;  %v557_v19 = vmul.f32 1.442695, %v551_v33 }
 0x3d5   :  { %490 = vrot.lane.b32.xlu0 %v3936_v34, %s3491_s25  ;;  %567 = vrot.lane.b32.xlu2 %v3938_v55, %s3486_s9  ;;  %v3945_v37 = vpop.eup %3251 }
 0x3d6   :  { %3253 = vpow2.f32 %v413_v20 }
 0x3d7   :  { %3255 = vpow2.f32 %v480_v58 }
 0x3d8   :  { %3257 = vpow2.f32 %v557_v19 }
 0x3d9   :  { %v622_v56 = vpop.xlane.xlu2 %621  ;;  %v403_v44 = vpop.xlane.xlu1 %402 }
 0x3da   :  { %v628_v38 = vsub.f32 %v3873_v25, %v622_v56 }
 0x3dc   :  { %v3947_v32 = vpop.eup %3253  ;;  %v634_v16 = vmul.f32 1.442695, %v628_v38  ;;  %v3979_v38 = vunpack.i.h.bf16 %v3809_v15  ;;  %v248_v15 = vmul.f32 %v3885_v62, %v3668_v0 }
 0x3dd   :  { %644 = vrot.lane.b32.xlu0 %v3945_v37, %s3490_s20  ;;  %v422_v27 = vsel %vm150_vm12, %v3947_v32, 0.0  ;;  %v3955_v36 = vpop.eup %3255 }
 0x3de   :  { %423 = vadd.xlane.f32.xlu1 %v422_v27  ;;  %v3960_v3 = vpop.eup %3257 }
 0x3e1   :  { %v625_v12 = vpop.xlane.xlu2 %624  ;;  %v548_v2 = vpop.xlane.xlu1 %547 }
 0x3e2   :  { %v629_v63 = vsub.f32 %v3888_v1, %v625_v12  ;;  %v475_v1 = vsub.f32 %v3864_v40, %v471_v24  ;;  %v552_v56 = vsub.f32 %v3891_v29, %v548_v2  ;;  %v244_v24 = vmul.f32 %v3979_v38, %v3656_v60 }
 0x3e4   :  { %v636_v9 = vmul.f32 1.442695, %v629_v63  ;;  %v482_v58 = vmul.f32 1.442695, %v475_v1  ;;  %v559_v33 = vmul.f32 1.442695, %v552_v56 }
 0x3e5   :  { %492 = vrot.lane.b32.xlu0 %v3955_v36, %s3491_s25  ;;  %v3093_v19 = vpop.permute.xlu0 %3092 }
 0x3e6   :  { %3259 = vpow2.f32 %v636_v9  ;;  %v3094_v40 = vunpack.i.l.bf16 %v3093_v19  ;;  %v3095_v9 = vunpack.i.h.bf16 %v3093_v19 }
 0x3e7   :  { %3261 = vpow2.f32 %v634_v16  ;;  %v243_v16 = vmul.f32 %v3979_v38, %v3645_v54 }
 0x3e8   :  { %3263 = vpow2.f32 %v482_v58 }
 0x3e9   :  { %3265 = vpow2.f32 %v559_v33  ;;  %v3101_v1 = vpack.i.bf16 %v243_v16, %v244_v24  ;;  %v406_v2 = vpop.xlane.xlu2 %405  ;;  %v242_v16 = vmul.f32 %v3979_v38, %v3637_v50 }
 0x3ec   :  { %v3962_v20 = vpop.eup %3259 }
 0x3ed   :  { %648 = vrot.lane.b32.xlu2 %v3962_v20, %s3490_s20  ;;  %569 = vrot.lane.b32.xlu0 %v3960_v3, %s3486_s9  ;;  %v3969_v25 = vpop.eup %3261 }
 0x3ee   :  { %v3974_v12 = vpop.eup %3263 }
 0x3ef   :  { %v3981_v29 = vpop.eup %3265 }
 0x3f5   :  { %646 = vrot.lane.b32.xlu0 %v3969_v25, %s3490_s20 }
 0x3f9   :  { %v3088_v30 = vpop.permute.xlu1 %3087 }
 0x3fa   :  { %v3089_v27 = vunpack.i.l.bf16 %v3088_v30  ;;  %v3090_v63 = vunpack.i.h.bf16 %v3088_v30  ;;  %v249_v30 = vmul.f32 %v3885_v62, %v3637_v50 }
 0x3fc   :  { %758 = vmatpush.msrb.mxu1 %v3089_v27  ;;  %v3096_v27 = vpack.i.bf16 %v248_v15, %v249_v30  ;;  %v410_v15 = vsub.f32 %v3902_v43, %v406_v2 }
 0x3fd   :  { %494 = vrot.lane.b32.xlu0 %v3974_v12, %s3491_s25 }
 0x3fe   :  { %759 = vmatpush.msrb.mxu1 %v3090_v63  ;;  %v409_v63 = vsub.f32 %v3876_v39, %v403_v44  ;;  %v417_v44 = vmul.f32 1.442695, %v410_v15  ;;  %v5120_v15 = vpack.i.bf16 %v3579_v11, %v3574_v10 }
 0x400   :  { %760 = vmatpush.msrb.mxu1 %v3094_v40 }
 0x402   :  { %761 = vmatpush.msrb.mxu1 %v3095_v9  ;;  %v241_v9 = vmul.f32 %v3979_v38, %v3668_v0 }
 0x405   :  { %571 = vrot.lane.b32.xlu0 %v3981_v29, %s3486_s9 }
 0x40d   :  { %3102 = vrot.lane.b32.xlu0 %v3101_v1, %s3486_s9  ;;  %v415_v1 = vmul.f32 1.442695, %v409_v63 }
 0x40f   :  { %3267 = vpow2.f32 %v415_v1 }
 0x410   :  { %3269 = vpow2.f32 %v417_v44  ;;  %v90_v44 = vperm.slane %v3605_v23, 1 }
 0x415   :  { %v4007_v0 = vpop.eup %3267 }
 0x420   :  { %v489_v58 = vpop.permute.xlu2 %488 }
 0x421   :  { %v500_v56 = vsel %vm150_vm12, %v489_v58, 0.0  ;;  %v3106_v58 = vpack.i.bf16 %v241_v9, %v242_v16 }
 0x422   :  { %501 = vadd.xlane.f32.xlu2 %v500_v56 }
 0x42f   :  { %v568_v56 = vpop.permute.xlu2 %567 }
 0x430   :  { %v580_v39 = vsel %vm150_vm12, %v568_v56, 0.0 }
 0x437   :  { %v566_v33 = vpop.permute.xlu0 %565 }
 0x438   :  { %v577_v54 = vsel %vm150_vm12, %v566_v33, 0.0  ;;  %v425_v33 = vsel %vm150_vm12, %v4007_v0, 0.0 }
 0x439   :  { %578 = vadd.xlane.f32.xlu0 %v577_v54 }
 0x43a   :  { %3097 = vrot.lane.b32.xlu2 %v3096_v27, %s3486_s9  ;;  %v4011_v27 = vpop.eup %3269 }
 0x43f   :  { %v643_v60 = vpop.permute.xlu0 %642 }
 0x440   :  { %v654_v19 = vsel %vm150_vm12, %v643_v60, 0.0  ;;  %v428_v60 = vsel %vm150_vm12, %v4011_v27, 0.0 }
 0x441   :  { %655 = vadd.xlane.f32.xlu1 %v654_v19  ;;  %v421_v11 = vpop.xlane.xlu1 %420 }
 0x442   :  { %3271 = vrcp.f32 %v421_v11 }
 0x447   :  { %v491_v40 = vpop.permute.xlu0 %490 }
 0x448   :  { %v503_v24 = vsel %vm150_vm12, %v491_v40, 0.0 }
 0x449   :  { %504 = vadd.xlane.f32.xlu1 %v503_v24 }
 0x44d   :  { %3107 = vrot.lane.b32.xlu0 %v3106_v58, %s3486_s9  ;;  %v649_v58 = vpop.permute.xlu2 %648 }
 0x44e   :  { %v663_v56 = vsel %vm150_vm12, %v649_v58, 0.0 }
 0x44f   :  { %v645_v30 = vpop.permute.xlu0 %644 }
 0x450   :  { %v657_v43 = vsel %vm150_vm12, %v645_v30, 0.0  ;;  %v5121_v30 = vpack.i.bf16 %v3566_v8, %v3561_v7 }
 0x451   :  { %581 = vadd.xlane.f32.xlu1 %v580_v39  ;;  %v424_v7 = vpop.xlane.xlu1 %423 }
 0x457   :  { %v493_v50 = vpop.permute.xlu0 %492 }
 0x458   :  { %v506_v9 = vsel %vm150_vm12, %v493_v50, 0.0 }
 0x459   :  { %426 = vadd.xlane.f32.xlu1 %v425_v33 }
 0x45f   :  { %v570_v54 = vpop.permute.xlu0 %569 }
 0x460   :  { %v583_v19 = vsel %vm150_vm12, %v570_v54, 0.0 }
 0x461   :  { %429 = vadd.xlane.f32.xlu1 %v428_v60 }
 0x463   :  { %658 = vadd.xlane.f32.xlu2 %v657_v43 }
 0x467   :  { %v647_v2 = vpop.permute.xlu0 %646 }
 0x468   :  { %v660_v40 = vsel %vm150_vm12, %v647_v2, 0.0  ;;  %v3272_v2 = vpop.eup %3271 }
 0x469   :  { %584 = vadd.xlane.f32.xlu1 %v583_v19 }
 0x46f   :  { %v495_v63 = vpop.permute.xlu0 %494 }
 0x470   :  { %v509_v24 = vsel %vm150_vm12, %v495_v63, 0.0 }
 0x471   :  { %661 = vadd.xlane.f32.xlu1 %v660_v40 }
 0x477   :  { %507 = vadd.xlane.f32.xlu0 %v506_v9  ;;  %v572_v16 = vpop.permute.xlu0 %571 }
 0x478   :  { %v586_v1 = vsel %vm150_vm12, %v572_v16, 0.0 }
 0x479   :  { %510 = vadd.xlane.f32.xlu1 %v509_v24  ;;  %587 = vadd.xlane.f32.xlu2 %v586_v1  ;;  %v435_v1 = vmul.f32 %v3272_v2, %v3928_v28 }
 0x47f   :  { %v3103_v54 = vpop.permute.xlu0 %3102 }
 0x480   :  { %v3104_v10 = vunpack.i.l.bf16 %v3103_v54  ;;  %v3105_v43 = vunpack.i.h.bf16 %v3103_v54  ;;  %v2937_v54 = vld [vmem:[%s5109_s4 + $0x28] sm:$0xff] }
 0x481   :  { %664 = vadd.xlane.f32.xlu1 %v663_v56 }
 0x48b   :  { %3117 = vrot.lane.b32.xlu0 %v5120_v15, %s3490_s20 }
 0x491   :  { %3112 = vrot.lane.b32.xlu2 %v5121_v30, %s3490_s20 }
 0x495   :  { %v502_v39 = vpop.xlane.xlu2 %501 }
 0x496   :  { %3273 = vrcp.f32 %v502_v39 }
 0x499   :  { %92 = vrot.lane.b32.xlu2 %v90_v44, %s3490_s20 }
 0x49a   :  { %798 = vrot.lane.b32.xlu1 %v3632_v46, %s3490_s20 }
 0x49c   :  { %v3274_v46 = vpop.eup %3273 }
 0x49d   :  { %v3098_v50 = vpop.permute.xlu2 %3097  ;;  %v516_v9 = vmul.f32 %v3274_v46, %v3918_v14 }
 0x49e   :  { %v3099_v33 = vunpack.i.l.bf16 %v3098_v50  ;;  %v3100_v60 = vunpack.i.h.bf16 %v3098_v50 }
 0x49f   :  { %v674_v30 = vsel %vm150_vm12, %v435_v1, %v516_v9 }
 0x4a0   :  { %762 = vmatpush.msrb.mxu1 %v3099_v33 }
 0x4a2   :  { %763 = vmatpush.msrb.mxu1 %v3100_v60  ;;  %v2938_v60 = vld [vmem:[%s5109_s4 + $0x30] sm:$0xff] }
 0x4a3   :  { %v4057_v11 = vpack.i.bf16 %v2937_v54, %v2938_v60 }
 0x4a4   :  { %764 = vmatpush.msrb.mxu1 %v3104_v10 }
 0x4a6   :  { %765 = vmatpush.msrb.mxu1 %v3105_v43 }
 0x4ac   :  { %v579_v8 = vpop.xlane.xlu0 %578 }
 0x4ad   :  { %3275 = vrcp.f32 %v579_v8 }
 0x4b3   :  { %v3276_v19 = vpop.eup %3275 }
 0x4b4   :  { %v656_v23 = vpop.xlane.xlu1 %655  ;;  %v593_v24 = vmul.f32 %v3276_v19, %v3916_v57  ;;  %v2939_v57 = vld [vmem:[%s5109_s4 + $0x38] sm:$0xff] }
 0x4b5   :  { %3277 = vrcp.f32 %v656_v23 }
 0x4b6   :  { %v679_v39 = vsel %vm678_vm2, %v674_v30, %v593_v24 }
 0x4bb   :  { %v3278_v40 = vpop.eup %3277 }
 0x4bc   :  { %v505_v63 = vpop.xlane.xlu1 %504  ;;  %v670_v56 = vmul.f32 %v3278_v40, %v3926_v41  ;;  %v2940_v41 = vld [vmem:[%s5109_s4 + $0x40] sm:$0xff] }
 0x4bd   :  { %v4047_v28 = vpack.i.bf16 %v2939_v57, %v2940_v41  ;;  %977 = vmatpush.msrb.mxu2 %v2940_v41  ;;  %3279 = vrcp.f32 %v505_v63 }
 0x4be   :  { %v684_v14 = vsel %vm683_vm3, %v679_v39, %v670_v56 }
 0x4bf   :  { %v3108_v16 = vpop.permute.xlu0 %3107  ;;  %3122 = vrot.lane.b32.xlu2 %v4047_v28, %s3491_s25  ;;  %978 = vmatpush.msrb.mxu2 %v2939_v57 }
 0x4c0   :  { %v3109_v58 = vunpack.i.l.bf16 %v3108_v16  ;;  %v3110_v15 = vunpack.i.h.bf16 %v3108_v16 }
 0x4c1   :  { %979 = vmatpush.msrb.mxu2 %v2938_v60 }
 0x4c2   :  { %766 = vmatpush.msrb.mxu1 %v3109_v58 }
 0x4c3   :  { %v3280_v43 = vpop.eup %3279  ;;  %980 = vmatpush.msrb.mxu2 %v2937_v54 }
 0x4c4   :  { %v582_v44 = vpop.xlane.xlu1 %581  ;;  %767 = vmatpush.msrb.mxu1 %v3110_v15 }
 0x4c5   :  { %768 = vmatmul.f32.vlgmr.msrb.gmra.mxu1 %v684_v14  ;;  %3281 = vrcp.f32 %v582_v44 }
 0x4c6   :  { %3283 = vrcp.f32 %v424_v7  ;;  %v517_v7 = vmul.f32 %v3280_v43, %v3936_v34 }
 0x4c7   :  { %3127 = vrot.lane.b32.xlu2 %v4057_v11, %s3491_s25 }
 0x4cb   :  { %v3282_v8 = vpop.eup %3281 }
 0x4cc   :  { %v427_v50 = vpop.xlane.xlu1 %426  ;;  %v3284_v23 = vpop.eup %3283  ;;  %v594_v2 = vmul.f32 %v3282_v8, %v3938_v55 }
 0x4cd   :  { %v436_v46 = vmul.f32 %v3284_v23, %v3947_v32 }
 0x4cf   :  { %v675_v9 = vsel %vm150_vm12, %v436_v46, %v517_v7 }
 0x4d0   :  { %v680_v16 = vsel %vm678_vm2, %v675_v9, %v594_v2 }
 0x4d4   :  { %v430_v33 = vpop.xlane.xlu1 %429 }
 0x4d6   :  { %v659_v10 = vpop.xlane.xlu2 %658 }
 0x4d7   :  { %3285 = vrcp.f32 %v659_v10 }
 0x4d8   :  { %3287 = vrcp.f32 %v427_v50 }
 0x4dc   :  { %v585_v19 = vpop.xlane.xlu1 %584 }
 0x4dd   :  { %v3286_v63 = vpop.eup %3285  ;;  %3289 = vrcp.f32 %v585_v19 }
 0x4de   :  { %v671_v40 = vmul.f32 %v3286_v63, %v3945_v37  ;;  %v3288_v32 = vpop.eup %3287 }
 0x4df   :  { %v437_v30 = vmul.f32 %v3288_v32, %v4007_v0 }
 0x4e0   :  { %v685_v24 = vsel %vm683_vm3, %v680_v16, %v671_v40 }
 0x4e1   :  { %771 = vmatmul.f32.gmra.mxu1 %v685_v24 }
 0x4e3   :  { %v3290_v56 = vpop.eup %3289 }
 0x4e4   :  { %v662_v1 = vpop.xlane.xlu1 %661  ;;  %v595_v14 = vmul.f32 %v3290_v56, %v3960_v3 }
 0x4e5   :  { %3291 = vrcp.f32 %v662_v1 }
 0x4ea   :  { %v508_v34 = vpop.xlane.xlu0 %507 }
 0x4eb   :  { %3293 = vrcp.f32 %v508_v34  ;;  %v3292_v37 = vpop.eup %3291 }
 0x4ec   :  { %v511_v55 = vpop.xlane.xlu1 %510  ;;  %v588_v58 = vpop.xlane.xlu2 %587  ;;  %v672_v41 = vmul.f32 %v3292_v37, %v3969_v25 }
 0x4ed   :  { %3295 = vrcp.f32 %v511_v55 }
 0x4ee   :  { %3297 = vrcp.f32 %v430_v33 }
 0x4ef   :  { %3299 = vrcp.f32 %v588_v58  ;;  %v4089_v58 = vld [vmem:[%s5109_s4 + $0x48] ss:$0 sm:$0xff] }
 0x4f1   :  { %v3294_v15 = vpop.eup %3293 }
 0x4f2   :  { %v518_v39 = vmul.f32 %v3294_v15, %v3955_v36 }
 0x4f3   :  { %v3296_v44 = vpop.eup %3295 }
 0x4f4   :  { %v665_v50 = vpop.xlane.xlu1 %664  ;;  %v3113_v57 = vpop.permute.xlu2 %3112  ;;  %v676_v54 = vsel %vm150_vm12, %v437_v30, %v518_v39  ;;  %v519_v8 = vmul.f32 %v3296_v44, %v3974_v12 }
 0x4f5   :  { %v3298_v60 = vpop.eup %3297  ;;  %3301 = vrcp.f32 %v665_v50  ;;  %v681_v33 = vsel %vm678_vm2, %v676_v54, %v595_v14  ;;  %v3114_v10 = vunpack.i.l.bf16 %v3113_v57  ;;  %v3115_v36 = vunpack.i.h.bf16 %v3113_v57  ;;  %v3445_v57 = vld [vmem:[#allocation2 + $0x18] sm:$0xff] }
 0x4f6   :  { %v3300_v43 = vpop.eup %3299  ;;  %v686_v0 = vsel %vm683_vm3, %v681_v33, %v672_v41  ;;  %v438_v3 = vmul.f32 %v3298_v60, %v4011_v27 }
 0x4f7   :  { %774 = vmatmul.f32.gmra.mxu1 %v686_v0  ;;  %825 = vmatpush.msrb.mxu0 %v3114_v10  ;;  %v596_v23 = vmul.f32 %v3300_v43, %v3981_v29 }
 0x4f8   :  { %v677_v25 = vsel %vm150_vm12, %v438_v3, %v519_v8  ;;  %v3492_v3 = vmov 32.0  }
 0x4f9   :  { %826 = vmatpush.msrb.mxu0 %v3115_v36  ;;  %v682_v12 = vsel %vm678_vm2, %v677_v25, %v596_v23  ;;  %3303 = vrcp.f32 %v3492_v3 }
 0x4fb   :  { %v3302_v7 = vpop.eup %3301 }
 0x4fc   :  { %v93_v2 = vpop.permute.xlu2 %92  ;;  %v673_v46 = vmul.f32 %v3302_v7, %v3962_v20 }
 0x4fd   :  { %v95_v19 = vadd.f32 %v93_v2, %v3617_v31  ;;  %v3118_v63 = vpop.permute.xlu0 %3117 }
 0x4fe   :  { %v687_v40 = vsel %vm683_vm3, %v682_v12, %v673_v46  ;;  %v3119_v9 = vunpack.i.l.bf16 %v3118_v63  ;;  %v3120_v29 = vunpack.i.h.bf16 %v3118_v63 }
 0x4ff   :  { %986 = vrot.lane.b32.xlu2 %v95_v19, %s3491_s25  ;;  %777 = vmatmul.f32.gmra.mxu1 %v687_v40  ;;  %v3304_v23 = vpop.eup %3303 }
 0x500   :  { %827 = vmatpush.msrb.mxu0 %v3119_v9  ;;  %v859_v25 = vmul.f32 32.0, %v3304_v23  ;;  %vm863_vm4 = vweird.f32 %v3304_v23 }
 0x502   :  { %828 = vmatpush.msrb.mxu0 %v3120_v29  ;;  %v860_v7 = vsub.f32 1.0, %v859_v25 }
 0x504   :  { %v861_v2 = vmul.f32 %v3304_v23, %v860_v7 }
 0x506   :  { %v862_v46 = vadd.f32 %v3304_v23, %v861_v2 }
 0x507   :  { %1005 = vrot.lane.b32.xlu2 %v4089_v58, %s3491_s25 }
 0x508   :  { %v4123_v19 = vsel %vm863_vm4, %v3304_v23, %v862_v46 }
 0x50c   :  { %v4105_v44 = vpop.permute.xlu1 %798 }
 0x519   :  { %v3123_v27 = vpop.permute.xlu2 %3122 }
 0x51a   :  { %v3125_v16 = vunpack.i.h.bf16 %v3123_v27  ;;  %v3124_v24 = vunpack.i.l.bf16 %v3123_v27 }
 0x51c   :  { %1022 = vmatpush.msra.mxu0 %v3124_v24 }
 0x51e   :  { %1023 = vmatpush.msra.mxu0 %v3125_v16 }
 0x521   :  { %v3128_v20 = vpop.permute.xlu2 %3127 }
 0x522   :  { %v3130_v1 = vunpack.i.h.bf16 %v3128_v20  ;;  %v3129_v31 = vunpack.i.l.bf16 %v3128_v20 }
 0x524   :  { %1024 = vmatpush.msra.mxu0 %v3129_v31 }
 0x526   :  { %1025 = vmatpush.msra.mxu0 %v3130_v1 }
 0x542   :  { %v769_v34 = vpop.f32.mrf.mxu1 }
 0x543   :  { %2933 = vmatmul.msk.f32.vlgmr.msrb.gmra.mxu0 %vm150_vm12, %v769_v34 }
 0x559   :  { %v4095_v37 = vpop.permute.xlu2 %986 }
 0x55e   :  { %v772_v55 = vpop.f32.mrf.mxu1 }
 0x55f   :  { %2934 = vmatmul.msk.f32.gmra.mxu0 %vm150_vm12, %v772_v55 }
 0x561   :  { %v1006_v60 = vpop.permute.xlu2 %1005 }
 0x574   :  { %v775_v32 = vpop.f32.mrf.mxu1 }
 0x575   :  { %2935 = vmatmul.msk.f32.gmra.mxu0 %vm150_vm12, %v775_v32 }
 0x57c   :  { %v778_v56 = vpop.f32.mrf.mxu1 }
 0x57d   :  { %2936 = vmatmul.msk.f32.gmra.mxu0 %vm150_vm12, %v778_v56  ;;  %v3446_v56 = vld [vmem:[%s5107_s2] sm:$0xff] }
 0x585   :  { %2943 = vmatmul.msk.f32.vlgmr.msra.gmra.mxu0 %vm150_vm12, %v4095_v37 }
 0x5c0   :  { %v4099_v15 = vpop.f32.mrf.mxu0 }
 0x5dc   :  { %v4101_v30 = vpop.f32.mrf.mxu0 }
 0x5f2   :  { %v4103_v39 = vpop.f32.mrf.mxu0 }
 0x5fa   :  { %v839_v14 = vpop.f32.mrf.mxu0 }
 0x5fb   :  { %v840_v50 = vadd.f32 %v839_v14, %v4105_v44  ;;  %v4131_v14 = vperm.slane %v3446_v56, 6 }
 0x5fd   :  { %v845_v41 = vadd.f32 %v3445_v57, %v840_v50 }
 0x5ff   :  { %v855_v54 = vsel %vm150_vm12, %v845_v41, 0.0 }
 0x600   :  { %856 = vadd.xlane.f32.xlu0 %v855_v54 }
 0x602   :  { %v1027_v33 = vpop.f32.mrf.mxu0 }
 0x603   :  { %v4109_v10 = vadd.f32 %v1027_v33, %v1006_v60  ;;  %v37_v33 = vld [vmem:[%s5108_s3 + $0x20] sm:$0xff] }
 0x604   :  { %1107 = vrot.lane.b32.xlu2 %v37_v33, %s3495_s11 }
 0x605   :  { %v1033_v43 = vmul.f32 %v3589_v18, %v4109_v10  ;;  %v1032_v8 = vmul.f32 %v3587_v17, %v4109_v10  ;;  %v1031_v0 = vmul.f32 %v3600_v22, %v4109_v10  ;;  %v1030_v36 = vmul.f32 %v3598_v21, %v4109_v10 }
 0x607   :  { %2944 = vmatpush.xpose.msk.msra.mxu2 %vm150_vm12, %v1033_v43 }
 0x60b   :  { %2945 = vmatpush.xpose.msk.msra.mxu2 %vm150_vm12, %v1032_v8 }
 0x60f   :  { %2946 = vmatpush.xpose.msk.msra.mxu2 %vm150_vm12, %v1031_v0 }
 0x613   :  { %2947 = vmatpush.xpose.msk.msra.mxu2 %vm150_vm12, %v1030_v36 }
 0x614   :  { %1087 = vrot.lane.b32.xlu0 %v37_v33, %s3493_s29 }
 0x65e   :  { %v4148_v0 = vpop.permute.xlu2 %1107 }
 0x673   :  { %v857_v12 = vpop.xlane.xlu0 %856 }
 0x674   :  { %v868_v63 = vmul.f32 %v4123_v19, %v857_v12 }
 0x676   :  { %v872_v40 = vsub.f32 %v845_v41, %v868_v63  ;;  %v4133_v41 = vperm.slane %v3446_v56, 7 }
 0x678   :  { %v876_v9 = vmul.f32 %v872_v40, %v872_v40 }
 0x67a   :  { %v886_v29 = vsel %vm150_vm12, %v876_v9, 0.0 }
 0x67b   :  { %887 = vadd.xlane.f32.xlu1 %v886_v29 }
 0x686   :  { %v4152_v23 = vpop.permute.xlu0 %1087 }
 0x694   :  { %1127 = vrot.lane.b32.xlu1 %v37_v33, %s3494_s30 }
 0x6ee   :  { %v888_v27 = vpop.xlane.xlu1 %887 }
 0x6ef   :  { %v892_v16 = vmul.f32 %v888_v27, %v4123_v19 }
 0x6f1   :  { %v896_v24 = vadd.f32 1e-05, %v892_v16 }
 0x6f3   :  { %3305 = vrsqrt.f32 %v896_v24  ;;  %vm933_vm6 = vweird.f32 %v896_v24 }
 0x6f9   :  { %v3306_v20 = vpop.eup %3305 }
 0x6fa   :  { %v928_v1 = vmul.f32 %v3306_v20, %v896_v24  ;;  %vm934_vm5 = vweird.f32 %v3306_v20 }
 0x6fb   :  { %vm935_vm7 = vmor %vm933_vm6, %vm934_vm5 }
 0x6fc   :  { %v929_v31 = vmul.f32 %v3306_v20, %v928_v1 }
 0x6fe   :  { %v930_v34 = vmul.f32 0.5, %v929_v31 }
 0x700   :  { %v931_v55 = vsub.f32 1.5, %v930_v34 }
 0x702   :  { %v932_v32 = vmul.f32 %v3306_v20, %v931_v55 }
 0x704   :  { %v936_v50 = vsel %vm935_vm7, %v3306_v20, %v932_v32 }
 0x705   :  { %v940_v57 = vmul.f32 %v936_v50, %v872_v40 }
 0x706   :  { %v4150_v36 = vpop.permute.xlu1 %1127 }
 0x707   :  { %v945_v54 = vmul.f32 %v4131_v14, %v940_v57 }
 0x709   :  { %v4137_v60 = vadd.f32 %v4133_v41, %v945_v54 }
 0x70b   :  { %954 = vst.msk [vmem:[#allocation2 + $0x18] sm:$0xff] %vm150_vm12, %v4137_v60  ;;  %2942 = vmatmul.msk.f32.vlgmr.msrb.gmra.mxu2 %vm150_vm12, %v4137_v60 }
 0x78e   :  { %v982_v43 = vpop.f32.mrf.mxu2 }
 0x78f   :  { %v983_v8 = vadd.f32 %v4089_v58, %v982_v43 }
 0x791   :  { %2948 = vmatmul.msk.f32.vlgmr.msra.gmra.mxu2 %vm150_vm12, %v983_v8 }
 0x814   :  { %v1070_v3 = vpop.f32.mrf.mxu2 }
 0x815   :  { %v1073_v25 = vmul.f32 0.35355338, %v1070_v3 }
 0x817   :  { %v1110_v7 = vadd.f32 %v4148_v0, %v1073_v25  ;;  %v1130_v2 = vadd.f32 %v4150_v36, %v1073_v25  ;;  %v1090_v46 = vadd.f32 %v4152_v23, %v1073_v25  ;;  %v1074_v9 = vadd.f32 %v1073_v25, %v37_v33 }
 0x819   :  { %v1112_v12 = vsel %vm1111_vm8, %v1110_v7, -inf  ;;  %v1132_v63 = vsel %vm1131_vm9, %v1130_v2, -inf  ;;  %v1092_v40 = vsel %vm1091_vm10, %v1090_v46, -inf  ;;  %v1075_v29 = vsel %vm114_vm1, %v1074_v9, -inf }
 0x81a   :  { %1113 = vmax.xlane.f32.xlu0 %v1112_v12  ;;  %1133 = vmax.xlane.f32.xlu1 %v1132_v63 }
 0x81b   :  { %1093 = vmax.xlane.f32.xlu2 %v1092_v40 }
 0x823   :  { %1076 = vmax.xlane.f32.xlu2 %v1075_v29 }
 0x88d   :  { %v1134_v27 = vpop.xlane.xlu1 %1133  ;;  %v1114_v16 = vpop.xlane.xlu0 %1113 }
 0x88e   :  { %v1135_v24 = vsub.f32 %v1130_v2, %v1134_v27  ;;  %v1094_v20 = vpop.xlane.xlu2 %1093  ;;  %v1115_v1 = vsub.f32 %v1110_v7, %v1114_v16  ;;  %v1036_v2 = vmul.f32 %v3642_v53, %v4109_v10  ;;  %v1034_v27 = vmul.f32 %v3679_v4, %v4109_v10 }
 0x88f   :  { %v1095_v31 = vsub.f32 %v1090_v46, %v1094_v20  ;;  %v1037_v46 = vmul.f32 %v3634_v49, %v4109_v10  ;;  %v1035_v16 = vmul.f32 %v3653_v59, %v4109_v10  ;;  %v834_v20 = vadd.f32 %v4101_v30, %v4105_v44 }
 0x890   :  { %v1136_v34 = vmul.f32 1.442695, %v1135_v24  ;;  %v1116_v55 = vmul.f32 1.442695, %v1115_v1  ;;  %v3447_v1 = vld [vmem:[#allocation2 + $0x8] sm:$0xff]  ;;  %v837_v10 = vadd.f32 %v4103_v39, %v4105_v44 }
 0x891   :  { %v1096_v32 = vmul.f32 1.442695, %v1095_v31  ;;  %v3131_v12 = vpack.i.bf16 %v1036_v2, %v1037_v46  ;;  %v3136_v24 = vpack.i.bf16 %v1034_v27, %v1035_v16  ;;  %v831_v31 = vadd.f32 %v4099_v15, %v4105_v44 }
 0x892   :  { %3307 = vpow2.f32 %v1136_v34  ;;  %v3448_v34 = vld [vmem:[#allocation2] sm:$0xff] }
 0x893   :  { %3309 = vpow2.f32 %v1096_v32  ;;  %v3449_v32 = vld [vmem:[#allocation2 + $0x10] sm:$0xff] }
 0x894   :  { %3311 = vpow2.f32 %v1116_v55  ;;  %v842_v55 = vadd.f32 %v3448_v34, %v831_v31 }
 0x896   :  { %v1077_v54 = vpop.xlane.xlu2 %1076 }
 0x897   :  { %v1078_v33 = vsub.f32 %v1074_v9, %v1077_v54  ;;  %v844_v54 = vadd.f32 %v3449_v32, %v837_v10 }
 0x898   :  { %v4161_v56 = vpop.eup %3307 }
 0x899   :  { %v4163_v50 = vpop.eup %3309  ;;  %1139 = vrot.lane.b32.xlu1 %v4161_v56, %s3496_s12  ;;  %v1079_v43 = vmul.f32 1.442695, %v1078_v33  ;;  %v852_v30 = vsel %vm150_vm12, %v844_v54, 0.0 }
 0x89a   :  { %v4167_v57 = vpop.eup %3311  ;;  %1099 = vrot.lane.b32.xlu2 %v4163_v50, %s3487_s10 }
 0x89b   :  { %1119 = vrot.lane.b32.xlu0 %v4167_v57, %s3488_s0  ;;  %3313 = vpow2.f32 %v1079_v43 }
 0x8a1   :  { %v3314_v8 = vpop.eup %3313 }
 0x8a2   :  { %v1081_v3 = vsel %vm114_vm1, %v3314_v8, 0.0 }
 0x8c3   :  { %1082 = vadd.xlane.f32.xlu2 %v1081_v3 }
 0x8f4   :  { %v1100_v25 = vpop.permute.xlu2 %1099 }
 0x8f5   :  { %v1102_v7 = vsel %vm114_vm1, %v1100_v25, 0.0 }
 0x8f6   :  { %1103 = vadd.xlane.f32.xlu0 %v1102_v7 }
 0x90a   :  { %3132 = vrot.lane.b32.xlu0 %v3131_v12, %s3491_s25 }
 0x90b   :  { %v1140_v63 = vpop.permute.xlu1 %1139 }
 0x90c   :  { %v1142_v40 = vsel %vm114_vm1, %v1140_v63, 0.0 }
 0x90d   :  { %v1120_v9 = vpop.permute.xlu0 %1119  ;;  %1143 = vadd.xlane.f32.xlu2 %v1142_v40 }
 0x90e   :  { %v1122_v29 = vsel %vm114_vm1, %v1120_v9, 0.0 }
 0x90f   :  { %1123 = vadd.xlane.f32.xlu1 %v1122_v29 }
 0x912   :  { %3147 = vrot.lane.b32.xlu0 %v4057_v11, %s3490_s20  ;;  %v4195_v11 = vadd.f32 %v3447_v1, %v834_v20 }
 0x91a   :  { %1202 = vrot.lane.b32.xlu0 %v4089_v58, %s3490_s20  ;;  %v849_v58 = vsel %vm150_vm12, %v4195_v11, 0.0 }
 0x925   :  { %3137 = vrot.lane.b32.xlu2 %v3136_v24, %s3491_s25 }
 0x928   :  { %3142 = vrot.lane.b32.xlu1 %v4047_v28, %s3490_s20  ;;  %v846_v28 = vsel %vm150_vm12, %v842_v55, 0.0 }
 0x936   :  { %v1083_v43 = vpop.xlane.xlu2 %1082 }
 0x944   :  { %850 = vadd.xlane.f32.xlu0 %v849_v58 }
 0x94e   :  { %847 = vadd.xlane.f32.xlu2 %v846_v28 }
 0x952   :  { %853 = vadd.xlane.f32.xlu1 %v852_v30 }
 0x969   :  { %v1104_v33 = vpop.xlane.xlu0 %1103 }
 0x96a   :  { %3315 = vrcp.f32 %v1104_v33 }
 0x96b   :  { %3317 = vrcp.f32 %v1083_v43 }
 0x970   :  { %v3316_v44 = vpop.eup %3315 }
 0x971   :  { %v3318_v2 = vpop.eup %3317  ;;  %v1106_v12 = vmul.f32 %v3316_v44, %v4163_v50 }
 0x972   :  { %v1085_v9 = vmul.f32 %v3318_v2, %v3314_v8 }
 0x974   :  { %v1147_v20 = vsel %vm114_vm1, %v1085_v9, %v1106_v12  ;;  %v1262_v12 = vld [vmem:[%s5110_s5 + $0x10] sm:$0xff]  ;;  %v1260_v9 = vld [vmem:[%s5110_s5] sm:$0xff] }
 0x97c   :  { %v3133_v3 = vpop.permute.xlu0 %3132 }
 0x97d   :  { %v3134_v25 = vunpack.i.l.bf16 %v3133_v3  ;;  %v3135_v7 = vunpack.i.h.bf16 %v3133_v3 }
 0x97f   :  { %1182 = vmatpush.msrb.mxu0 %v3134_v25 }
 0x980   :  { %v1144_v15 = vpop.xlane.xlu2 %1143 }
 0x981   :  { %3319 = vrcp.f32 %v1144_v15  ;;  %1183 = vmatpush.msrb.mxu0 %v3135_v7 }
 0x982   :  { %v1124_v39 = vpop.xlane.xlu1 %1123 }
 0x983   :  { %3321 = vrcp.f32 %v1124_v39 }
 0x984   :  { %v3148_v10 = vpop.permute.xlu0 %3147 }
 0x985   :  { %v3150_v34 = vunpack.i.h.bf16 %v3148_v10 }
 0x987   :  { %v3320_v46 = vpop.eup %3319 }
 0x988   :  { %v3138_v63 = vpop.permute.xlu2 %3137  ;;  %v1146_v29 = vmul.f32 %v3320_v46, %v4161_v56  ;;  %v3149_v56 = vunpack.i.l.bf16 %v3148_v10 }
 0x989   :  { %v3322_v40 = vpop.eup %3321  ;;  %v3139_v27 = vunpack.i.l.bf16 %v3138_v63  ;;  %v3140_v24 = vunpack.i.h.bf16 %v3138_v63  ;;  %v1261_v63 = vld [vmem:[%s5110_s5 + $0x8] sm:$0xff] }
 0x98a   :  { %v1126_v16 = vmul.f32 %v3322_v40, %v4167_v57 }
 0x98b   :  { %1184 = vmatpush.msrb.mxu0 %v3139_v27 }
 0x98c   :  { %v1148_v1 = vsel %vm5117_vm0, %v1147_v20, %v1126_v16  ;;  %v1203_v44 = vpop.permute.xlu0 %1202 }
 0x98d   :  { %1185 = vmatpush.msrb.mxu0 %v3140_v24  ;;  %v1150_v58 = vsel %vm5116_vm11, %v1148_v1, %v1146_v29 }
 0x98e   :  { %2949 = vmatmul.msk.f32.vlgmr.msrb.gmra.mxu0 %vm150_vm12, %v1150_v58 }
 0x99a   :  { %v3143_v50 = vpop.permute.xlu1 %3142 }
 0x99b   :  { %v3145_v31 = vunpack.i.h.bf16 %v3143_v50  ;;  %v3144_v8 = vunpack.i.l.bf16 %v3143_v50 }
 0x99d   :  { %1220 = vmatpush.msra.mxu0 %v3144_v8 }
 0x99f   :  { %1221 = vmatpush.msra.mxu0 %v3145_v31 }
 0x9a1   :  { %1222 = vmatpush.msra.mxu0 %v3149_v56 }
 0x9a3   :  { %1223 = vmatpush.msra.mxu0 %v3150_v34 }
 0x9b7   :  { %v851_v2 = vpop.xlane.xlu0 %850 }
 0x9c1   :  { %v848_v57 = vpop.xlane.xlu2 %847 }
 0x9c2   :  { %v865_v28 = vmul.f32 %v4123_v19, %v848_v57 }
 0x9c4   :  { %v869_v32 = vsub.f32 %v842_v55, %v865_v28  ;;  %v1263_v55 = vld [vmem:[%s5110_s5 + $0x18] sm:$0xff] }
 0x9c5   :  { %v854_v30 = vpop.xlane.xlu1 %853  ;;  %1299 = vmatpush.msrb.mxu2 %v1263_v55 }
 0x9c6   :  { %v867_v33 = vmul.f32 %v4123_v19, %v854_v30  ;;  %v873_v43 = vmul.f32 %v869_v32, %v869_v32 }
 0x9c7   :  { %1300 = vmatpush.msrb.mxu2 %v1262_v12  ;;  %v1269_v12 = vld [vmem:[%s5111_s6 + $0x20] sm:$0xff] }
 0x9c8   :  { %v871_v3 = vsub.f32 %v844_v54, %v867_v33  ;;  %v877_v25 = vsel %vm150_vm12, %v873_v43, 0.0 }
 0x9c9   :  { %878 = vadd.xlane.f32.xlu0 %v877_v25  ;;  %1301 = vmatpush.msrb.mxu2 %v1261_v63  ;;  %v1268_v63 = vld [vmem:[%s5111_s6 + $0x18] sm:$0xff] }
 0x9ca   :  { %v875_v7 = vmul.f32 %v871_v3, %v871_v3 }
 0x9cb   :  { %1302 = vmatpush.msrb.mxu2 %v1260_v9  ;;  %v866_v9 = vmul.f32 %v4123_v19, %v851_v2 }
 0x9cc   :  { %v883_v15 = vsel %vm150_vm12, %v875_v7, 0.0 }
 0x9cd   :  { %884 = vadd.xlane.f32.xlu1 %v883_v15 }
 0xa0b   :  { %v1187_v39 = vpop.f32.mrf.mxu0 }
 0xa0c   :  { %2950 = vmatmul.msk.f32.vlgmr.msra.gmra.mxu0 %vm150_vm12, %v1187_v39 }
 0xa3c   :  { %v879_v46 = vpop.xlane.xlu0 %878 }
 0xa3d   :  { %v889_v54 = vmul.f32 %v879_v46, %v4123_v19 }
 0xa3f   :  { %v893_v40 = vadd.f32 1e-05, %v889_v54  ;;  %v1270_v54 = vld [vmem:[%s5111_s6 + $0x28] sm:$0xff] }
 0xa40   :  { %v885_v29 = vpop.xlane.xlu1 %884 }
 0xa41   :  { %3323 = vrsqrt.f32 %v893_v40  ;;  %v891_v27 = vmul.f32 %v885_v29, %v4123_v19  ;;  %vm903_vm5 = vweird.f32 %v893_v40 }
 0xa43   :  { %v895_v16 = vadd.f32 1e-05, %v891_v27 }
 0xa45   :  { %3325 = vrsqrt.f32 %v895_v16  ;;  %vm923_vm11 = vweird.f32 %v895_v16 }
 0xa47   :  { %v3324_v24 = vpop.eup %3323 }
 0xa48   :  { %v898_v20 = vmul.f32 %v3324_v24, %v893_v40  ;;  %vm904_vm4 = vweird.f32 %v3324_v24 }
 0xa49   :  { %vm905_vm6 = vmor %vm903_vm5, %vm904_vm4 }
 0xa4a   :  { %v899_v1 = vmul.f32 %v3324_v24, %v898_v20 }
 0xa4b   :  { %v3326_v58 = vpop.eup %3325 }
 0xa4c   :  { %v900_v50 = vmul.f32 0.5, %v899_v1  ;;  %v918_v31 = vmul.f32 %v3326_v58, %v895_v16  ;;  %vm924_vm7 = vweird.f32 %v3326_v58  ;;  %v870_v16 = vsub.f32 %v4195_v11, %v866_v9  ;;  %v4273_v11 = vld [vmem:[%s5110_s5 + $0x20] ss:$0 sm:$0xff] }
 0xa4d   :  { %vm925_vm0 = vmor %vm923_vm11, %vm924_vm7  ;;  %v3234_v9 = vld [vmem:[%s5111_s6 + $0x40] ss:$0 sm:$0xff] }
 0xa4e   :  { %v901_v8 = vsub.f32 1.5, %v900_v50  ;;  %v919_v10 = vmul.f32 %v3326_v58, %v918_v31  ;;  %v874_v20 = vmul.f32 %v870_v16, %v870_v16 }
 0xa50   :  { %v902_v56 = vmul.f32 %v3324_v24, %v901_v8  ;;  %v920_v34 = vmul.f32 0.5, %v919_v10  ;;  %v880_v1 = vsel %vm150_vm12, %v874_v20, 0.0 }
 0xa52   :  { %v906_v57 = vsel %vm905_vm6, %v3324_v24, %v902_v56  ;;  %v921_v28 = vsub.f32 1.5, %v920_v34 }
 0xa53   :  { %v937_v30 = vmul.f32 %v906_v57, %v869_v32  ;;  %v1272_v32 = vld [vmem:[%s5111_s6 + $0x38] sm:$0xff] }
 0xa54   :  { %v922_v33 = vmul.f32 %v3326_v58, %v921_v28  ;;  %1341 = vmatpush.msra.mxu1 %v1272_v32 }
 0xa55   :  { %v942_v43 = vmul.f32 %v4131_v14, %v937_v30 }
 0xa56   :  { %v926_v25 = vsel %vm925_vm0, %v3326_v58, %v922_v33  ;;  %v1267_v58 = vld [vmem:[%s5111_s6 + $0x10] sm:$0xff] }
 0xa57   :  { %v947_v7 = vadd.f32 %v4133_v41, %v942_v43  ;;  %v939_v15 = vmul.f32 %v926_v25, %v871_v3  ;;  %v1271_v3 = vld [vmem:[%s5111_s6 + $0x30] sm:$0xff] }
 0xa58   :  { %1342 = vmatpush.msra.mxu1 %v1271_v3 }
 0xa59   :  { %951 = vst.msk [vmem:[#allocation2] sm:$0xff] %vm150_vm12, %v947_v7  ;;  %v944_v39 = vmul.f32 %v4131_v14, %v939_v15 }
 0xa5a   :  { %1343 = vmatpush.msra.mxu1 %v1270_v54 }
 0xa5b   :  { %v949_v55 = vadd.f32 %v4133_v41, %v944_v39 }
 0xa5c   :  { %1344 = vmatpush.msra.mxu1 %v1269_v12 }
 0xa5d   :  { %953 = vst.msk [vmem:[#allocation2 + $0x10] sm:$0xff] %vm150_vm12, %v949_v55 }
 0xa5e   :  { %1345 = vmatpush.msra.mxu1 %v1268_v63 }
 0xa60   :  { %v4237_v46 = vld [vmem:[#allocation2] sm:$0xff]  ;;  %1346 = vmatpush.msra.mxu1 %v1267_v58 }
 0xa61   :  { %2951 = vmatmul.msk.f32.vlgmr.msrb.gmra.mxu2 %vm150_vm12, %v4237_v46 }
 0xa89   :  { %v1225_v40 = vpop.f32.mrf.mxu0 }
 0xa8a   :  { %v1226_v29 = vadd.f32 %v1225_v40, %v1203_v44  ;;  %v1266_v44 = vld [vmem:[%s5111_s6 + $0x8] sm:$0xff]  ;;  %v1258_v40 = vld [vmem:[#allocation2 + $0x10] sm:$0xff] }
 0xa8b   :  { %1347 = vmatpush.msra.mxu1 %v1266_v44 }
 0xa8c   :  { %v1228_v27 = vadd.f32 %v1226_v29, %v4137_v60  ;;  %v1265_v60 = vld [vmem:[%s5111_s6] sm:$0xff] }
 0xa8d   :  { %1348 = vmatpush.msra.mxu1 %v1265_v60 }
 0xa8e   :  { %v1229_v24 = vsel %vm150_vm12, %v1228_v27, 0.0 }
 0xa8f   :  { %1230 = vadd.xlane.f32.xlu2 %v1229_v24 }
 0xa97   :  { %881 = vadd.xlane.f32.xlu2 %v880_v1 }
 0xae4   :  { %v1304_v2 = vpop.f32.mrf.mxu2 }
 0xae5   :  { %v1305_v50 = vadd.f32 %v4273_v11, %v1304_v2  ;;  %v4294_v2 = vld [vmem:[%s5107_s2 + $0x8] sm:$0xff] }
 0xae7   :  { %v1316_v31 = vmax.f32 %v1305_v50, 0.0 }
 0xae9   :  { %2955 = vmatmul.msk.f32.vlgmr.msra.gmra.mxu1 %vm678_vm2, %v1316_v31  ;;  %v1251_v31 = vperm.slane %v4294_v2, 0 }
 0xb02   :  { %v1231_v8 = vpop.xlane.xlu2 %1230 }
 0xb03   :  { %v1232_v10 = vmul.f32 %v1231_v8, %v4123_v19 }
 0xb05   :  { %v1233_v56 = vsub.f32 %v1228_v27, %v1232_v10  ;;  %v1253_v10 = vperm.slane %v4294_v2, 1 }
 0xb07   :  { %v1234_v34 = vmul.f32 %v1233_v56, %v1233_v56 }
 0xb09   :  { %v1235_v57 = vsel %vm150_vm12, %v1234_v34, 0.0 }
 0xb0a   :  { %1236 = vadd.xlane.f32.xlu0 %v1235_v57  ;;  %v882_v28 = vpop.xlane.xlu2 %881 }
 0xb0b   :  { %v890_v30 = vmul.f32 %v882_v28, %v4123_v19 }
 0xb0d   :  { %v894_v33 = vadd.f32 1e-05, %v890_v30 }
 0xb0f   :  { %3327 = vrsqrt.f32 %v894_v33  ;;  %vm913_vm11 = vweird.f32 %v894_v33 }
 0xb15   :  { %v3328_v43 = vpop.eup %3327 }
 0xb16   :  { %v908_v25 = vmul.f32 %v3328_v43, %v894_v33  ;;  %vm914_vm0 = vweird.f32 %v3328_v43 }
 0xb17   :  { %vm915_vm4 = vmor %vm913_vm11, %vm914_vm0 }
 0xb18   :  { %v909_v7 = vmul.f32 %v3328_v43, %v908_v25 }
 0xb1a   :  { %v910_v15 = vmul.f32 0.5, %v909_v7 }
 0xb1c   :  { %v911_v39 = vsub.f32 1.5, %v910_v15 }
 0xb1e   :  { %v912_v55 = vmul.f32 %v3328_v43, %v911_v39 }
 0xb20   :  { %v916_v32 = vsel %vm915_vm4, %v3328_v43, %v912_v55 }
 0xb21   :  { %v938_v3 = vmul.f32 %v916_v32, %v870_v16 }
 0xb23   :  { %v943_v54 = vmul.f32 %v4131_v14, %v938_v3 }
 0xb25   :  { %v948_v12 = vadd.f32 %v4133_v41, %v943_v54 }
 0xb27   :  { %952 = vst.msk [vmem:[#allocation2 + $0x8] sm:$0xff] %vm150_vm12, %v948_v12 }
 0xb2e   :  { %v1257_v63 = vld [vmem:[#allocation2 + $0x8] sm:$0xff] }
 0xb2f   :  { %2952 = vmatmul.msk.f32.gmra.mxu2 %vm150_vm12, %v1257_v63 }
 0xb37   :  { %2953 = vmatmul.msk.f32.gmra.mxu2 %vm150_vm12, %v1258_v40 }
 0xb66   :  { %v1350_v29 = vpop.f32.mrf.mxu1 }
 0xb67   :  { %v1351_v27 = vadd.f32 %v3234_v9, %v1350_v29 }
 0xb69   :  { %v1362_v16 = vadd.f32 %v1351_v27, %v4237_v46 }
 0xb6b   :  { %v1366_v14 = vsel %vm150_vm12, %v1362_v16, 0.0 }
 0xb6c   :  { %1367 = vadd.xlane.f32.xlu2 %v1366_v14 }
 0xb7d   :  { %v1237_v41 = vpop.xlane.xlu0 %1236 }
 0xb7e   :  { %v1238_v24 = vmul.f32 %v1237_v41, %v4123_v19 }
 0xb80   :  { %v1239_v20 = vadd.f32 1e-05, %v1238_v24 }
 0xb82   :  { %3329 = vrsqrt.f32 %v1239_v20  ;;  %vm1246_vm6 = vweird.f32 %v1239_v20 }
 0xb88   :  { %v3330_v1 = vpop.eup %3329 }
 0xb89   :  { %v1241_v58 = vmul.f32 %v3330_v1, %v1239_v20  ;;  %vm1247_vm5 = vweird.f32 %v3330_v1 }
 0xb8a   :  { %vm1248_vm7 = vmor %vm1246_vm6, %vm1247_vm5 }
 0xb8b   :  { %v1242_v44 = vmul.f32 %v3330_v1, %v1241_v58 }
 0xb8d   :  { %v1243_v60 = vmul.f32 0.5, %v1242_v44 }
 0xb8f   :  { %v1244_v50 = vsub.f32 1.5, %v1243_v60 }
 0xb91   :  { %v1245_v46 = vmul.f32 %v3330_v1, %v1244_v50 }
 0xb93   :  { %v1249_v8 = vsel %vm1248_vm7, %v3330_v1, %v1245_v46 }
 0xb94   :  { %v1250_v34 = vmul.f32 %v1249_v8, %v1233_v56 }
 0xb96   :  { %v1252_v57 = vmul.f32 %v1251_v31, %v1250_v34 }
 0xb98   :  { %v1254_v28 = vadd.f32 %v1253_v10, %v1252_v57  ;;  %v4319_v10 = vld [vmem:[%s5109_s4 + $0x68] sm:$0xff]  ;;  %v4332_v57 = vld [vmem:[%s5109_s4 + $0x58] sm:$0xff] }
 0xb99   :  { %1503 = vmatpush.msrb.mxu0 %v4319_v10 }
 0xb9a   :  { %1255 = vst.msk [vmem:[#allocation2 + $0x18] sm:$0xff] %vm150_vm12, %v1254_v28  ;;  %v4337_v28 = vld [vmem:[%s5109_s4 + $0x50] sm:$0xff] }
 0xba1   :  { %v1259_v30 = vld [vmem:[#allocation2 + $0x18] sm:$0xff] }
 0xba2   :  { %2954 = vmatmul.msk.f32.gmra.mxu2 %vm150_vm12, %v1259_v30 }
 0xbb2   :  { %v1307_v33 = vpop.f32.mrf.mxu2 }
 0xbb3   :  { %v1308_v43 = vadd.f32 %v4273_v11, %v1307_v33  ;;  %v3196_v33 = vpack.i.bf16 %v4337_v28, %v4332_v57 }
 0xbb5   :  { %v1317_v25 = vmax.f32 %v1308_v43, 0.0 }
 0xbb7   :  { %2956 = vmatmul.msk.f32.gmra.mxu1 %vm678_vm2, %v1317_v25 }
 0xbba   :  { %v1310_v7 = vpop.f32.mrf.mxu2 }
 0xbbb   :  { %v1311_v15 = vadd.f32 %v4273_v11, %v1310_v7 }
 0xbbd   :  { %v1318_v39 = vmax.f32 %v1311_v15, 0.0 }
 0xbbf   :  { %2957 = vmatmul.msk.f32.gmra.mxu1 %vm678_vm2, %v1318_v39 }
 0xbdf   :  { %v1368_v3 = vpop.xlane.xlu2 %1367 }
 0xbe0   :  { %v1378_v12 = vmul.f32 %v1368_v3, %v4123_v19 }
 0xbe2   :  { %v1382_v14 = vsub.f32 %v1362_v16, %v1378_v12 }
 0xbe4   :  { %v1386_v1 = vmul.f32 %v1382_v14, %v1382_v14 }
 0xc25   :  { %v1313_v56 = vpop.f32.mrf.mxu2 }
 0xc26   :  { %v1314_v55 = vadd.f32 %v4273_v11, %v1313_v56  ;;  %v1390_v11 = vsel %vm150_vm12, %v1386_v1, 0.0  ;;  %v4356_v1 = vperm.slane %v4294_v2, 3 }
 0xc28   :  { %v1319_v32 = vmax.f32 %v1314_v55, 0.0 }
 0xc2a   :  { %2958 = vmatmul.msk.f32.gmra.mxu1 %vm678_vm2, %v1319_v32 }
 0xc34   :  { %v1353_v54 = vpop.f32.mrf.mxu1 }
 0xc35   :  { %v1354_v29 = vadd.f32 %v3234_v9, %v1353_v54 }
 0xc37   :  { %v1363_v27 = vadd.f32 %v1354_v29, %v1257_v63 }
 0xc39   :  { %v1369_v41 = vsel %vm150_vm12, %v1363_v27, 0.0 }
 0xc3a   :  { %1370 = vadd.xlane.f32.xlu1 %v1369_v41 }
 0xc3c   :  { %v1356_v24 = vpop.f32.mrf.mxu1 }
 0xc3d   :  { %v1357_v20 = vadd.f32 %v3234_v9, %v1356_v24  ;;  %v4353_v24 = vperm.slane %v4294_v2, 2 }
 0xc3f   :  { %v1364_v58 = vadd.f32 %v1357_v20, %v1258_v40 }
 0xc41   :  { %v1372_v44 = vsel %vm150_vm12, %v1364_v58, 0.0 }
 0xc42   :  { %1373 = vadd.xlane.f32.xlu0 %v1372_v44  ;;  %1391 = vadd.xlane.f32.xlu1 %v1390_v11 }
 0xca7   :  { %v1359_v60 = vpop.f32.mrf.mxu1 }
 0xca8   :  { %v1360_v50 = vadd.f32 %v3234_v9, %v1359_v60  ;;  %v4324_v9 = vld [vmem:[%s5109_s4 + $0x60] sm:$0xff] }
 0xca9   :  { %v3191_v34 = vpack.i.bf16 %v4324_v9, %v4319_v10  ;;  %1504 = vmatpush.msrb.mxu0 %v4324_v9  ;;  %v4701_v10 = vld [vmem:[%s5109_s4 + $0x90] sm:$0xff] }
 0xcaa   :  { %v1365_v46 = vadd.f32 %v1360_v50, %v1259_v30 }
 0xcab   :  { %1505 = vmatpush.msrb.mxu0 %v4332_v57 }
 0xcac   :  { %v1375_v31 = vsel %vm150_vm12, %v1365_v46, 0.0 }
 0xcad   :  { %1376 = vadd.xlane.f32.xlu2 %v1375_v31  ;;  %v1371_v63 = vpop.xlane.xlu1 %1370  ;;  %1506 = vmatpush.msrb.mxu0 %v4337_v28 }
 0xcae   :  { %v1379_v16 = vmul.f32 %v1371_v63, %v4123_v19 }
 0xcb0   :  { %v4312_v8 = vsub.f32 %v1363_v27, %v1379_v16 }
 0xcb2   :  { %v1387_v40 = vmul.f32 %v4312_v8, %v4312_v8 }
 0xcb4   :  { %v1393_v30 = vsel %vm150_vm12, %v1387_v40, 0.0 }
 0xcb5   :  { %v1374_v43 = vpop.xlane.xlu0 %1373  ;;  %1394 = vadd.xlane.f32.xlu0 %v1393_v30  ;;  %v1392_v25 = vpop.xlane.xlu1 %1391 }
 0xcb6   :  { %v1380_v7 = vmul.f32 %v1374_v43, %v4123_v19  ;;  %v1402_v15 = vmul.f32 %v1392_v25, %v4123_v19 }
 0xcb8   :  { %v4346_v39 = vsub.f32 %v1364_v58, %v1380_v7  ;;  %v1406_v56 = vadd.f32 1e-05, %v1402_v15 }
 0xcba   :  { %3331 = vrsqrt.f32 %v1406_v56  ;;  %v1388_v55 = vmul.f32 %v4346_v39, %v4346_v39  ;;  %vm1416_vm11 = vweird.f32 %v1406_v56 }
 0xcbc   :  { %v1396_v32 = vsel %vm150_vm12, %v1388_v55, 0.0 }
 0xcbd   :  { %1397 = vadd.xlane.f32.xlu2 %v1396_v32 }
 0xcc0   :  { %v3332_v3 = vpop.eup %3331 }
 0xcc1   :  { %v1411_v54 = vmul.f32 %v3332_v3, %v1406_v56  ;;  %vm1417_vm0 = vweird.f32 %v3332_v3 }
 0xcc2   :  { %vm1418_vm4 = vmor %vm1416_vm11, %vm1417_vm0 }
 0xcc3   :  { %v1412_v12 = vmul.f32 %v3332_v3, %v1411_v54 }
 0xcc5   :  { %v1413_v29 = vmul.f32 0.5, %v1412_v12 }
 0xcc7   :  { %v1414_v27 = vsub.f32 1.5, %v1413_v29 }
 0xcc9   :  { %v1415_v41 = vmul.f32 %v3332_v3, %v1414_v27 }
 0xccb   :  { %v1419_v20 = vsel %vm1418_vm4, %v3332_v3, %v1415_v41 }
 0xccc   :  { %v1450_v58 = vmul.f32 %v1419_v20, %v1382_v14 }
 0xcce   :  { %v1455_v44 = vmul.f32 %v4353_v24, %v1450_v58 }
 0xcd0   :  { %v1460_v11 = vadd.f32 %v4356_v1, %v1455_v44 }
 0xcd2   :  { %1464 = vst.msk [vmem:[#allocation2] sm:$0xff] %vm150_vm12, %v1460_v11 }
 0xcd9   :  { %v1468_v60 = vld [vmem:[#allocation2] sm:$0xff] }
 0xcda   :  { %2964 = vmatmul.msk.f32.vlgmr.msrb.gmra.mxu0 %vm150_vm12, %v1468_v60 }
 0xd20   :  { %v1377_v50 = vpop.xlane.xlu2 %1376 }
 0xd21   :  { %v1381_v31 = vmul.f32 %v1377_v50, %v4123_v19 }
 0xd23   :  { %v1385_v63 = vsub.f32 %v1365_v46, %v1381_v31 }
 0xd25   :  { %v1389_v16 = vmul.f32 %v1385_v63, %v1385_v63 }
 0xd27   :  { %v1399_v40 = vsel %vm150_vm12, %v1389_v16, 0.0 }
 0xd28   :  { %v1395_v30 = vpop.xlane.xlu0 %1394  ;;  %1400 = vadd.xlane.f32.xlu1 %v1399_v40 }
 0xd29   :  { %v1403_v2 = vmul.f32 %v1395_v30, %v4123_v19 }
 0xd2b   :  { %v1407_v14 = vadd.f32 1e-05, %v1403_v2 }
 0xd2d   :  { %3333 = vrsqrt.f32 %v1407_v14  ;;  %vm1426_vm6 = vweird.f32 %v1407_v14 }
 0xd30   :  { %v1398_v43 = vpop.xlane.xlu2 %1397 }
 0xd31   :  { %v1404_v25 = vmul.f32 %v1398_v43, %v4123_v19 }
 0xd33   :  { %v3334_v7 = vpop.eup %3333  ;;  %v1408_v15 = vadd.f32 1e-05, %v1404_v25 }
 0xd34   :  { %v1421_v56 = vmul.f32 %v3334_v7, %v1407_v14  ;;  %vm1427_vm5 = vweird.f32 %v3334_v7 }
 0xd35   :  { %3335 = vrsqrt.f32 %v1408_v15  ;;  %vm1428_vm7 = vmor %vm1426_vm6, %vm1427_vm5  ;;  %vm1436_vm11 = vweird.f32 %v1408_v15 }
 0xd36   :  { %v1422_v55 = vmul.f32 %v3334_v7, %v1421_v56 }
 0xd38   :  { %v1423_v32 = vmul.f32 0.5, %v1422_v55 }
 0xd3a   :  { %v1424_v3 = vsub.f32 1.5, %v1423_v32 }
 0xd3b   :  { %v3336_v46 = vpop.eup %3335 }
 0xd3c   :  { %v1425_v54 = vmul.f32 %v3334_v7, %v1424_v3  ;;  %v1431_v12 = vmul.f32 %v3336_v46, %v1408_v15  ;;  %vm1437_vm0 = vweird.f32 %v3336_v46 }
 0xd3d   :  { %vm1438_vm4 = vmor %vm1436_vm11, %vm1437_vm0 }
 0xd3e   :  { %v1429_v29 = vsel %vm1428_vm7, %v3334_v7, %v1425_v54  ;;  %v1432_v27 = vmul.f32 %v3336_v46, %v1431_v12 }
 0xd3f   :  { %v1451_v41 = vmul.f32 %v1429_v29, %v4312_v8 }
 0xd40   :  { %v1433_v20 = vmul.f32 0.5, %v1432_v27  ;;  %v4387_v27 = vld [vmem:[%s5109_s4 + $0x70] ss:$0 sm:$0xff] }
 0xd41   :  { %v1456_v58 = vmul.f32 %v4353_v24, %v1451_v41 }
 0xd42   :  { %v1434_v44 = vsub.f32 1.5, %v1433_v20 }
 0xd43   :  { %v1461_v11 = vadd.f32 %v4356_v1, %v1456_v58 }
 0xd44   :  { %v1435_v60 = vmul.f32 %v3336_v46, %v1434_v44 }
 0xd45   :  { %1465 = vst.msk [vmem:[#allocation2 + $0x8] sm:$0xff] %vm150_vm12, %v1461_v11 }
 0xd46   :  { %v1439_v50 = vsel %vm1438_vm4, %v3336_v46, %v1435_v60 }
 0xd47   :  { %v1452_v31 = vmul.f32 %v1439_v50, %v4346_v39 }
 0xd49   :  { %v1457_v16 = vmul.f32 %v4353_v24, %v1452_v31 }
 0xd4b   :  { %v1462_v40 = vadd.f32 %v4356_v1, %v1457_v16 }
 0xd4c   :  { %v1469_v8 = vld [vmem:[#allocation2 + $0x8] sm:$0xff] }
 0xd4d   :  { %1466 = vst.msk [vmem:[#allocation2 + $0x10] sm:$0xff] %vm150_vm12, %v1462_v40  ;;  %2965 = vmatmul.msk.f32.gmra.mxu0 %vm150_vm12, %v1469_v8 }
 0xd54   :  { %v1470_v30 = vld [vmem:[#allocation2 + $0x10] sm:$0xff] }
 0xd55   :  { %2966 = vmatmul.msk.f32.gmra.mxu0 %vm150_vm12, %v1470_v30 }
 0xd57   :  { %v1508_v29 = vpop.f32.mrf.mxu0 }
 0xd58   :  { %v4408_v60 = vadd.f32 %v4387_v27, %v1508_v29 }
 0xd5a   :  { %v1520_v50 = vmul.f32 %v3679_v4, %v4408_v60  ;;  %v1548_v16 = vmul.f32 %v3780_v52, %v4408_v60 }
 0xd9b   :  { %v1401_v2 = vpop.xlane.xlu1 %1400 }
 0xd9c   :  { %v1405_v14 = vmul.f32 %v1401_v2, %v4123_v19 }
 0xd9e   :  { %v1409_v43 = vadd.f32 1e-05, %v1405_v14 }
 0xda0   :  { %3337 = vrsqrt.f32 %v1409_v43  ;;  %vm1446_vm6 = vweird.f32 %v1409_v43 }
 0xda6   :  { %v3338_v25 = vpop.eup %3337 }
 0xda7   :  { %v1441_v7 = vmul.f32 %v3338_v25, %v1409_v43  ;;  %vm1447_vm5 = vweird.f32 %v3338_v25 }
 0xda8   :  { %vm1448_vm7 = vmor %vm1446_vm6, %vm1447_vm5 }
 0xda9   :  { %v1442_v39 = vmul.f32 %v3338_v25, %v1441_v7  ;;  %v1544_v7 = vmul.f32 %v3790_v61, %v4408_v60 }
 0xdab   :  { %v1443_v15 = vmul.f32 0.5, %v1442_v39  ;;  %v1532_v39 = vmul.f32 %v3634_v49, %v4408_v60 }
 0xdad   :  { %v1444_v56 = vsub.f32 1.5, %v1443_v15  ;;  %v1528_v15 = vmul.f32 %v3642_v53, %v4408_v60 }
 0xdaf   :  { %v1445_v55 = vmul.f32 %v3338_v25, %v1444_v56 }
 0xdb1   :  { %v1449_v32 = vsel %vm1448_vm7, %v3338_v25, %v1445_v55 }
 0xdb2   :  { %v1453_v3 = vmul.f32 %v1449_v32, %v1385_v63 }
 0xdb4   :  { %v1458_v46 = vmul.f32 %v4353_v24, %v1453_v3 }
 0xdb6   :  { %v1463_v54 = vadd.f32 %v4356_v1, %v1458_v46 }
 0xdb8   :  { %1467 = vst.msk [vmem:[#allocation2 + $0x18] sm:$0xff] %vm150_vm12, %v1463_v54 }
 0xdbf   :  { %v4380_v12 = vld [vmem:[#allocation2 + $0x18] sm:$0xff] }
 0xdc0   :  { %2967 = vmatmul.msk.f32.gmra.mxu0 %vm150_vm12, %v4380_v12 }
 0xdca   :  { %v1511_v41 = vpop.f32.mrf.mxu0 }
 0xdcb   :  { %v4390_v63 = vadd.f32 %v4387_v27, %v1511_v41 }
 0xdcd   :  { %v1533_v24 = vmul.f32 %v3634_v49, %v4390_v63  ;;  %v1529_v58 = vmul.f32 %v3642_v53, %v4390_v63  ;;  %v1549_v31 = vmul.f32 %v3780_v52, %v4390_v63  ;;  %v1545_v25 = vmul.f32 %v3790_v61, %v4390_v63 }
 0xdce   :  { %v1525_v3 = vmul.f32 %v3653_v59, %v4390_v63 }
 0xdcf   :  { %1594 = vrot.lane.b32.xlu1 %v1533_v24, %s3491_s25  ;;  %v3151_v40 = vpack.i.bf16 %v1548_v16, %v1549_v31  ;;  %v3156_v56 = vpack.i.bf16 %v1544_v7, %v1545_v25  ;;  %v1521_v24 = vmul.f32 %v3679_v4, %v4390_v63 }
 0xdd2   :  { %v1514_v1 = vpop.f32.mrf.mxu0 }
 0xdd3   :  { %v4396_v20 = vadd.f32 %v4387_v27, %v1514_v1 }
 0xdd5   :  { %v1534_v44 = vmul.f32 %v3634_v49, %v4396_v20  ;;  %v1526_v11 = vmul.f32 %v3653_v59, %v4396_v20  ;;  %v1550_v32 = vmul.f32 %v3780_v52, %v4396_v20  ;;  %v1530_v46 = vmul.f32 %v3642_v53, %v4396_v20 }
 0xdd6   :  { %v1522_v41 = vmul.f32 %v3679_v4, %v4396_v20 }
 0xdd7   :  { %1586 = vrot.lane.b32.xlu1 %v1529_v58, %s3491_s25  ;;  %1596 = vrot.lane.b32.xlu2 %v1534_v44, %s3491_s25  ;;  %v1546_v58 = vmul.f32 %v3790_v61, %v4396_v20 }
 0xddf   :  { %1580 = vrot.lane.b32.xlu1 %v1526_v11, %s3491_s25 }
 0xde7   :  { %1568 = vrot.lane.b32.xlu1 %v1520_v50, %s3491_s25  ;;  %v1542_v50 = vmul.f32 %v3885_v62, %v4396_v20 }
 0xdef   :  { %3152 = vrot.lane.b32.xlu1 %v3151_v40, %s3486_s9 }
 0xe3d   :  { %v1517_v8 = vpop.f32.mrf.mxu0 }
 0xe3e   :  { %v4419_v30 = vadd.f32 %v4387_v27, %v1517_v8 }
 0xe40   :  { %v1535_v2 = vmul.f32 %v3634_v49, %v4419_v30  ;;  %v1531_v14 = vmul.f32 %v3642_v53, %v4419_v30  ;;  %v1523_v43 = vmul.f32 %v3679_v4, %v4419_v30  ;;  %v1551_v55 = vmul.f32 %v3780_v52, %v4419_v30 }
 0xe41   :  { %v1527_v29 = vmul.f32 %v3653_v59, %v4419_v30  ;;  %v1524_v52 = vmul.f32 %v3653_v59, %v4408_v60  ;;  %v1547_v1 = vmul.f32 %v3790_v61, %v4419_v30  ;;  %v1543_v11 = vmul.f32 %v3885_v62, %v4419_v30  ;;  %v1595_v16 = vpop.permute.xlu1 %1594  ;;  %v1597_v61 = vpop.permute.xlu2 %1596 }
 0xe42   :  { %1598 = vrot.lane.b32.xlu0 %v1535_v2, %s3491_s25  ;;  %1590 = vrot.lane.b32.xlu2 %v1531_v14, %s3491_s25  ;;  %v3161_v54 = vpack.i.bf16 %v1550_v32, %v1551_v55 }
 0xe43   :  { %1574 = vrot.lane.b32.xlu1 %v1523_v43, %s3491_s25  ;;  %v3166_v44 = vpack.i.bf16 %v1546_v58, %v1547_v1  ;;  %v3171_v31 = vpack.i.bf16 %v1542_v50, %v1543_v11 }
 0xe49   :  { %v1587_v40 = vpop.permute.xlu1 %1586 }
 0xe4a   :  { %1592 = vrot.lane.b32.xlu0 %v1532_v39, %s3491_s25  ;;  %1584 = vrot.lane.b32.xlu2 %v1528_v15, %s3491_s25 }
 0xe4b   :  { %3157 = vrot.lane.b32.xlu1 %v3156_v56, %s3486_s9 }
 0xe51   :  { %v1581_v8 = vpop.permute.xlu1 %1580 }
 0xe52   :  { %1578 = vrot.lane.b32.xlu2 %v1525_v3, %s3491_s25  ;;  %1588 = vrot.lane.b32.xlu0 %v1530_v46, %s3491_s25 }
 0xe53   :  { %3162 = vrot.lane.b32.xlu1 %v3161_v54, %s3486_s9 }
 0xe59   :  { %v1569_v2 = vpop.permute.xlu1 %1568 }
 0xe5a   :  { %1582 = vrot.lane.b32.xlu0 %v1527_v29, %s3491_s25  ;;  %1572 = vrot.lane.b32.xlu2 %v1522_v41, %s3491_s25 }
 0xe61   :  { %v3153_v14 = vpop.permute.xlu1 %3152 }
 0xe62   :  { %1576 = vrot.lane.b32.xlu0 %v1524_v52, %s3491_s25  ;;  %v3154_v46 = vunpack.i.l.bf16 %v3153_v14  ;;  %v3155_v29 = vunpack.i.h.bf16 %v3153_v14 }
 0xe6a   :  { %1570 = vrot.lane.b32.xlu0 %v1521_v24, %s3491_s25 }
 0xe72   :  { %3167 = vrot.lane.b32.xlu0 %v3166_v44, %s3486_s9 }
 0xe7a   :  { %3172 = vrot.lane.b32.xlu0 %v3171_v31, %s3486_s9 }
 0xe9c   :  { %v1591_v15 = vpop.permute.xlu2 %1590 }
 0xea4   :  { %v1585_v41 = vpop.permute.xlu2 %1584 }
 0xeac   :  { %v1579_v24 = vpop.permute.xlu2 %1578 }
 0xeb4   :  { %v1599_v43 = vpop.permute.xlu0 %1598  ;;  %v1573_v50 = vpop.permute.xlu2 %1572 }
 0xeb5   :  { %v1575_v25 = vpop.permute.xlu1 %1574  ;;  %2968 = vmatpush.xpose.msk.msra.mxu2 %vm150_vm12, %v1599_v43 }
 0xeb9   :  { %2969 = vmatpush.xpose.msk.msra.mxu2 %vm150_vm12, %v1597_v61 }
 0xebc   :  { %v1593_v7 = vpop.permute.xlu0 %1592 }
 0xebd   :  { %v3158_v39 = vpop.permute.xlu1 %3157  ;;  %2970 = vmatpush.xpose.msk.msra.mxu2 %vm150_vm12, %v1595_v16 }
 0xebe   :  { %v3159_v31 = vunpack.i.l.bf16 %v3158_v39  ;;  %v3160_v16 = vunpack.i.h.bf16 %v3158_v39 }
 0xec1   :  { %2971 = vmatpush.xpose.msk.msra.mxu2 %vm150_vm12, %v1593_v7 }
 0xec4   :  { %v1589_v56 = vpop.permute.xlu0 %1588 }
 0xec5   :  { %v3163_v55 = vpop.permute.xlu1 %3162  ;;  %2972 = vmatpush.xpose.msk.msra.mxu2 %vm150_vm12, %v1591_v15 }
 0xec6   :  { %v3164_v32 = vunpack.i.l.bf16 %v3163_v55  ;;  %v3165_v3 = vunpack.i.h.bf16 %v3163_v55 }
 0xec8   :  { %1993 = vmatpush.msrb.mxu3 %v3164_v32 }
 0xec9   :  { %2973 = vmatpush.xpose.msk.msra.mxu2 %vm150_vm12, %v1589_v56 }
 0xeca   :  { %1994 = vmatpush.msrb.mxu3 %v3165_v3 }
 0xecc   :  { %1995 = vmatpush.msrb.mxu3 %v3154_v46  ;;  %v1583_v54 = vpop.permute.xlu0 %1582 }
 0xecd   :  { %2974 = vmatpush.xpose.msk.msra.mxu2 %vm150_vm12, %v1587_v40 }
 0xece   :  { %1996 = vmatpush.msrb.mxu3 %v3155_v29 }
 0xed1   :  { %2975 = vmatpush.xpose.msk.msra.mxu2 %vm150_vm12, %v1585_v41 }
 0xed4   :  { %v1577_v52 = vpop.permute.xlu0 %1576 }
 0xed5   :  { %2976 = vmatpush.xpose.msk.msra.mxu2 %vm150_vm12, %v1583_v54 }
 0xed9   :  { %2977 = vmatpush.xpose.msk.msra.mxu2 %vm150_vm12, %v1581_v8 }
 0xedc   :  { %v1571_v1 = vpop.permute.xlu0 %1570 }
 0xedd   :  { %2978 = vmatpush.xpose.msk.msra.mxu2 %vm150_vm12, %v1579_v24 }
 0xee1   :  { %2979 = vmatpush.xpose.msk.msra.mxu2 %vm150_vm12, %v1577_v52 }
 0xee4   :  { %v3168_v58 = vpop.permute.xlu0 %3167 }
 0xee5   :  { %2980 = vmatpush.xpose.msk.msra.mxu2 %vm150_vm12, %v1575_v25  ;;  %v3169_v44 = vunpack.i.l.bf16 %v3168_v58  ;;  %v3170_v11 = vunpack.i.h.bf16 %v3168_v58 }
 0xee7   :  { %1997 = vmatpush.msrb.mxu3 %v3169_v44 }
 0xee9   :  { %2981 = vmatpush.xpose.msk.msra.mxu2 %vm150_vm12, %v1573_v50  ;;  %1998 = vmatpush.msrb.mxu3 %v3170_v11 }
 0xeeb   :  { %1999 = vmatpush.msrb.mxu3 %v3159_v31 }
 0xeec   :  { %v3173_v40 = vpop.permute.xlu0 %3172 }
 0xeed   :  { %2982 = vmatpush.xpose.msk.msra.mxu2 %vm150_vm12, %v1571_v1  ;;  %2000 = vmatpush.msrb.mxu3 %v3160_v16  ;;  %v3174_v8 = vunpack.i.l.bf16 %v3173_v40  ;;  %v3175_v14 = vunpack.i.h.bf16 %v3173_v40 }
 0xeef   :  { %2001 = vmatpush.msrb.mxu3 %v3174_v8 }
 0xef1   :  { %2983 = vmatpush.xpose.msk.msra.mxu2 %vm150_vm12, %v1569_v2  ;;  %2002 = vmatpush.msrb.mxu3 %v3175_v14 }
 0xef4   :  { %2984 = vmatmul.msk.f32.vlgmr.msra.gmra.mxu2 %vm150_vm12, %v4408_v60 }
 0xefc   :  { %2985 = vmatmul.msk.f32.gmra.mxu2 %vm150_vm12, %v4390_v63 }
 0xf04   :  { %2986 = vmatmul.msk.f32.gmra.mxu2 %vm150_vm12, %v4396_v20 }
 0xf0c   :  { %2987 = vmatmul.msk.f32.gmra.mxu2 %vm150_vm12, %v4419_v30 }
 0xf77   :  { %v1661_v43 = vpop.f32.mrf.mxu2 }
 0xf78   :  { %v1673_v25 = vmul.f32 0.35355338, %v1661_v43 }
 0xf7a   :  { %v4499_v61 = vadd.f32 %v1673_v25, %v3762_v42  ;;  %v4502_v2 = vadd.f32 %v1673_v25, %v3811_v26  ;;  %v4505_v7 = vadd.f32 %v1673_v25, %v3801_v5  ;;  %v3450_v26 = vld [vmem:[%s5108_s3] sm:$0xff] }
 0xf7b   :  { %v4516_v5 = vadd.f32 %v3450_v26, %v1673_v25 }
 0xf7c   :  { %v1857_v39 = vsel %vm613_vm15, %v4499_v61, -inf  ;;  %v1793_v15 = vsel %vm536_vm13, %v4502_v2, -inf  ;;  %v1729_v56 = vsel %vm459_vm14, %v4505_v7, -inf }
 0xf7d   :  { %1858 = vmax.xlane.f32.xlu1 %v1857_v39  ;;  %1794 = vmax.xlane.f32.xlu0 %v1793_v15  ;;  %v1681_v29 = vsel %vm150_vm12, %v4516_v5, -inf  ;;  %v5123_v15 = vld [vmem:[#allocation7_spill] sm:$0xff] }
 0xf7e   :  { %1730 = vmax.xlane.f32.xlu2 %v1729_v56 }
 0xf7f   :  { %v1664_v42 = vpop.f32.mrf.mxu2 }
 0xf80   :  { %v1674_v55 = vmul.f32 0.35355338, %v1664_v42  ;;  %v3453_v42 = vld [vmem:[%s5108_s3 + $0x18] sm:$0xff] }
 0xf82   :  { %v4519_v32 = vadd.f32 %v1674_v55, %v3766_v45  ;;  %v1790_v3 = vadd.f32 %v1674_v55, %v3834_v51  ;;  %v3451_v45 = vld [vmem:[%s5108_s3 + $0x8] sm:$0xff]  ;;  %v4533_v51 = vadd.f32 %v1674_v55, %v3803_v6 }
 0xf83   :  { %v4530_v24 = vadd.f32 %v3451_v45, %v1674_v55 }
 0xf84   :  { %v1860_v46 = vsel %vm613_vm15, %v4519_v32, -inf  ;;  %v1796_v54 = vsel %vm536_vm13, %v1790_v3, -inf  ;;  %v1732_v11 = vsel %vm459_vm14, %v4533_v51, -inf }
 0xf85   :  { %1861 = vmax.xlane.f32.xlu1 %v1860_v46  ;;  %1797 = vmax.xlane.f32.xlu0 %v1796_v54  ;;  %v1684_v58 = vsel %vm150_vm12, %v4530_v24, -inf }
 0xf86   :  { %1682 = vmax.xlane.f32.xlu2 %v1681_v29 }
 0xf87   :  { %v1667_v41 = vpop.f32.mrf.mxu2 }
 0xf88   :  { %v1675_v52 = vmul.f32 0.35355338, %v1667_v41 }
 0xf8a   :  { %v4536_v1 = vadd.f32 %v1675_v52, %v3772_v47  ;;  %v4545_v6 = vadd.f32 %v1675_v52, %v3855_v35  ;;  %v4548_v47 = vadd.f32 %v1675_v52, %v3805_v13  ;;  %v3452_v35 = vld [vmem:[%s5108_s3 + $0x10] sm:$0xff]  ;;  %v5122_v13 = vld [vmem:[#allocation6_spill] sm:$0xff] }
 0xf8b   :  { %v4559_v43 = vadd.f32 %v3452_v35, %v1675_v52 }
 0xf8c   :  { %v1863_v44 = vsel %vm613_vm15, %v4536_v1, -inf  ;;  %v1799_v40 = vsel %vm536_vm13, %v4545_v6, -inf  ;;  %v1735_v14 = vsel %vm459_vm14, %v4548_v47, -inf }
 0xf8d   :  { %1685 = vmax.xlane.f32.xlu0 %v1684_v58  ;;  %1864 = vmax.xlane.f32.xlu1 %v1863_v44 }
 0xf8e   :  { %1733 = vmax.xlane.f32.xlu2 %v1732_v11 }
 0xf8f   :  { %v1670_v50 = vpop.f32.mrf.mxu2 }
 0xf90   :  { %v1676_v31 = vmul.f32 0.35355338, %v1670_v50 }
 0xf92   :  { %v1856_v16 = vadd.f32 %v1676_v31, %v3776_v48  ;;  %v1728_v25 = vadd.f32 %v1676_v31, %v5122_v13  ;;  %v1687_v48 = vsel %vm150_vm12, %v4559_v43, -inf  ;;  %v4566_v56 = vadd.f32 %v1676_v31, %v5123_v15 }
 0xf93   :  { %v4571_v55 = vadd.f32 %v3453_v42, %v1676_v31 }
 0xf94   :  { %v1866_v8 = vsel %vm613_vm15, %v1856_v16, -inf  ;;  %v1738_v39 = vsel %vm459_vm14, %v1728_v25, -inf  ;;  %v1802_v26 = vsel %vm536_vm13, %v4566_v56, -inf }
 0xf95   :  { %1800 = vmax.xlane.f32.xlu0 %v1799_v40  ;;  %1867 = vmax.xlane.f32.xlu1 %v1866_v8  ;;  %v1690_v46 = vsel %vm150_vm12, %v4571_v55, -inf }
 0xf96   :  { %1736 = vmax.xlane.f32.xlu2 %v1735_v14 }
 0xf9d   :  { %1688 = vmax.xlane.f32.xlu0 %v1687_v48 }
 0xf9e   :  { %1739 = vmax.xlane.f32.xlu2 %v1738_v39 }
 0xfa5   :  { %1803 = vmax.xlane.f32.xlu0 %v1802_v26 }
 0xfa6   :  { %1691 = vmax.xlane.f32.xlu2 %v1690_v46 }
 0xff0   :  { %v1859_v54 = vpop.xlane.xlu1 %1858  ;;  %v1795_v29 = vpop.xlane.xlu0 %1794 }
 0xff1   :  { %v1869_v41 = vsub.f32 %v4499_v61, %v1859_v54  ;;  %v1805_v52 = vsub.f32 %v4502_v2, %v1795_v29  ;;  %v1731_v45 = vpop.xlane.xlu2 %1730 }
 0xff2   :  { %v1741_v58 = vsub.f32 %v4505_v7, %v1731_v45 }
 0xff3   :  { %v1873_v44 = vmul.f32 1.442695, %v1869_v41  ;;  %v1809_v11 = vmul.f32 1.442695, %v1805_v52 }
 0xff4   :  { %v1745_v50 = vmul.f32 1.442695, %v1741_v58 }
 0xff5   :  { %3339 = vpow2.f32 %v1873_v44 }
 0xff6   :  { %3341 = vpow2.f32 %v1809_v11 }
 0xff7   :  { %3343 = vpow2.f32 %v1745_v50 }
 0xff8   :  { %v1862_v31 = vpop.xlane.xlu1 %1861  ;;  %v1798_v40 = vpop.xlane.xlu0 %1797 }
 0xff9   :  { %v1683_v8 = vpop.xlane.xlu2 %1682  ;;  %v1806_v14 = vsub.f32 %v1790_v3, %v1798_v40 }
 0xffa   :  { %v1693_v52 = vsub.f32 %v4516_v5, %v1683_v8 }
 0xffb   :  { %v4580_v35 = vpop.eup %3339  ;;  %v1811_v13 = vmul.f32 1.442695, %v1806_v14  ;;  %v1870_v14 = vsub.f32 %v4519_v32, %v1862_v31 }
 0xffc   :  { %v4582_v48 = vpop.eup %3341  ;;  %1885 = vrot.lane.b32.xlu0 %v4580_v35, %s3490_s20  ;;  %v1697_v45 = vmul.f32 1.442695, %v1693_v52 }
 0xffd   :  { %v4586_v61 = vpop.eup %3343  ;;  %1821 = vrot.lane.b32.xlu2 %v4582_v48, %s3486_s9  ;;  %3345 = vpow2.f32 %v1811_v13 }
 0xffe   :  { %1757 = vrot.lane.b32.xlu1 %v4586_v61, %s3491_s25 }
0x1000   :  { %v1865_v2 = vpop.xlane.xlu1 %1864  ;;  %v1686_v8 = vpop.xlane.xlu0 %1685 }
0x1001   :  { %v1734_v7 = vpop.xlane.xlu2 %1733 }
0x1002   :  { %v1742_v50 = vsub.f32 %v4533_v51, %v1734_v7 }
0x1003   :  { %v4592_v3 = vpop.eup %3345 }
0x1004   :  { %v1747_v40 = vmul.f32 1.442695, %v1742_v50 }
0x1005   :  { %1823 = vrot.lane.b32.xlu2 %v4592_v3, %s3486_s9 }
0x1008   :  { %v1868_v39 = vpop.xlane.xlu1 %1867 }
0x1009   :  { %v1737_v15 = vpop.xlane.xlu2 %1736  ;;  %v1872_v42 = vsub.f32 %v1856_v16, %v1868_v39  ;;  %v1539_v16 = vmul.f32 %v3979_v38, %v4419_v30  ;;  %v1875_v30 = vmul.f32 1.442695, %v1870_v14  ;;  %v1801_v39 = vpop.xlane.xlu0 %1800  ;;  %v1541_v14 = vmul.f32 %v3885_v62, %v4390_v63 }
0x100a   :  { %v1807_v51 = vsub.f32 %v4545_v6, %v1801_v39 }
0x100b   :  { %v1879_v26 = vmul.f32 1.442695, %v1872_v42 }
0x100c   :  { %v1813_v31 = vmul.f32 1.442695, %v1807_v51 }
0x100d   :  { %3347 = vpow2.f32 %v1879_v26 }
0x1011   :  { %v1740_v46 = vpop.xlane.xlu2 %1739  ;;  %v1689_v32 = vpop.xlane.xlu0 %1688 }
0x1012   :  { %v1744_v54 = vsub.f32 %v1728_v25, %v1740_v46  ;;  %v1538_v25 = vmul.f32 %v3979_v38, %v4396_v20  ;;  %v1743_v20 = vsub.f32 %v4548_v47, %v1737_v15  ;;  %v1871_v47 = vsub.f32 %v4536_v1, %v1865_v2 }
0x1013   :  { %v4596_v41 = vpop.eup %3347  ;;  %v1537_v1 = vmul.f32 %v3979_v38, %v4390_v63  ;;  %v1695_v63 = vsub.f32 %v4559_v43, %v1689_v32 }
0x1014   :  { %v1751_v29 = vmul.f32 1.442695, %v1744_v54  ;;  %1891 = vrot.lane.b32.xlu2 %v4596_v41, %s3490_s20  ;;  %v3181_v44 = vpack.i.bf16 %v1538_v25, %v1539_v16  ;;  %v1749_v42 = vmul.f32 1.442695, %v1743_v20  ;;  %v1877_v15 = vmul.f32 1.442695, %v1871_v47 }
0x1015   :  { %v1540_v20 = vmul.f32 %v3885_v62, %v4408_v60 }
0x1016   :  { %3349 = vpow2.f32 %v1751_v29 }
0x1017   :  { %3351 = vpow2.f32 %v1697_v45  ;;  %v3176_v39 = vpack.i.bf16 %v1540_v20, %v1541_v14 }
0x1018   :  { %3353 = vpow2.f32 %v1747_v40  ;;  %v1694_v40 = vsub.f32 %v4530_v24, %v1686_v8 }
0x1019   :  { %3355 = vpow2.f32 %v1875_v30  ;;  %v1692_v7 = vpop.xlane.xlu2 %1691  ;;  %v1804_v54 = vpop.xlane.xlu0 %1803 }
0x101a   :  { %3357 = vpow2.f32 %v1749_v42  ;;  %v1808_v6 = vsub.f32 %v4566_v56, %v1804_v54  ;;  %v1699_v30 = vmul.f32 1.442695, %v1694_v40 }
0x101b   :  { %3359 = vpow2.f32 %v1813_v31 }
0x101c   :  { %v4601_v58 = vpop.eup %3349  ;;  %3361 = vpow2.f32 %v1877_v15  ;;  %v1815_v16 = vmul.f32 1.442695, %v1808_v6  ;;  %v1696_v15 = vsub.f32 %v4571_v55, %v1692_v7 }
0x101d   :  { %1763 = vrot.lane.b32.xlu0 %v4601_v58, %s3491_s25  ;;  %v4609_v11 = vpop.eup %3351 }
0x101e   :  { %v1705_v5 = vsel %vm150_vm12, %v4609_v11, 0.0  ;;  %v4616_v13 = vpop.eup %3353  ;;  %3363 = vpow2.f32 %v1815_v16  ;;  %v1703_v6 = vmul.f32 1.442695, %v1696_v15 }
0x101f   :  { %v4621_v26 = vpop.eup %3355  ;;  %3365 = vpow2.f32 %v1699_v30 }
0x1020   :  { %v4626_v46 = vpop.eup %3357 }
0x1021   :  { %v4631_v52 = vpop.eup %3359 }
0x1022   :  { %v4637_v25 = vpop.eup %3361 }
0x1024   :  { %v4643_v2 = vpop.eup %3363 }
0x1025   :  { %3182 = vrot.lane.b32.xlu0 %v3181_v44, %s3486_s9  ;;  %v1536_v44 = vmul.f32 %v3979_v38, %v4408_v60  ;;  %v4657_v38 = vpop.eup %3365  ;;  %v1701_v60 = vmul.f32 1.442695, %v1695_v63 }
0x1026   :  { %v1708_v42 = vsel %vm150_vm12, %v4657_v38, 0.0 }
0x1027   :  { %3367 = vpow2.f32 %v1701_v60 }
0x1028   :  { %1706 = vadd.xlane.f32.xlu1 %v1705_v5  ;;  %v3186_v5 = vpack.i.bf16 %v1536_v44, %v1537_v1  ;;  %3369 = vpow2.f32 %v1703_v6  ;;  %v4713_v6 = vld [vmem:[%s5109_s4 + $0x78] sm:$0xff] }
0x102d   :  { %v4669_v16 = vpop.eup %3367 }
0x102e   :  { %v1711_v1 = vsel %vm150_vm12, %v4669_v16, 0.0  ;;  %v4674_v55 = vpop.eup %3369 }
0x102f   :  { %v1714_v44 = vsel %vm150_vm12, %v4674_v55, 0.0 }
0x1041   :  { %1759 = vrot.lane.b32.xlu1 %v4616_v13, %s3491_s25 }
0x1049   :  { %1887 = vrot.lane.b32.xlu1 %v4621_v26, %s3490_s20 }
0x1051   :  { %1761 = vrot.lane.b32.xlu1 %v4626_v46, %s3491_s25 }
0x1057   :  { %v1822_v29 = vpop.permute.xlu2 %1821 }
0x1058   :  { %v1833_v45 = vsel %vm150_vm12, %v1822_v29, 0.0 }
0x1059   :  { %1825 = vrot.lane.b32.xlu1 %v4631_v52, %s3486_s9  ;;  %1834 = vadd.xlane.f32.xlu0 %v1833_v45 }
0x105f   :  { %v1824_v47 = vpop.permute.xlu2 %1823 }
0x1060   :  { %v1836_v29 = vsel %vm150_vm12, %v1824_v47, 0.0 }
0x1061   :  { %1889 = vrot.lane.b32.xlu1 %v4637_v25, %s3490_s20 }
0x1069   :  { %1827 = vrot.lane.b32.xlu1 %v4643_v2, %s3486_s9 }
0x106d   :  { %3187 = vrot.lane.b32.xlu0 %v3186_v5, %s3486_s9 }
0x106e   :  { %v1886_v51 = vpop.permute.xlu0 %1885  ;;  %v1892_v20 = vpop.permute.xlu2 %1891 }
0x106f   :  { %v1897_v24 = vsel %vm150_vm12, %v1886_v51, 0.0  ;;  %v1906_v63 = vsel %vm150_vm12, %v1892_v20, 0.0 }
0x1070   :  { %v1758_v56 = vpop.permute.xlu1 %1757 }
0x1071   :  { %v1769_v50 = vsel %vm150_vm12, %v1758_v56, 0.0 }
0x1072   :  { %1770 = vadd.xlane.f32.xlu2 %v1769_v50 }
0x108a   :  { %3177 = vrot.lane.b32.xlu2 %v3176_v39, %s3486_s9 }
0x108f   :  { %v1764_v50 = vpop.permute.xlu0 %1763 }
0x1093   :  { %1709 = vadd.xlane.f32.xlu1 %v1708_v42  ;;  %v1778_v42 = vsel %vm150_vm12, %v1764_v50, 0.0 }
0x1097   :  { %v3183_v39 = vpop.permute.xlu0 %3182 }
0x1098   :  { %v3185_v60 = vunpack.i.h.bf16 %v3183_v39 }
0x109b   :  { %1898 = vadd.xlane.f32.xlu1 %v1897_v24  ;;  %v4662_v8 = vpop.xlane.xlu1 %1706 }
0x10b3   :  { %v1760_v31 = vpop.permute.xlu1 %1759 }
0x10b4   :  { %v1772_v62 = vsel %vm150_vm12, %v1760_v31, 0.0 }
0x10b5   :  { %1773 = vadd.xlane.f32.xlu1 %v1772_v62 }
0x10bb   :  { %v1888_v54 = vpop.permute.xlu1 %1887 }
0x10bc   :  { %v1900_v45 = vsel %vm150_vm12, %v1888_v54, 0.0 }
0x10bd   :  { %1901 = vadd.xlane.f32.xlu2 %v1900_v45  ;;  %1837 = vadd.xlane.f32.xlu1 %v1836_v29  ;;  %v4696_v29 = vld [vmem:[%s5109_s4 + $0x88] sm:$0xff] }
0x10be   :  { %v4706_v9 = vpack.i.bf16 %v4696_v29, %v4701_v10 }
0x10c3   :  { %v1762_v43 = vpop.permute.xlu1 %1761 }
0x10c4   :  { %v1775_v32 = vsel %vm150_vm12, %v1762_v43, 0.0 }
0x10c5   :  { %1776 = vadd.xlane.f32.xlu0 %v1775_v32  ;;  %1712 = vadd.xlane.f32.xlu1 %v1711_v1 }
0x10cb   :  { %v1826_v7 = vpop.permute.xlu1 %1825 }
0x10cc   :  { %v1839_v56 = vsel %vm150_vm12, %v1826_v7, 0.0  ;;  %v1835_v24 = vpop.xlane.xlu0 %1834 }
0x10cd   :  { %1715 = vadd.xlane.f32.xlu1 %v1714_v44 }
0x10d3   :  { %v1890_v5 = vpop.permute.xlu1 %1889 }
0x10d4   :  { %v1903_v14 = vsel %vm150_vm12, %v1890_v5, 0.0 }
0x10d5   :  { %1840 = vadd.xlane.f32.xlu1 %v1839_v56 }
0x10d9   :  { %3197 = vrot.lane.b32.xlu0 %v3196_v33, %s3490_s20  ;;  %v3184_v33 = vunpack.i.l.bf16 %v3183_v39 }
0x10db   :  { %v1828_v40 = vpop.permute.xlu1 %1827 }
0x10dc   :  { %v1842_v30 = vsel %vm150_vm12, %v1828_v40, 0.0 }
0x10dd   :  { %1843 = vadd.xlane.f32.xlu2 %v1842_v30  ;;  %1904 = vadd.xlane.f32.xlu1 %v1903_v14 }
0x10df   :  { %v3188_v62 = vpop.permute.xlu0 %3187 }
0x10e0   :  { %v3189_v47 = vunpack.i.l.bf16 %v3188_v62  ;;  %v3190_v15 = vunpack.i.h.bf16 %v3188_v62 }
0x10e5   :  { %1779 = vadd.xlane.f32.xlu1 %v1778_v42  ;;  %v1771_v51 = vpop.xlane.xlu2 %1770 }
0x10e6   :  { %3371 = vrcp.f32 %v1771_v51 }
0x10e7   :  { %3373 = vrcp.f32 %v4662_v8  ;;  %v4718_v8 = vld [vmem:[%s5109_s4 + $0x80] sm:$0xff] }
0x10e8   :  { %3375 = vrcp.f32 %v1835_v24  ;;  %v4724_v7 = vpack.i.bf16 %v4713_v6, %v4718_v8 }
0x10ed   :  { %1907 = vadd.xlane.f32.xlu1 %v1906_v63  ;;  %v3178_v31 = vpop.permute.xlu2 %3177 }
0x10ee   :  { %v3179_v57 = vunpack.i.l.bf16 %v3178_v31  ;;  %v3180_v28 = vunpack.i.h.bf16 %v3178_v31 }
0x10f0   :  { %2003 = vmatpush.msrb.mxu3 %v3179_v57 }
0x10f2   :  { %2004 = vmatpush.msrb.mxu3 %v3180_v28 }
0x10f4   :  { %2005 = vmatpush.msrb.mxu3 %v3184_v33 }
0x10f5   :  { %3192 = vrot.lane.b32.xlu2 %v3191_v34, %s3490_s20  ;;  %v3372_v34 = vpop.eup %3371 }
0x10f6   :  { %2006 = vmatpush.msrb.mxu3 %v3185_v60  ;;  %v3374_v45 = vpop.eup %3373  ;;  %v1785_v43 = vmul.f32 %v3372_v34, %v4586_v61 }
0x10f7   :  { %v3376_v32 = vpop.eup %3375  ;;  %v1721_v1 = vmul.f32 %v3374_v45, %v4609_v11 }
0x10f8   :  { %2007 = vmatpush.msrb.mxu3 %v3189_v47  ;;  %v1849_v56 = vmul.f32 %v3376_v32, %v4582_v48 }
0x10f9   :  { %v1917_v44 = vsel %vm150_vm12, %v1721_v1, %v1785_v43 }
0x10fa   :  { %2008 = vmatpush.msrb.mxu3 %v3190_v15  ;;  %v1921_v40 = vsel %vm678_vm2, %v1917_v44, %v1849_v56 }
0x1106   :  { %v1710_v54 = vpop.xlane.xlu1 %1709  ;;  %2039 = vrot.lane.b32.xlu1 %v4387_v27, %s3490_s20 }
0x110e   :  { %v1899_v27 = vpop.xlane.xlu1 %1898  ;;  %3202 = vrot.lane.b32.xlu1 %v4706_v9, %s3491_s25 }
0x110f   :  { %3377 = vrcp.f32 %v1899_v27 }
0x1115   :  { %v3378_v5 = vpop.eup %3377 }
0x1116   :  { %3207 = vrot.lane.b32.xlu1 %v4724_v7, %s3491_s25  ;;  %v1913_v50 = vmul.f32 %v3378_v5, %v4580_v35 }
0x1118   :  { %v1925_v61 = vsel %vm683_vm3, %v1921_v40, %v1913_v50 }
0x1119   :  { %2009 = vmatmul.f32.vlgmr.msrb.gmra.mxu3 %v1925_v61 }
0x1128   :  { %v1774_v11 = vpop.xlane.xlu1 %1773 }
0x1129   :  { %3379 = vrcp.f32 %v1774_v11 }
0x112a   :  { %3381 = vrcp.f32 %v1710_v54 }
0x112f   :  { %v3380_v20 = vpop.eup %3379 }
0x1130   :  { %v1838_v14 = vpop.xlane.xlu1 %1837  ;;  %v1902_v30 = vpop.xlane.xlu2 %1901  ;;  %v1786_v48 = vmul.f32 %v3380_v20, %v4616_v13 }
0x1131   :  { %3383 = vrcp.f32 %v1838_v14  ;;  %v3382_v39 = vpop.eup %3381 }
0x1132   :  { %3385 = vrcp.f32 %v1902_v30  ;;  %v1722_v51 = vmul.f32 %v3382_v39, %v4657_v38 }
0x1134   :  { %v1918_v57 = vsel %vm150_vm12, %v1722_v51, %v1786_v48 }
0x1137   :  { %v3384_v42 = vpop.eup %3383 }
0x1138   :  { %v3386_v35 = vpop.eup %3385  ;;  %v1713_v24 = vpop.xlane.xlu1 %1712  ;;  %v1850_v63 = vmul.f32 %v3384_v42, %v4592_v3 }
0x1139   :  { %v1914_v31 = vmul.f32 %v3386_v35, %v4621_v26  ;;  %v1777_v60 = vpop.xlane.xlu0 %1776 }
0x113a   :  { %v1922_v28 = vsel %vm678_vm2, %v1918_v57, %v1850_v63  ;;  %3387 = vrcp.f32 %v1777_v60 }
0x113b   :  { %v1926_v33 = vsel %vm683_vm3, %v1922_v28, %v1914_v31  ;;  %3389 = vrcp.f32 %v1713_v24 }
0x113c   :  { %2012 = vmatmul.f32.gmra.mxu3 %v1926_v33 }
0x1140   :  { %v1716_v62 = vpop.xlane.xlu1 %1715  ;;  %v3388_v13 = vpop.eup %3387 }
0x1141   :  { %v3390_v15 = vpop.eup %3389  ;;  %v1787_v26 = vmul.f32 %v3388_v13, %v4626_v46 }
0x1142   :  { %v1723_v54 = vmul.f32 %v3390_v15, %v4669_v16 }
0x1144   :  { %v1919_v32 = vsel %vm150_vm12, %v1723_v54, %v1787_v26 }
0x1148   :  { %v1841_v47 = vpop.xlane.xlu1 %1840 }
0x1149   :  { %3391 = vrcp.f32 %v1841_v47 }
0x114b   :  { %v3198_v48 = vpop.permute.xlu0 %3197 }
0x114f   :  { %v3392_v3 = vpop.eup %3391 }
0x1150   :  { %v1905_v38 = vpop.xlane.xlu1 %1904  ;;  %v1851_v34 = vmul.f32 %v3392_v3, %v4631_v52  ;;  %v1844_v5 = vpop.xlane.xlu2 %1843 }
0x1151   :  { %3393 = vrcp.f32 %v1905_v38 }
0x1152   :  { %v1923_v1 = vsel %vm678_vm2, %v1919_v32, %v1851_v34 }
0x1157   :  { %v3394_v27 = vpop.eup %3393 }
0x1158   :  { %v1780_v45 = vpop.xlane.xlu1 %1779  ;;  %v1915_v43 = vmul.f32 %v3394_v27, %v4637_v25  ;;  %v3193_v39 = vpop.permute.xlu2 %3192 }
0x1159   :  { %3395 = vrcp.f32 %v1780_v45  ;;  %v3194_v42 = vunpack.i.l.bf16 %v3193_v39 }
0x115a   :  { %v1927_v44 = vsel %vm683_vm3, %v1923_v1, %v1915_v43  ;;  %3397 = vrcp.f32 %v1716_v62 }
0x115b   :  { %2015 = vmatmul.f32.gmra.mxu3 %v1927_v44  ;;  %3399 = vrcp.f32 %v1844_v5  ;;  %2066 = vmatpush.msrb.mxu1 %v3194_v42 }
0x115f   :  { %v3396_v46 = vpop.eup %3395 }
0x1160   :  { %v1908_v56 = vpop.xlane.xlu1 %1907  ;;  %v3398_v16 = vpop.eup %3397  ;;  %v1788_v52 = vmul.f32 %v3396_v46, %v4601_v58  ;;  %v4757_v58 = vld [vmem:[%s5109_s4 + $0x98] ss:$0 sm:$0xff] }
0x1161   :  { %3401 = vrcp.f32 %v1908_v56  ;;  %v3400_v50 = vpop.eup %3399  ;;  %v1724_v25 = vmul.f32 %v3398_v16, %v4674_v55  ;;  %v3195_v55 = vunpack.i.h.bf16 %v3193_v39  ;;  %2236 = vrot.lane.b32.xlu1 %v4757_v58, %s3491_s25 }
0x1162   :  { %v1852_v11 = vmul.f32 %v3400_v50, %v4643_v2  ;;  %v3199_v2 = vunpack.i.l.bf16 %v3198_v48  ;;  %v4802_v50 = vld [vmem:[%s5107_s2 + $0x8] sm:$0xff] }
0x1163   :  { %v1920_v40 = vsel %vm150_vm12, %v1724_v25, %v1788_v52  ;;  %2067 = vmatpush.msrb.mxu1 %v3195_v55  ;;  %v4805_v25 = vperm.slane %v4802_v50, 4 }
0x1164   :  { %v1924_v30 = vsel %vm678_vm2, %v1920_v40, %v1852_v11  ;;  %v4808_v11 = vperm.slane %v4802_v50, 5 }
0x1165   :  { %2068 = vmatpush.msrb.mxu1 %v3199_v2 }
0x1167   :  { %v3402_v61 = vpop.eup %3401 }
0x1168   :  { %v1916_v14 = vmul.f32 %v3402_v61, %v4596_v41  ;;  %v3200_v41 = vunpack.i.h.bf16 %v3198_v48 }
0x116a   :  { %v1928_v20 = vsel %vm683_vm3, %v1924_v30, %v1916_v14  ;;  %2069 = vmatpush.msrb.mxu1 %v3200_v41  ;;  %vm5124_vm3 = vcmask 130048  }
0x116b   :  { %2018 = vmatmul.f32.gmra.mxu3 %v1928_v20 }
0x116c   :  { %2211 = vmatpush.msra.mxu1 %v4701_v10 }
0x116e   :  { %2212 = vmatpush.msra.mxu1 %v4696_v29 }
0x1170   :  { %2213 = vmatpush.msra.mxu1 %v4718_v8 }
0x1172   :  { %2214 = vmatpush.msra.mxu1 %v4713_v6 }
0x1178   :  { %v4761_v51 = vpop.permute.xlu1 %2039 }
0x1180   :  { %v3203_v35 = vpop.permute.xlu1 %3202 }
0x1181   :  { %v3205_v24 = vunpack.i.h.bf16 %v3203_v35  ;;  %v3204_v63 = vunpack.i.l.bf16 %v3203_v35 }
0x1183   :  { %2251 = vmatpush.msra.mxu0 %v3204_v63 }
0x1185   :  { %2252 = vmatpush.msra.mxu0 %v3205_v24 }
0x1188   :  { %v3208_v31 = vpop.permute.xlu1 %3207 }
0x1189   :  { %v3210_v57 = vunpack.i.h.bf16 %v3208_v31  ;;  %v3209_v28 = vunpack.i.l.bf16 %v3208_v31  ;;  %v3455_v31 = vld [vmem:[%s5108_s3 + $0x20] sm:$0xff] }
0x118b   :  { %2253 = vmatpush.msra.mxu0 %v3209_v28 }
0x118d   :  { %2254 = vmatpush.msra.mxu0 %v3210_v57 }
0x118e   :  { %2998 = vmatmul.msk.f32.vlgmr.msra.gmra.mxu0 %vm150_vm12, %v4095_v37 }
0x119c   :  { %v2010_v10 = vpop.f32.mrf.mxu3 }
0x119d   :  { %2988 = vmatmul.msk.f32.vlgmr.msrb.gmra.mxu1 %vm150_vm12, %v2010_v10 }
0x11bf   :  { %v2013_v29 = vpop.f32.mrf.mxu3 }
0x11c0   :  { %2989 = vmatmul.msk.f32.gmra.mxu1 %vm150_vm12, %v2013_v29 }
0x11d3   :  { %v2237_v33 = vpop.permute.xlu1 %2236 }
0x11de   :  { %v2016_v6 = vpop.f32.mrf.mxu3 }
0x11df   :  { %2990 = vmatmul.msk.f32.gmra.mxu1 %vm150_vm12, %v2016_v6 }
0x11ee   :  { %v2019_v8 = vpop.f32.mrf.mxu3 }
0x11ef   :  { %2991 = vmatmul.msk.f32.gmra.mxu1 %vm150_vm12, %v2019_v8 }
0x120b   :  { %v2256_v62 = vpop.f32.mrf.mxu0 }
0x120c   :  { %v4773_v60 = vadd.f32 %v2256_v62, %v2237_v33 }
0x120e   :  { %v2262_v47 = vmul.f32 %v3589_v18, %v4773_v60  ;;  %v2261_v37 = vmul.f32 %v3587_v17, %v4773_v60  ;;  %v2260_v13 = vmul.f32 %v3600_v22, %v4773_v60  ;;  %v2259_v38 = vmul.f32 %v3598_v21, %v4773_v60 }
0x1210   :  { %2999 = vmatpush.xpose.msk.msrb.mxu0 %vm150_vm12, %v2262_v47 }
0x1214   :  { %3000 = vmatpush.xpose.msk.msrb.mxu0 %vm150_vm12, %v2261_v37 }
0x1218   :  { %3001 = vmatpush.xpose.msk.msrb.mxu0 %vm150_vm12, %v2260_v13 }
0x121a   :  { %v4787_v15 = vpop.f32.mrf.mxu1 }
0x121c   :  { %3002 = vmatpush.xpose.msk.msrb.mxu0 %vm150_vm12, %v2259_v38 }
0x123d   :  { %v4789_v18 = vpop.f32.mrf.mxu1 }
0x125c   :  { %v4791_v3 = vpop.f32.mrf.mxu1 }
0x126c   :  { %v2080_v26 = vpop.f32.mrf.mxu1 }
0x126d   :  { %v2081_v17 = vadd.f32 %v2080_v26, %v4761_v51 }
0x126f   :  { %v2086_v54 = vadd.f32 %v2081_v17, %v4380_v12 }
0x1271   :  { %v2096_v22 = vsel %vm150_vm12, %v2086_v54, 0.0 }
0x1272   :  { %2097 = vadd.xlane.f32.xlu0 %v2096_v22 }
0x12e5   :  { %v2098_v34 = vpop.xlane.xlu0 %2097 }
0x12e6   :  { %v2102_v27 = vmul.f32 %v2098_v34, %v4123_v19  ;;  %v2265_v34 = vmul.f32 %v3642_v53, %v4773_v60 }
0x12e8   :  { %v2106_v21 = vsub.f32 %v2086_v54, %v2102_v27  ;;  %v2266_v27 = vmul.f32 %v3634_v49, %v4773_v60  ;;  %v2263_v49 = vmul.f32 %v3679_v4, %v4773_v60 }
0x12ea   :  { %v2110_v45 = vmul.f32 %v2106_v21, %v2106_v21 }
0x12ec   :  { %v2120_v43 = vsel %vm150_vm12, %v2110_v45, 0.0 }
0x12ed   :  { %2121 = vadd.xlane.f32.xlu2 %v2120_v43 }
0x1360   :  { %v2122_v32 = vpop.xlane.xlu2 %2121 }
0x1361   :  { %v2126_v1 = vmul.f32 %v2122_v32, %v4123_v19 }
0x1363   :  { %v2130_v44 = vadd.f32 1e-05, %v2126_v1 }
0x1365   :  { %3403 = vrsqrt.f32 %v2130_v44  ;;  %vm2167_vm14 = vweird.f32 %v2130_v44 }
0x136b   :  { %v3404_v5 = vpop.eup %3403 }
0x136c   :  { %v2162_v46 = vmul.f32 %v3404_v5, %v2130_v44  ;;  %vm2168_vm13 = vweird.f32 %v3404_v5 }
0x136d   :  { %vm2169_vm15 = vmor %vm2167_vm14, %vm2168_vm13 }
0x136e   :  { %v2163_v56 = vmul.f32 %v3404_v5, %v2162_v46 }
0x1370   :  { %v2164_v12 = vmul.f32 0.5, %v2163_v56 }
0x1372   :  { %v2165_v16 = vsub.f32 1.5, %v2164_v12 }
0x1374   :  { %v2166_v52 = vmul.f32 %v3404_v5, %v2165_v16 }
0x1376   :  { %v2170_v40 = vsel %vm2169_vm15, %v3404_v5, %v2166_v52  ;;  %v2264_v5 = vmul.f32 %v3653_v59, %v4773_v60  ;;  %v3456_v52 = vld [vmem:[#allocation2 + $0x8] sm:$0xff]  ;;  %v3457_v60 = vld [vmem:[#allocation2] sm:$0xff] }
0x1377   :  { %v2174_v61 = vmul.f32 %v2170_v40, %v2106_v21  ;;  %v3211_v21 = vpack.i.bf16 %v2265_v34, %v2266_v27 }
0x1378   :  { %v3216_v46 = vpack.i.bf16 %v2263_v49, %v2264_v5  ;;  %v3007_v49 = vld [vmem:[%s5110_s5 + $0x30] sm:$0xff]  ;;  %v3006_v5 = vld [vmem:[%s5110_s5 + $0x28] sm:$0xff] }
0x1379   :  { %v2179_v14 = vmul.f32 %v4805_v25, %v2174_v61 }
0x137b   :  { %v4812_v30 = vadd.f32 %v4808_v11, %v2179_v14  ;;  %v3458_v14 = vld [vmem:[#allocation2 + $0x10] sm:$0xff] }
0x137d   :  { %2188 = vst.msk [vmem:[#allocation2 + $0x18] sm:$0xff] %vm150_vm12, %v4812_v30  ;;  %2997 = vmatmul.msk.f32.vlgmr.msra.gmra.mxu1 %vm150_vm12, %v4812_v30 }
0x13fa   :  { %v2216_v20 = vpop.f32.mrf.mxu1 }
0x13fb   :  { %v2217_v39 = vadd.f32 %v4757_v58, %v2216_v20 }
0x13fd   :  { %3003 = vmatmul.msk.f32.vlgmr.msrb.gmra.mxu0 %vm150_vm12, %v2217_v39 }
0x147a   :  { %v2299_v48 = vpop.f32.mrf.mxu0 }
0x147b   :  { %v2302_v55 = vmul.f32 0.35355338, %v2299_v48 }
0x147d   :  { %v2347_v42 = vadd.f32 %v2302_v55, %v4150_v36  ;;  %v2331_v2 = vadd.f32 %v2302_v55, %v4148_v0  ;;  %v2315_v41 = vadd.f32 %v2302_v55, %v4152_v23  ;;  %v2303_v57 = vadd.f32 %v3455_v31, %v2302_v55 }
0x147f   :  { %v2348_v35 = vsel %vm1131_vm9, %v2347_v42, -inf  ;;  %v2332_v24 = vsel %vm1111_vm8, %v2331_v2, -inf  ;;  %v2316_v63 = vsel %vm1091_vm10, %v2315_v41, -inf  ;;  %v2304_v36 = vsel %vm114_vm1, %v2303_v57, -inf }
0x1480   :  { %2349 = vmax.xlane.f32.xlu2 %v2348_v35  ;;  %2333 = vmax.xlane.f32.xlu0 %v2332_v24  ;;  %vm5125_vm8 = vcmask 195584  }
0x1481   :  { %2317 = vmax.xlane.f32.xlu1 %v2316_v63 }
0x1488   :  { %2305 = vmax.xlane.f32.xlu0 %v2304_v36 }
0x14f3   :  { %v2334_v0 = vpop.xlane.xlu0 %2333  ;;  %v2350_v6 = vpop.xlane.xlu2 %2349 }
0x14f4   :  { %v2335_v28 = vsub.f32 %v2331_v2, %v2334_v0  ;;  %v2318_v23 = vpop.xlane.xlu1 %2317  ;;  %v2351_v33 = vsub.f32 %v2347_v42, %v2350_v6 }
0x14f5   :  { %v2319_v10 = vsub.f32 %v2315_v41, %v2318_v23 }
0x14f6   :  { %v2336_v29 = vmul.f32 1.442695, %v2335_v28  ;;  %v2352_v37 = vmul.f32 1.442695, %v2351_v33 }
0x14f7   :  { %v2320_v8 = vmul.f32 1.442695, %v2319_v10 }
0x14f8   :  { %3405 = vpow2.f32 %v2336_v29 }
0x14f9   :  { %3407 = vpow2.f32 %v2320_v8 }
0x14fb   :  { %v2306_v62 = vpop.xlane.xlu0 %2305 }
0x14fc   :  { %v2307_v47 = vsub.f32 %v2303_v57, %v2306_v62 }
0x14fe   :  { %v2308_v13 = vmul.f32 1.442695, %v2307_v47  ;;  %v4830_v38 = vpop.eup %3405 }
0x14ff   :  { %v3408_v26 = vpop.eup %3407  ;;  %2339 = vrot.lane.b32.xlu0 %v4830_v38, %s3488_s0  ;;  %s3497_s0 = smov [#allocation3]  }
0x1500   :  { %3409 = vpow2.f32 %v2308_v13  ;;  %2323 = vrot.lane.b32.xlu2 %v3408_v26, %s3487_s10 }
0x1501   :  { %3411 = vpow2.f32 %v2352_v37 }
0x1506   :  { %v3410_v17 = vpop.eup %3409 }
0x1507   :  { %v2310_v54 = vsel %vm114_vm1, %v3410_v17, 0.0  ;;  %v4836_v22 = vpop.eup %3411 }
0x1508   :  { %2311 = vadd.xlane.f32.xlu1 %v2310_v54  ;;  %2355 = vrot.lane.b32.xlu2 %v4836_v22, %s3496_s12 }
0x1521   :  { %3212 = vrot.lane.b32.xlu1 %v3211_v21, %s3491_s25 }
0x155a   :  { %v2324_v45 = vpop.permute.xlu2 %2323 }
0x155b   :  { %v2326_v43 = vsel %vm114_vm1, %v2324_v45, 0.0 }
0x155c   :  { %2327 = vadd.xlane.f32.xlu0 %v2326_v43 }
0x1562   :  { %v2356_v32 = vpop.permute.xlu2 %2355 }
0x1563   :  { %v2358_v1 = vsel %vm114_vm1, %v2356_v32, 0.0  ;;  %v3009_v32 = vld [vmem:[%s5110_s5 + $0x40] sm:$0xff] }
0x1564   :  { %2359 = vadd.xlane.f32.xlu1 %v2358_v1  ;;  %2516 = vmatpush.msra.mxu0 %v3009_v32  ;;  %v3008_v1 = vld [vmem:[%s5110_s5 + $0x38] sm:$0xff] }
0x1566   :  { %2517 = vmatpush.msra.mxu0 %v3008_v1 }
0x1568   :  { %2518 = vmatpush.msra.mxu0 %v3007_v49 }
0x156a   :  { %2519 = vmatpush.msra.mxu0 %v3006_v5 }
0x1570   :  { %3222 = vrot.lane.b32.xlu0 %v4706_v9, %s3490_s20  ;;  %v2075_v9 = vadd.f32 %v4789_v18, %v4761_v51  ;;  %v2078_v18 = vadd.f32 %v4791_v3, %v4761_v51 }
0x1571   :  { %v2340_v44 = vpop.permute.xlu0 %2339 }
0x1572   :  { %v2342_v53 = vsel %vm114_vm1, %v2340_v44, 0.0  ;;  %v4861_v4 = vadd.f32 %v3456_v52, %v2075_v9  ;;  %v2085_v20 = vadd.f32 %v3458_v14, %v2078_v18 }
0x1573   :  { %2343 = vadd.xlane.f32.xlu2 %v2342_v53 }
0x1574   :  { %v2090_v59 = vsel %vm150_vm12, %v4861_v4, 0.0  ;;  %v2093_v39 = vsel %vm150_vm12, %v2085_v20, 0.0 }
0x157b   :  { %v2312_v56 = vpop.xlane.xlu1 %2311 }
0x157d   :  { %3217 = vrot.lane.b32.xlu1 %v3216_v46, %s3491_s25  ;;  %s2892_s25 = sshll.u32 %s5113_s8, 4  ;;  %s2893_s25 = int_to_ptr.hbm [resolvable:$true] %s2892_s25 }
0x1585   :  { %2417 = vrot.lane.b32.xlu1 %v4757_v58, %s3490_s20  ;;  %v2072_v58 = vadd.f32 %v4787_v15, %v4761_v51 }
0x158b   :  { %3227 = vrot.lane.b32.xlu2 %v4724_v7, %s3490_s20  ;;  %v2083_v7 = vadd.f32 %v3457_v60, %v2072_v58 }
0x158d   :  { %v2087_v61 = vsel %vm150_vm12, %v2083_v7, 0.0 }
0x1593   :  { %v3213_v12 = vpop.permute.xlu1 %3212 }
0x1594   :  { %v3214_v16 = vunpack.i.l.bf16 %v3213_v12  ;;  %v3215_v40 = vunpack.i.h.bf16 %v3213_v12 }
0x1596   :  { %2397 = vmatpush.msrb.mxu1 %v3214_v16 }
0x1598   :  { %2398 = vmatpush.msrb.mxu1 %v3215_v40 }
0x159a   :  { %2091 = vadd.xlane.f32.xlu0 %v2090_v59 }
0x15af   :  { %2088 = vadd.xlane.f32.xlu1 %v2087_v61 }
0x15b4   :  { %2094 = vadd.xlane.f32.xlu2 %v2093_v39 }
0x15cf   :  { %v2328_v48 = vpop.xlane.xlu0 %2327 }
0x15d0   :  { %3413 = vrcp.f32 %v2328_v48 }
0x15d1   :  { %3415 = vrcp.f32 %v2312_v56 }
0x15d6   :  { %v3414_v15 = vpop.eup %3413 }
0x15d7   :  { %v2360_v55 = vpop.xlane.xlu1 %2359  ;;  %v3416_v2 = vpop.eup %3415  ;;  %v2330_v41 = vmul.f32 %v3414_v15, %v3408_v26 }
0x15d8   :  { %v2314_v51 = vmul.f32 %v3416_v2, %v3410_v17 }
0x15da   :  { %v2363_v57 = vsel %vm114_vm1, %v2314_v51, %v2330_v41 }
0x15e2   :  { %v3223_v0 = vpop.permute.xlu0 %3222 }
0x15e3   :  { %v3224_v10 = vunpack.i.l.bf16 %v3223_v0  ;;  %v3225_v6 = vunpack.i.h.bf16 %v3223_v0 }
0x15e6   :  { %v2344_v42 = vpop.xlane.xlu2 %2343 }
0x15e7   :  { %3417 = vrcp.f32 %v2344_v42 }
0x15e8   :  { %3419 = vrcp.f32 %v2360_v55 }
0x15ed   :  { %v3418_v35 = vpop.eup %3417 }
0x15ee   :  { %v2346_v3 = vmul.f32 %v3418_v35, %v4830_v38  ;;  %v3420_v24 = vpop.eup %3419  ;;  %v3228_v8 = vpop.permute.xlu2 %3227 }
0x15ef   :  { %v3218_v63 = vpop.permute.xlu1 %3217  ;;  %v2362_v28 = vmul.f32 %v3420_v24, %v4836_v22  ;;  %v3229_v33 = vunpack.i.l.bf16 %v3228_v8  ;;  %v3230_v62 = vunpack.i.h.bf16 %v3228_v8  ;;  %v3018_v24 = vld [vmem:[%s5111_s6 + $0x80] sm:$0xff] }
0x15f0   :  { %v3219_v31 = vunpack.i.l.bf16 %v3218_v63  ;;  %v2364_v36 = vsel %vm5124_vm3, %v2363_v57, %v2346_v3  ;;  %v3220_v23 = vunpack.i.h.bf16 %v3218_v63  ;;  %v3017_v63 = vld [vmem:[%s5111_s6 + $0x78] sm:$0xff]  ;;  %2558 = vmatpush.msra.mxu3 %v3018_v24  ;;  %v3015_v57 = vld [vmem:[%s5111_s6 + $0x68] sm:$0xff] }
0x15f1   :  { %v2365_v29 = vsel %vm5125_vm8, %v2364_v36, %v2362_v28  ;;  %v3014_v36 = vld [vmem:[%s5111_s6 + $0x60] sm:$0xff] }
0x15f2   :  { %2399 = vmatpush.msrb.mxu1 %v3219_v31  ;;  %v3016_v31 = vld [vmem:[%s5111_s6 + $0x70] sm:$0xff]  ;;  %2559 = vmatpush.msra.mxu3 %v3017_v63 }
0x15f4   :  { %2400 = vmatpush.msrb.mxu1 %v3220_v23  ;;  %2560 = vmatpush.msra.mxu3 %v3016_v31 }
0x15f5   :  { %3004 = vmatmul.msk.f32.vlgmr.msrb.gmra.mxu1 %vm150_vm12, %v2365_v29 }
0x15f6   :  { %2435 = vmatpush.msra.mxu1 %v3224_v10  ;;  %2561 = vmatpush.msra.mxu3 %v3015_v57 }
0x15f7   :  { %v4877_v47 = vpop.permute.xlu1 %2417 }
0x15f8   :  { %2436 = vmatpush.msra.mxu1 %v3225_v6  ;;  %2562 = vmatpush.msra.mxu3 %v3014_v36  ;;  %v3238_v36 = vld [vmem:[%s5111_s6 + $0x88] ss:$0 sm:$0xff] }
0x15fa   :  { %2437 = vmatpush.msra.mxu1 %v3229_v33 }
0x15fc   :  { %2438 = vmatpush.msra.mxu1 %v3230_v62  ;;  %v3013_v62 = vld [vmem:[%s5111_s6 + $0x58] sm:$0xff] }
0x15fd   :  { %2563 = vmatpush.msra.mxu3 %v3013_v62 }
0x160d   :  { %v2092_v43 = vpop.xlane.xlu0 %2091 }
0x160e   :  { %v2100_v28 = vmul.f32 %v2092_v43, %v4123_v19 }
0x1610   :  { %v2104_v29 = vsub.f32 %v4861_v4, %v2100_v28  ;;  %v4941_v4 = vld [vmem:[%s5110_s5 + $0x48] ss:$0 sm:$0xff] }
0x1612   :  { %v2108_v8 = vmul.f32 %v2104_v29, %v2104_v29 }
0x1614   :  { %v2114_v33 = vsel %vm150_vm12, %v2108_v8, 0.0 }
0x1622   :  { %v2089_v37 = vpop.xlane.xlu1 %2088 }
0x1623   :  { %v2099_v13 = vmul.f32 %v2089_v37, %v4123_v19 }
0x1625   :  { %v2103_v38 = vsub.f32 %v2083_v7, %v2099_v13 }
0x1627   :  { %v2095_v26 = vpop.xlane.xlu2 %2094  ;;  %v2107_v17 = vmul.f32 %v2103_v38, %v2103_v38 }
0x1628   :  { %v2101_v54 = vmul.f32 %v2095_v26, %v4123_v19 }
0x1629   :  { %v2111_v22 = vsel %vm150_vm12, %v2107_v17, 0.0 }
0x162a   :  { %v2105_v34 = vsub.f32 %v2085_v20, %v2101_v54  ;;  %2112 = vadd.xlane.f32.xlu0 %v2111_v22 }
0x162c   :  { %v2109_v27 = vmul.f32 %v2105_v34, %v2105_v34 }
0x162e   :  { %v2117_v21 = vsel %vm150_vm12, %v2109_v27, 0.0 }
0x162f   :  { %2118 = vadd.xlane.f32.xlu2 %v2117_v21 }
0x1672   :  { %v2402_v45 = vpop.f32.mrf.mxu1 }
0x1673   :  { %3005 = vmatmul.msk.f32.vlgmr.msra.gmra.mxu1 %vm150_vm12, %v2402_v45 }
0x169d   :  { %v2113_v44 = vpop.xlane.xlu0 %2112 }
0x169e   :  { %v2123_v53 = vmul.f32 %v2113_v44, %v4123_v19 }
0x16a0   :  { %v2127_v46 = vadd.f32 1e-05, %v2123_v53 }
0x16a2   :  { %3421 = vrsqrt.f32 %v2127_v46  ;;  %v2119_v56 = vpop.xlane.xlu2 %2118  ;;  %vm2137_vm9 = vweird.f32 %v2127_v46 }
0x16a3   :  { %v2125_v9 = vmul.f32 %v2119_v56, %v4123_v19 }
0x16a5   :  { %v2129_v12 = vadd.f32 1e-05, %v2125_v9 }
0x16a7   :  { %3423 = vrsqrt.f32 %v2129_v12  ;;  %vm2157_vm11 = vweird.f32 %v2129_v12 }
0x16a8   :  { %v3422_v16 = vpop.eup %3421 }
0x16a9   :  { %v2132_v52 = vmul.f32 %v3422_v16, %v2127_v46  ;;  %vm2138_vm1 = vweird.f32 %v3422_v16 }
0x16aa   :  { %vm2139_vm10 = vmor %vm2137_vm9, %vm2138_vm1 }
0x16ab   :  { %v2133_v40 = vmul.f32 %v3422_v16, %v2132_v52 }
0x16ad   :  { %v3424_v59 = vpop.eup %3423  ;;  %v2134_v58 = vmul.f32 0.5, %v2133_v40 }
0x16ae   :  { %v2152_v60 = vmul.f32 %v3424_v59, %v2129_v12  ;;  %vm2158_vm0 = vweird.f32 %v3424_v59 }
0x16af   :  { %v2135_v7 = vsub.f32 1.5, %v2134_v58  ;;  %vm2159_vm4 = vmor %vm2157_vm11, %vm2158_vm0 }
0x16b0   :  { %v2153_v18 = vmul.f32 %v3424_v59, %v2152_v60 }
0x16b1   :  { %v2136_v61 = vmul.f32 %v3422_v16, %v2135_v7 }
0x16b2   :  { %v2154_v14 = vmul.f32 0.5, %v2153_v18 }
0x16b3   :  { %v2140_v20 = vsel %vm2139_vm10, %v3422_v16, %v2136_v61  ;;  %v2466_v61 = vperm.slane %v4802_v50, 6 }
0x16b4   :  { %v2171_v39 = vmul.f32 %v2140_v20, %v2103_v38  ;;  %v2155_v48 = vsub.f32 1.5, %v2154_v14  ;;  %v2468_v20 = vperm.slane %v4802_v50, 7 }
0x16b6   :  { %v2176_v55 = vmul.f32 %v4805_v25, %v2171_v39  ;;  %v2156_v42 = vmul.f32 %v3424_v59, %v2155_v48 }
0x16b8   :  { %v2181_v15 = vadd.f32 %v4808_v11, %v2176_v55  ;;  %v2160_v2 = vsel %vm2159_vm4, %v3424_v59, %v2156_v42 }
0x16b9   :  { %v2173_v41 = vmul.f32 %v2160_v2, %v2105_v34 }
0x16ba   :  { %2185 = vst.msk [vmem:[#allocation2] sm:$0xff] %vm150_vm12, %v2181_v15 }
0x16bb   :  { %v2178_v35 = vmul.f32 %v4805_v25, %v2173_v41 }
0x16bd   :  { %v2183_v51 = vadd.f32 %v4808_v11, %v2178_v35 }
0x16bf   :  { %2187 = vst.msk [vmem:[#allocation2 + $0x10] sm:$0xff] %vm150_vm12, %v2183_v51 }
0x16c1   :  { %v4904_v3 = vld [vmem:[#allocation2] sm:$0xff] }
0x16c2   :  { %3020 = vmatmul.msk.f32.vlgmr.msra.gmra.mxu0 %vm150_vm12, %v4904_v3 }
0x16c6   :  { %v2473_v16 = vld [vmem:[#allocation2 + $0x10] sm:$0xff] }
0x16f0   :  { %v2440_v0 = vpop.f32.mrf.mxu1 }
0x16f1   :  { %v2441_v23 = vadd.f32 %v2440_v0, %v4877_v47  ;;  %v3012_v47 = vld [vmem:[%s5111_s6 + $0x50] sm:$0xff] }
0x16f2   :  { %2564 = vmatpush.msra.mxu3 %v3012_v47 }
0x16f3   :  { %v2443_v10 = vadd.f32 %v2441_v23, %v4812_v30  ;;  %v3011_v30 = vld [vmem:[%s5111_s6 + $0x48] sm:$0xff]  ;;  %s2890_s6 = sshll.u32 %s3497_s0, 4  ;;  %s2891_s6 = int_to_ptr.vmem [resolvable:$true] %s2890_s6 }
0x16f4   :  { %2565 = vmatpush.msra.mxu3 %v3011_v30 }
0x16f5   :  { %v2444_v6 = vsel %vm150_vm12, %v2443_v10, 0.0 }
0x16f6   :  { %2445 = vadd.xlane.f32.xlu1 %v2444_v6 }
0x16fe   :  { %2115 = vadd.xlane.f32.xlu1 %v2114_v33 }
0x173f   :  { %v2521_v37 = vpop.f32.mrf.mxu0 }
0x1740   :  { %v2522_v13 = vadd.f32 %v4941_v4, %v2521_v37 }
0x1742   :  { %v2533_v38 = vmax.f32 %v2522_v13, 0.0 }
0x1744   :  { %3024 = vmatmul.msk.f32.vlgmr.msra.gmra.mxu3 %vm678_vm2, %v2533_v38 }
0x1769   :  { %v2446_v26 = vpop.xlane.xlu1 %2445 }
0x176a   :  { %v2447_v17 = vmul.f32 %v2446_v26, %v4123_v19 }
0x176c   :  { %v2448_v54 = vsub.f32 %v2443_v10, %v2447_v17 }
0x176e   :  { %v2449_v22 = vmul.f32 %v2448_v54, %v2448_v54 }
0x1770   :  { %v2450_v34 = vsel %vm150_vm12, %v2449_v22, 0.0 }
0x1771   :  { %2451 = vadd.xlane.f32.xlu0 %v2450_v34  ;;  %v2116_v27 = vpop.xlane.xlu1 %2115 }
0x1772   :  { %v2124_v21 = vmul.f32 %v2116_v27, %v4123_v19 }
0x1774   :  { %v2128_v45 = vadd.f32 1e-05, %v2124_v21 }
0x1776   :  { %3425 = vrsqrt.f32 %v2128_v45  ;;  %vm2147_vm6 = vweird.f32 %v2128_v45 }
0x177c   :  { %v3426_v43 = vpop.eup %3425 }
0x177d   :  { %v2142_v32 = vmul.f32 %v3426_v43, %v2128_v45  ;;  %vm2148_vm5 = vweird.f32 %v3426_v43 }
0x177e   :  { %vm2149_vm7 = vmor %vm2147_vm6, %vm2148_vm5 }
0x177f   :  { %v2143_v1 = vmul.f32 %v3426_v43, %v2142_v32 }
0x1781   :  { %v2144_v44 = vmul.f32 0.5, %v2143_v1 }
0x1783   :  { %v2145_v53 = vsub.f32 1.5, %v2144_v44 }
0x1785   :  { %v2146_v49 = vmul.f32 %v3426_v43, %v2145_v53 }
0x1787   :  { %v2150_v5 = vsel %vm2149_vm7, %v3426_v43, %v2146_v49 }
0x1788   :  { %v2172_v46 = vmul.f32 %v2150_v5, %v2104_v29 }
0x178a   :  { %v2177_v56 = vmul.f32 %v4805_v25, %v2172_v46 }
0x178c   :  { %v2182_v9 = vadd.f32 %v4808_v11, %v2177_v56 }
0x178e   :  { %2186 = vst.msk [vmem:[#allocation2 + $0x8] sm:$0xff] %vm150_vm12, %v2182_v9 }
0x1795   :  { %v2472_v12 = vld [vmem:[#allocation2 + $0x8] sm:$0xff] }
0x1796   :  { %3021 = vmatmul.msk.f32.gmra.mxu0 %vm150_vm12, %v2472_v12 }
0x179e   :  { %3022 = vmatmul.msk.f32.gmra.mxu0 %vm150_vm12, %v2473_v16 }
0x17c7   :  { %v2567_v57 = vpop.f32.mrf.mxu3 }
0x17e4   :  { %v2452_v52 = vpop.xlane.xlu0 %2451 }
0x17e5   :  { %v2453_v40 = vmul.f32 %v2452_v52, %v4123_v19 }
0x17e7   :  { %v2454_v59 = vadd.f32 1e-05, %v2453_v40 }
0x17e9   :  { %3427 = vrsqrt.f32 %v2454_v59  ;;  %vm2461_vm14 = vweird.f32 %v2454_v59 }
0x17ef   :  { %v3428_v58 = vpop.eup %3427 }
0x17f0   :  { %v2456_v60 = vmul.f32 %v3428_v58, %v2454_v59  ;;  %vm2462_vm13 = vweird.f32 %v3428_v58 }
0x17f1   :  { %vm2463_vm15 = vmor %vm2461_vm14, %vm2462_vm13 }
0x17f2   :  { %v2457_v7 = vmul.f32 %v3428_v58, %v2456_v60 }
0x17f4   :  { %v2458_v18 = vmul.f32 0.5, %v2457_v7 }
0x17f6   :  { %v2459_v25 = vsub.f32 1.5, %v2458_v18 }
0x17f8   :  { %v2460_v11 = vmul.f32 %v3428_v58, %v2459_v25 }
0x17fa   :  { %v2464_v14 = vsel %vm2463_vm15, %v3428_v58, %v2460_v11 }
0x17fb   :  { %v2465_v39 = vmul.f32 %v2464_v14, %v2448_v54 }
0x17fd   :  { %v2467_v48 = vmul.f32 %v2466_v61, %v2465_v39 }
0x17ff   :  { %v2469_v55 = vadd.f32 %v2468_v20, %v2467_v48  ;;  %v4993_v48 = vld [vmem:[%s5107_s2 + $0x10] sm:$0x1f] }
0x1801   :  { %2470 = vst.msk [vmem:[#allocation2 + $0x18] sm:$0xff] %vm150_vm12, %v2469_v55 }
0x1808   :  { %v2474_v42 = vld [vmem:[#allocation2 + $0x18] sm:$0xff] }
0x1809   :  { %3023 = vmatmul.msk.f32.gmra.mxu0 %vm150_vm12, %v2474_v42 }
0x1813   :  { %v2524_v15 = vpop.f32.mrf.mxu0 }
0x1814   :  { %v2525_v2 = vadd.f32 %v4941_v4, %v2524_v15 }
0x1816   :  { %v2534_v41 = vmax.f32 %v2525_v2, 0.0  ;;  %v2671_v2 = vperm.slane %v4993_v48, 0 }
0x1818   :  { %3025 = vmatmul.msk.f32.gmra.mxu3 %vm678_vm2, %v2534_v41 }
0x181b   :  { %v2527_v35 = vpop.f32.mrf.mxu0 }
0x181c   :  { %v2528_v51 = vadd.f32 %v4941_v4, %v2527_v35 }
0x181e   :  { %v2535_v24 = vmax.f32 %v2528_v51, 0.0  ;;  %v2676_v51 = vperm.slane %v4993_v48, 1 }
0x1820   :  { %3026 = vmatmul.msk.f32.gmra.mxu3 %vm678_vm2, %v2535_v24 }
0x1886   :  { %v2530_v50 = vpop.f32.mrf.mxu0 }
0x1887   :  { %v2531_v63 = vadd.f32 %v4941_v4, %v2530_v50  ;;  %v2568_v4 = vadd.f32 %v3238_v36, %v2567_v57 }
0x1889   :  { %v2536_v31 = vmax.f32 %v2531_v63, 0.0  ;;  %v2579_v38 = vadd.f32 %v2568_v4, %v4904_v3 }
0x188b   :  { %3027 = vmatmul.msk.f32.gmra.mxu3 %vm678_vm2, %v2536_v31  ;;  %v2583_v54 = vsel %vm150_vm12, %v2579_v38, 0.0 }
0x189b   :  { %v2570_v0 = vpop.f32.mrf.mxu3 }
0x189c   :  { %v2571_v28 = vadd.f32 %v3238_v36, %v2570_v0 }
0x189e   :  { %v2580_v23 = vadd.f32 %v2571_v28, %v2472_v12 }
0x18a0   :  { %v2586_v10 = vsel %vm150_vm12, %v2580_v23, 0.0 }
0x18a1   :  { %2587 = vadd.xlane.f32.xlu0 %v2586_v10 }
0x18a3   :  { %v2573_v29 = vpop.f32.mrf.mxu3 }
0x18a4   :  { %v2574_v6 = vadd.f32 %v3238_v36, %v2573_v29 }
0x18a6   :  { %v2581_v8 = vadd.f32 %v2574_v6, %v2473_v16 }
0x18a8   :  { %v2589_v33 = vsel %vm150_vm12, %v2581_v8, 0.0 }
0x18a9   :  { %2590 = vadd.xlane.f32.xlu2 %v2589_v33 }
0x190e   :  { %v2576_v62 = vpop.f32.mrf.mxu3 }
0x190f   :  { %v2577_v47 = vadd.f32 %v3238_v36, %v2576_v62 }
0x1911   :  { %v2582_v30 = vadd.f32 %v2577_v47, %v2474_v42 }
0x1913   :  { %v2592_v37 = vsel %vm150_vm12, %v2582_v30, 0.0 }
0x1914   :  { %v2588_v13 = vpop.xlane.xlu0 %2587  ;;  %2593 = vadd.xlane.f32.xlu1 %v2592_v37 }
0x1915   :  { %v2596_v26 = vmul.f32 %v2588_v13, %v4123_v19 }
0x1917   :  { %v2600_v17 = vsub.f32 %v2580_v23, %v2596_v26 }
0x1919   :  { %v2604_v21 = vmul.f32 %v2600_v17, %v2600_v17 }
0x191b   :  { %v2610_v32 = vsel %vm150_vm12, %v2604_v21, 0.0 }
0x191c   :  { %v2591_v22 = vpop.xlane.xlu2 %2590  ;;  %2584 = vadd.xlane.f32.xlu1 %v2583_v54 }
0x191d   :  { %v2597_v34 = vmul.f32 %v2591_v22, %v4123_v19 }
0x191f   :  { %v2601_v27 = vsub.f32 %v2581_v8, %v2597_v34 }
0x1921   :  { %v2605_v45 = vmul.f32 %v2601_v27, %v2601_v27 }
0x1923   :  { %v2613_v43 = vsel %vm150_vm12, %v2605_v45, 0.0 }
0x1924   :  { %2614 = vadd.xlane.f32.xlu0 %v2613_v43  ;;  %2611 = vadd.xlane.f32.xlu1 %v2610_v32 }
0x1987   :  { %v2594_v1 = vpop.xlane.xlu1 %2593 }
0x1988   :  { %v2598_v3 = vmul.f32 %v2594_v1, %v4123_v19 }
0x198a   :  { %v4977_v44 = vsub.f32 %v2582_v30, %v2598_v3 }
0x198c   :  { %v2606_v53 = vmul.f32 %v4977_v44, %v4977_v44 }
0x198e   :  { %v2616_v49 = vsel %vm150_vm12, %v2606_v53, 0.0 }
0x198f   :  { %2617 = vadd.xlane.f32.xlu2 %v2616_v49  ;;  %v2585_v5 = vpop.xlane.xlu1 %2584 }
0x1990   :  { %v2595_v46 = vmul.f32 %v2585_v5, %v4123_v19 }
0x1992   :  { %v4983_v56 = vsub.f32 %v2579_v38, %v2595_v46 }
0x1994   :  { %v2603_v9 = vmul.f32 %v4983_v56, %v4983_v56 }
0x1996   :  { %v2607_v12 = vsel %vm150_vm12, %v2603_v9, 0.0 }
0x1997   :  { %v2615_v16 = vpop.xlane.xlu0 %2614  ;;  %2608 = vadd.xlane.f32.xlu2 %v2607_v12  ;;  %v2612_v52 = vpop.xlane.xlu1 %2611 }
0x1998   :  { %v2621_v40 = vmul.f32 %v2615_v16, %v4123_v19  ;;  %v2620_v59 = vmul.f32 %v2612_v52, %v4123_v19 }
0x199a   :  { %v2625_v58 = vadd.f32 1e-05, %v2621_v40  ;;  %v2624_v60 = vadd.f32 1e-05, %v2620_v59 }
0x199c   :  { %3429 = vrsqrt.f32 %v2625_v58  ;;  %vm2653_vm8 = vweird.f32 %v2625_v58  ;;  %vm2643_vm9 = vweird.f32 %v2624_v60 }
0x199d   :  { %3431 = vrsqrt.f32 %v2624_v60 }
0x19a2   :  { %v3430_v7 = vpop.eup %3429 }
0x19a3   :  { %v3432_v18 = vpop.eup %3431  ;;  %v2648_v25 = vmul.f32 %v3430_v7, %v2625_v58  ;;  %vm2654_vm2 = vweird.f32 %v3430_v7 }
0x19a4   :  { %v2638_v11 = vmul.f32 %v3432_v18, %v2624_v60  ;;  %vm2644_vm3 = vweird.f32 %v3432_v18  ;;  %vm2655_vm1 = vmor %vm2653_vm8, %vm2654_vm2 }
0x19a5   :  { %v2649_v61 = vmul.f32 %v3430_v7, %v2648_v25  ;;  %vm2645_vm10 = vmor %vm2643_vm9, %vm2644_vm3 }
0x19a6   :  { %v2639_v14 = vmul.f32 %v3432_v18, %v2638_v11 }
0x19a7   :  { %v2650_v20 = vmul.f32 0.5, %v2649_v61 }
0x19a8   :  { %v2640_v39 = vmul.f32 0.5, %v2639_v14 }
0x19a9   :  { %v2651_v55 = vsub.f32 1.5, %v2650_v20 }
0x19aa   :  { %v2641_v42 = vsub.f32 1.5, %v2640_v39 }
0x19ab   :  { %v2652_v15 = vmul.f32 %v3430_v7, %v2651_v55 }
0x19ac   :  { %v2642_v41 = vmul.f32 %v3432_v18, %v2641_v42 }
0x19ad   :  { %v2656_v35 = vsel %vm2655_vm1, %v3430_v7, %v2652_v15 }
0x19ae   :  { %v2669_v24 = vmul.f32 %v2656_v35, %v2601_v27  ;;  %v2646_v50 = vsel %vm2645_vm10, %v3432_v18, %v2642_v41 }
0x19af   :  { %v2668_v63 = vmul.f32 %v2646_v50, %v2600_v17 }
0x19b0   :  { %v2674_v31 = vmul.f32 %v2671_v2, %v2669_v24 }
0x19b1   :  { %v2673_v57 = vmul.f32 %v2671_v2, %v2668_v63 }
0x19b2   :  { %v2679_v36 = vadd.f32 %v2676_v51, %v2674_v31 }
0x19b3   :  { %v2678_v0 = vadd.f32 %v2676_v51, %v2673_v57 }
0x19b4   :  { %2683 = vst.msk [vmem:[#allocation2 + $0x10] sm:$0xff] %vm150_vm12, %v2679_v36 }
0x19b5   :  { %2682 = vst.msk [vmem:[#allocation2 + $0x8] sm:$0xff] %vm150_vm12, %v2678_v0 }
0x19bb   :  { %v2687_v28 = vld [vmem:[#allocation2 + $0x10] sm:$0xff] }
0x19bc   :  { %v2695_v23 = vsel %vm150_vm12, %v2687_v28, 0.0  ;;  %v2686_v10 = vld [vmem:[#allocation2 + $0x8] sm:$0xff] }
0x19bd   :  { %2696 = vadd.xlane.f32.xlu1 %v2695_v23  ;;  %v2692_v29 = vsel %vm150_vm12, %v2686_v10, 0.0 }
0x19be   :  { %2693 = vadd.xlane.f32.xlu2 %v2692_v29 }
0x1a02   :  { %v2618_v6 = vpop.xlane.xlu2 %2617 }
0x1a03   :  { %v2622_v8 = vmul.f32 %v2618_v6, %v4123_v19 }
0x1a05   :  { %v2626_v33 = vadd.f32 1e-05, %v2622_v8 }
0x1a07   :  { %3433 = vrsqrt.f32 %v2626_v33  ;;  %vm2663_vm11 = vweird.f32 %v2626_v33 }
0x1a0a   :  { %v2609_v62 = vpop.xlane.xlu2 %2608 }
0x1a0b   :  { %v2619_v47 = vmul.f32 %v2609_v62, %v4123_v19 }
0x1a0d   :  { %v3434_v30 = vpop.eup %3433  ;;  %v2623_v4 = vadd.f32 1e-05, %v2619_v47 }
0x1a0e   :  { %v2658_v37 = vmul.f32 %v3434_v30, %v2626_v33  ;;  %vm2664_vm0 = vweird.f32 %v3434_v30 }
0x1a0f   :  { %3435 = vrsqrt.f32 %v2623_v4  ;;  %vm2665_vm4 = vmor %vm2663_vm11, %vm2664_vm0  ;;  %vm2633_vm6 = vweird.f32 %v2623_v4 }
0x1a10   :  { %v2659_v13 = vmul.f32 %v3434_v30, %v2658_v37 }
0x1a12   :  { %v2660_v38 = vmul.f32 0.5, %v2659_v13 }
0x1a14   :  { %v2661_v26 = vsub.f32 1.5, %v2660_v38 }
0x1a15   :  { %v3436_v17 = vpop.eup %3435 }
0x1a16   :  { %v2662_v54 = vmul.f32 %v3434_v30, %v2661_v26  ;;  %v2628_v22 = vmul.f32 %v3436_v17, %v2623_v4  ;;  %vm2634_vm5 = vweird.f32 %v3436_v17  ;;  %v5028_v4 = vperm.slane %v4993_v48, 2 }
0x1a17   :  { %vm2635_vm7 = vmor %vm2633_vm6, %vm2634_vm5  ;;  %v5031_v26 = vperm.slane %v4993_v48, 3  ;;  %vm2849_vm5 = vcmask 7168   ;;  %vm2854_vm6 = vcmask 15360  }
0x1a18   :  { %v2666_v34 = vsel %vm2665_vm4, %v3434_v30, %v2662_v54  ;;  %v2629_v27 = vmul.f32 %v3436_v17, %v2628_v22  ;;  %v3034_v22 = vld [vmem:[%s5112_s7 + $0x50] sm:$0xff] }
0x1a19   :  { %v2670_v21 = vmul.f32 %v2666_v34, %v4977_v44  ;;  %v3030_v34 = vld [vmem:[%s5112_s7 + $0x30] sm:$0xff] }
0x1a1a   :  { %v2630_v45 = vmul.f32 0.5, %v2629_v27  ;;  %v2789_v27 = vld [vmem:[%s5112_s7 + $0x10] sm:$0xff] }
0x1a1b   :  { %v2675_v43 = vmul.f32 %v2671_v2, %v2670_v21 }
0x1a1c   :  { %v2631_v32 = vsub.f32 1.5, %v2630_v45 }
0x1a1d   :  { %v2680_v1 = vadd.f32 %v2676_v51, %v2675_v43 }
0x1a1e   :  { %v2632_v3 = vmul.f32 %v3436_v17, %v2631_v32 }
0x1a1f   :  { %2684 = vst.msk [vmem:[#allocation2 + $0x18] sm:$0xff] %vm150_vm12, %v2680_v1 }
0x1a20   :  { %v2636_v53 = vsel %vm2635_vm7, %v3436_v17, %v2632_v3  ;;  %vm2883_vm7 = vcmask 17408  }
0x1a21   :  { %v2667_v49 = vmul.f32 %v2636_v53, %v4983_v56 }
0x1a23   :  { %v2672_v5 = vmul.f32 %v2671_v2, %v2667_v49 }
0x1a25   :  { %v2677_v46 = vadd.f32 %v2676_v51, %v2672_v5 }
0x1a26   :  { %v2688_v9 = vld [vmem:[#allocation2 + $0x18] sm:$0xff] }
0x1a27   :  { %2681 = vst.msk [vmem:[#allocation2] sm:$0xff] %vm150_vm12, %v2677_v46  ;;  %v2698_v44 = vsel %vm150_vm12, %v2688_v9, 0.0  ;;  %v3033_v46 = vld [vmem:[%s5112_s7 + $0x48] sm:$0xff] }
0x1a28   :  { %2699 = vadd.xlane.f32.xlu0 %v2698_v44  ;;  %v2788_v44 = vld [vmem:[%s5112_s7 + $0x8] sm:$0xff] }
0x1a2e   :  { %v2685_v12 = vld [vmem:[#allocation2] sm:$0xff] }
0x1a2f   :  { %v2689_v16 = vsel %vm150_vm12, %v2685_v12, 0.0 }
0x1a30   :  { %2690 = vadd.xlane.f32.xlu0 %v2689_v16  ;;  %v2697_v52 = vpop.xlane.xlu1 %2696 }
0x1a31   :  { %v2694_v40 = vpop.xlane.xlu2 %2693  ;;  %v2703_v59 = vmul.f32 %v2697_v52, %v4123_v19 }
0x1a32   :  { %v2702_v58 = vmul.f32 %v2694_v40, %v4123_v19 }
0x1a33   :  { %v2707_v60 = vsub.f32 %v2687_v28, %v2703_v59 }
0x1a34   :  { %v2706_v56 = vsub.f32 %v2686_v10, %v2702_v58 }
0x1a35   :  { %v2711_v7 = vmul.f32 %v2707_v60, %v2707_v60 }
0x1a36   :  { %v2710_v18 = vmul.f32 %v2706_v56, %v2706_v56 }
0x1a37   :  { %v2719_v25 = vsel %vm150_vm12, %v2711_v7, 0.0 }
0x1a38   :  { %v2716_v11 = vsel %vm150_vm12, %v2710_v18, 0.0  ;;  %2720 = vadd.xlane.f32.xlu2 %v2719_v25 }
0x1a39   :  { %2717 = vadd.xlane.f32.xlu0 %v2716_v11 }
0x1a9b   :  { %v2700_v61 = vpop.xlane.xlu0 %2699 }
0x1a9c   :  { %v2704_v14 = vmul.f32 %v2700_v61, %v4123_v19 }
0x1a9e   :  { %v5014_v20 = vsub.f32 %v2688_v9, %v2704_v14  ;;  %v3029_v9 = vld [vmem:[%s5112_s7 + $0x28] sm:$0xff] }
0x1aa0   :  { %v2712_v39 = vmul.f32 %v5014_v20, %v5014_v20 }
0x1aa2   :  { %v2722_v55 = vsel %vm150_vm12, %v2712_v39, 0.0 }
0x1aa3   :  { %2723 = vadd.xlane.f32.xlu1 %v2722_v55  ;;  %v2691_v42 = vpop.xlane.xlu0 %2690 }
0x1aa4   :  { %v2701_v15 = vmul.f32 %v2691_v42, %v4123_v19 }
0x1aa6   :  { %v5020_v2 = vsub.f32 %v2685_v12, %v2701_v15 }
0x1aa8   :  { %v2709_v41 = vmul.f32 %v5020_v2, %v5020_v2 }
0x1aaa   :  { %v2713_v35 = vsel %vm150_vm12, %v2709_v41, 0.0 }
0x1aab   :  { %2714 = vadd.xlane.f32.xlu1 %v2713_v35  ;;  %v2721_v51 = vpop.xlane.xlu2 %2720 }
0x1aac   :  { %v2718_v24 = vpop.xlane.xlu0 %2717  ;;  %v2727_v50 = vmul.f32 %v2721_v51, %v4123_v19 }
0x1aad   :  { %v2726_v63 = vmul.f32 %v2718_v24, %v4123_v19 }
0x1aae   :  { %v2731_v31 = vadd.f32 1e-05, %v2727_v50 }
0x1aaf   :  { %v2730_v57 = vadd.f32 1e-05, %v2726_v63 }
0x1ab0   :  { %3437 = vrsqrt.f32 %v2731_v31  ;;  %vm2759_vm15 = vweird.f32 %v2731_v31 }
0x1ab1   :  { %3439 = vrsqrt.f32 %v2730_v57  ;;  %vm2749_vm2 = vweird.f32 %v2730_v57 }
0x1ab6   :  { %v3438_v36 = vpop.eup %3437 }
0x1ab7   :  { %v3440_v0 = vpop.eup %3439  ;;  %v2754_v28 = vmul.f32 %v3438_v36, %v2731_v31  ;;  %vm2760_vm13 = vweird.f32 %v3438_v36 }
0x1ab8   :  { %v2744_v23 = vmul.f32 %v3440_v0, %v2730_v57  ;;  %vm2750_vm14 = vweird.f32 %v3440_v0  ;;  %vm2761_vm3 = vmor %vm2759_vm15, %vm2760_vm13  ;;  %v3035_v57 = vld [vmem:[%s5112_s7 + $0x58] sm:$0xff] }
0x1ab9   :  { %v2755_v10 = vmul.f32 %v3438_v36, %v2754_v28  ;;  %vm2751_vm8 = vmor %vm2749_vm2, %vm2750_vm14 }
0x1aba   :  { %v2745_v29 = vmul.f32 %v3440_v0, %v2744_v23 }
0x1abb   :  { %v2756_v6 = vmul.f32 0.5, %v2755_v10 }
0x1abc   :  { %v2746_v8 = vmul.f32 0.5, %v2745_v29 }
0x1abd   :  { %v2757_v33 = vsub.f32 1.5, %v2756_v6 }
0x1abe   :  { %v2747_v62 = vsub.f32 1.5, %v2746_v8 }
0x1abf   :  { %v2758_v47 = vmul.f32 %v3438_v36, %v2757_v33 }
0x1ac0   :  { %v2748_v30 = vmul.f32 %v3440_v0, %v2747_v62 }
0x1ac1   :  { %v2762_v37 = vsel %vm2761_vm3, %v3438_v36, %v2758_v47  ;;  %v3031_v36 = vld [vmem:[%s5112_s7 + $0x38] sm:$0xff] }
0x1ac2   :  { %v2752_v13 = vsel %vm2751_vm8, %v3440_v0, %v2748_v30  ;;  %v2775_v38 = vmul.f32 %v2762_v37, %v2707_v60  ;;  %v2790_v0 = vld [vmem:[%s5112_s7 + $0x18] sm:$0xff]  ;;  %v3032_v37 = vld [vmem:[%s5112_s7 + $0x40] sm:$0xff] }
0x1ac3   :  { %v2774_v17 = vmul.f32 %v2752_v13, %v2706_v56  ;;  %v3028_v13 = vld [vmem:[%s5112_s7 + $0x20] sm:$0xff] }
0x1ac4   :  { %v2780_v54 = vmul.f32 %v5028_v4, %v2775_v38 }
0x1ac5   :  { %v2779_v45 = vmul.f32 %v5028_v4, %v2774_v17 }
0x1ac6   :  { %v2785_v21 = vadd.f32 %v5031_v26, %v2780_v54 }
0x1ac7   :  { %v2784_v5 = vadd.f32 %v5031_v26, %v2779_v45 }
0x1ac8   :  { %v2835_v43 = vmul.f32 %v3034_v22, %v2785_v21  ;;  %v2814_v32 = vmul.f32 %v3030_v34, %v2785_v21  ;;  %v2793_v1 = vmul.f32 %v2789_v27, %v2785_v21 }
0x1ac9   :  { %v2834_v12 = vmul.f32 %v3033_v46, %v2784_v5  ;;  %v2813_v16 = vmul.f32 %v3029_v9, %v2784_v5  ;;  %v2792_v52 = vmul.f32 %v2788_v44, %v2784_v5 }
0x1aca   :  { %v2843_v3 = vsel %vm150_vm12, %v2835_v43, 0.0  ;;  %v2822_v53 = vsel %vm150_vm12, %v2814_v32, 0.0  ;;  %v2801_v49 = vsel %vm150_vm12, %v2793_v1, 0.0 }
0x1acb   :  { %2844 = vadd.xlane.f32.xlu1 %v2843_v3  ;;  %2823 = vadd.xlane.f32.xlu0 %v2822_v53  ;;  %v2840_v40 = vsel %vm150_vm12, %v2834_v12, 0.0  ;;  %v2819_v59 = vsel %vm150_vm12, %v2813_v16, 0.0  ;;  %v2798_v58 = vsel %vm150_vm12, %v2792_v52, 0.0 }
0x1acc   :  { %2802 = vadd.xlane.f32.xlu2 %v2801_v49 }
0x1ad3   :  { %2841 = vadd.xlane.f32.xlu1 %v2840_v40  ;;  %2820 = vadd.xlane.f32.xlu0 %v2819_v59 }
0x1ad4   :  { %2799 = vadd.xlane.f32.xlu2 %v2798_v58 }
0x1b16   :  { %v2724_v60 = vpop.xlane.xlu1 %2723 }
0x1b17   :  { %v2728_v56 = vmul.f32 %v2724_v60, %v4123_v19  ;;  %v38_v60 = vld [vmem:[%s5108_s3 + $0x28] sm:$0x3] }
0x1b19   :  { %v2732_v7 = vadd.f32 1e-05, %v2728_v56 }
0x1b1b   :  { %3441 = vrsqrt.f32 %v2732_v7  ;;  %vm2769_vm9 = vweird.f32 %v2732_v7 }
0x1b1e   :  { %v2715_v18 = vpop.xlane.xlu1 %2714 }
0x1b1f   :  { %v2725_v25 = vmul.f32 %v2715_v18, %v4123_v19 }
0x1b21   :  { %v3442_v11 = vpop.eup %3441  ;;  %v2729_v61 = vadd.f32 1e-05, %v2725_v25 }
0x1b22   :  { %v2764_v14 = vmul.f32 %v3442_v11, %v2732_v7  ;;  %vm2770_vm1 = vweird.f32 %v3442_v11  ;;  %v2859_v7 = vperm.slane %v4993_v48, 4 }
0x1b23   :  { %3443 = vrsqrt.f32 %v2729_v61  ;;  %vm2771_vm10 = vmor %vm2769_vm9, %vm2770_vm1  ;;  %vm2739_vm11 = vweird.f32 %v2729_v61 }
0x1b24   :  { %v2765_v39 = vmul.f32 %v3442_v11, %v2764_v14 }
0x1b26   :  { %v2766_v55 = vmul.f32 0.5, %v2765_v39 }
0x1b28   :  { %v2767_v42 = vsub.f32 1.5, %v2766_v55 }
0x1b29   :  { %v3444_v15 = vpop.eup %3443 }
0x1b2a   :  { %v2768_v41 = vmul.f32 %v3442_v11, %v2767_v42  ;;  %v2734_v35 = vmul.f32 %v3444_v15, %v2729_v61  ;;  %vm2740_vm0 = vweird.f32 %v3444_v15 }
0x1b2b   :  { %vm2741_vm4 = vmor %vm2739_vm11, %vm2740_vm0 }
0x1b2c   :  { %v2772_v51 = vsel %vm2771_vm10, %v3442_v11, %v2768_v41  ;;  %v2735_v24 = vmul.f32 %v3444_v15, %v2734_v35 }
0x1b2d   :  { %v2776_v50 = vmul.f32 %v2772_v51, %v5014_v20 }
0x1b2e   :  { %v2736_v63 = vmul.f32 0.5, %v2735_v24 }
0x1b2f   :  { %v2781_v19 = vmul.f32 %v5028_v4, %v2776_v50 }
0x1b30   :  { %v2737_v31 = vsub.f32 1.5, %v2736_v63 }
0x1b31   :  { %v2786_v28 = vadd.f32 %v5031_v26, %v2781_v19 }
0x1b32   :  { %v2738_v20 = vmul.f32 %v3444_v15, %v2737_v31 }
0x1b33   :  { %v2836_v23 = vmul.f32 %v3035_v57, %v2786_v28  ;;  %v2815_v10 = vmul.f32 %v3031_v36, %v2786_v28  ;;  %v2794_v29 = vmul.f32 %v2790_v0, %v2786_v28 }
0x1b34   :  { %v2742_v6 = vsel %vm2741_vm4, %v3444_v15, %v2738_v20 }
0x1b35   :  { %v2773_v8 = vmul.f32 %v2742_v6, %v5020_v2  ;;  %v2846_v33 = vsel %vm150_vm12, %v2836_v23, 0.0  ;;  %v2825_v62 = vsel %vm150_vm12, %v2815_v10, 0.0  ;;  %v2804_v47 = vsel %vm150_vm12, %v2794_v29, 0.0  ;;  %v2787_v2 = vld [vmem:[%s5112_s7] sm:$0xff] }
0x1b36   :  { %2847 = vadd.xlane.f32.xlu1 %v2846_v33  ;;  %2826 = vadd.xlane.f32.xlu0 %v2825_v62 }
0x1b37   :  { %2805 = vadd.xlane.f32.xlu2 %v2804_v47  ;;  %v2778_v30 = vmul.f32 %v5028_v4, %v2773_v8 }
0x1b39   :  { %v2783_v38 = vadd.f32 %v5031_v26, %v2778_v30 }
0x1b3b   :  { %v2833_v17 = vmul.f32 %v3032_v37, %v2783_v38  ;;  %v2812_v54 = vmul.f32 %v3028_v13, %v2783_v38  ;;  %v2791_v22 = vmul.f32 %v2787_v2, %v2783_v38 }
0x1b3d   :  { %v2837_v34 = vsel %vm150_vm12, %v2833_v17, 0.0  ;;  %v2816_v4 = vsel %vm150_vm12, %v2812_v54, 0.0  ;;  %v2795_v27 = vsel %vm150_vm12, %v2791_v22, 0.0 }
0x1b3e   :  { %2838 = vadd.xlane.f32.xlu1 %v2837_v34  ;;  %2817 = vadd.xlane.f32.xlu0 %v2816_v4  ;;  %v2824_v21 = vpop.xlane.xlu0 %2823  ;;  %v2845_v45 = vpop.xlane.xlu1 %2844 }
0x1b3f   :  { %2796 = vadd.xlane.f32.xlu2 %v2795_v27  ;;  %v2803_v43 = vpop.xlane.xlu2 %2802 }
0x1b40   :  { %v2852_v5 = vsel %vm2849_vm5, %v2803_v43, %v2824_v21 }
0x1b41   :  { %v2857_v12 = vsel %vm2854_vm6, %v2852_v5, %v2845_v45 }
0x1b46   :  { %v2821_v32 = vpop.xlane.xlu0 %2820  ;;  %v2842_v1 = vpop.xlane.xlu1 %2841 }
0x1b47   :  { %v2800_v3 = vpop.xlane.xlu2 %2799 }
0x1b48   :  { %v2851_v44 = vsel %vm2849_vm5, %v2800_v3, %v2821_v32 }
0x1b49   :  { %v2856_v16 = vsel %vm2854_vm6, %v2851_v44, %v2842_v1 }
0x1ba9   :  { %v2827_v26 = vpop.xlane.xlu0 %2826  ;;  %v2848_v53 = vpop.xlane.xlu1 %2847 }
0x1baa   :  { %v2806_v49 = vpop.xlane.xlu2 %2805 }
0x1bab   :  { %v2853_v46 = vsel %vm2849_vm5, %v2806_v49, %v2827_v26 }
0x1bac   :  { %v2858_v9 = vsel %vm2854_vm6, %v2853_v46, %v2848_v53 }
0x1bad   :  { %2875 = vmatpush.msrb.mxu1 %v2858_v9 }
0x1baf   :  { %2876 = vmatpush.msrb.mxu1 %v2857_v12 }
0x1bb1   :  { %2877 = vmatpush.msrb.mxu1 %v2856_v16  ;;  %v2818_v52 = vpop.xlane.xlu0 %2817  ;;  %v2839_v40 = vpop.xlane.xlu1 %2838 }
0x1bb2   :  { %v2797_v59 = vpop.xlane.xlu2 %2796 }
0x1bb3   :  { %v2850_v58 = vsel %vm2849_vm5, %v2797_v59, %v2818_v52 }
0x1bb4   :  { %v2855_v56 = vsel %vm2854_vm6, %v2850_v58, %v2839_v40 }
0x1bb5   :  { %2878 = vmatpush.msrb.mxu1 %v2855_v56 }
0x1bb6   :  { %3036 = vmatmul.msk.f32.vlgmr.msrb.gmra.mxu1 %vm150_vm12, %v38_v60 }
0x1c33   :  { %v2880_v18 = vpop.f32.mrf.mxu1 }
0x1c34   :  { %v2881_v25 = vadd.f32 %v2880_v18, %v2859_v7 }
0x1c36   :  { %2884 = vst.msk [vmem:[#allocation3] sm:$0x3] %vm2883_vm7, %v2881_v25 }
0x1c37   :  { %2895 = dma.vmem_to_hbm [thread:$0]  %s2891_s6, 32, %s2893_s25, [#allocation4]  }
0x1c38   :  { %3483 = dma.done.wait [#allocation4], 32  }
0x1c39   :  { %3484 = vsyncadd [#allocation4], 4294967264 }
0x1c3a   :  { %2900 = vsyncpa [#allocation4], 1 }

</bundles_post_ra>
